<compile_context>
chip_gen: v5e
topology: v5e:2x2
jax: 0.10.0
libtpu: 0.0.40
codegen_flags: <defaults>
</compile_context>

<pallas_src>
import jax
import jax.numpy as jnp
from jax import lax
from jax.experimental import pallas as pl
from jax.experimental.pallas import tpu as pltpu

EPS = 1e-5
LANE = 128


def _rup(c, m=LANE):
    return ((c + m - 1) // m) * m


# ------------------------------ fused kernel --------------------------------

def _bottleneck_kernel(x_ref, w1_ref, t1_ref, w2_ref, t2_ref, w3_ref, t3_ref,
                       o_ref, y1p_ref):
    """Fused bottleneck for one batch element.

    x_ref  : (1, H*W, Ci)  f32 input (channel-padded)
    w*_ref : bf16 conv weights with BN scale pre-folded
    t*_ref : (1, C) f32 BN shifts
    y1p_ref: (H+2, W+2, Cm) f32 VMEM scratch holding zero-padded y1 so the
             3x3 conv is 9 shifted-window MXU matmuls (no HBM round-trip).
    """
    Hp, Wp, Cm = y1p_ref.shape
    H, W = Hp - 2, Wp - 2

    x = x_ref[0]                                               # (H*W, Ci) f32

    # ---- stage 1: 1x1 conv (+ folded BN) + ReLU -----------------------------
    y1 = jnp.dot(x.astype(jnp.bfloat16), w1_ref[...],
                 preferred_element_type=jnp.float32)
    y1 = jnp.maximum(y1 + t1_ref[...], 0.0)                    # (H*W, Cm) f32

    # ---- stage 2: 3x3 conv (pad=1, stride=1) via padded VMEM scratch --------
    # Zero only the top/bottom border rows; left/right zero columns are padded
    # into the interior row-strip in registers, so the interior store is a
    # single full-width (sublane-aligned) strip write.
    zero_row = jnp.zeros((Wp, Cm), jnp.float32)
    y1p_ref[0] = zero_row
    y1p_ref[Hp - 1] = zero_row
    y1p_ref[1:H + 1] = jnp.pad(y1.reshape(H, W, Cm),
                               ((0, 0), (1, 1), (0, 0)))        # (H, Wp, Cm)

    acc = jnp.zeros((H * W, Cm), jnp.float32)
    for k in range(9):                                          # static unroll -> 9 MXU matmuls
        dy, dx = k // 3, k % 3
        win = y1p_ref[dy:dy + H, dx:dx + W, :].reshape(H * W, Cm)
        acc = acc + jnp.dot(win.astype(jnp.bfloat16), w2_ref[k],
                            preferred_element_type=jnp.float32)
    y2 = jnp.maximum(acc + t2_ref[...], 0.0)                    # (H*W, Cm) f32

    # ---- stage 3: 1x1 conv (+ folded BN) + residual + ReLU ------------------
    y3 = jnp.dot(y2.astype(jnp.bfloat16), w3_ref[...],
                 preferred_element_type=jnp.float32)
    o_ref[0] = jnp.maximum(y3 + t3_ref[...] + x, 0.0).astype(o_ref.dtype)


# ----------------------------- parameters / BN -------------------------------

def _fold_bn(conv_bias, gamma, beta, mean, var):
    scale = gamma / jnp.sqrt(var + EPS)
    shift = (conv_bias - mean) * scale + beta
    return scale.reshape(1, -1), shift.reshape(1, -1)


def _prepare_weights(p, cin):
    """Fold BN scale into conv weights, lane-pad channel dims to 128, cast the
    matmul operands to bf16 (shifts stay f32)."""
    cm, cout = p['w1'].shape[1], p['w3'].shape[1]
    ci, cmp_, cop = _rup(cin), _rup(cm), _rup(cout)

    s1, t1 = _fold_bn(p['cb1'], **p['bn1'])
    s2, t2 = _fold_bn(p['cb2'], **p['bn2'])
    s3, t3 = _fold_bn(p['cb3'], **p['bn3'])

    w1 = jnp.zeros((ci, cmp_), jnp.float32).at[:cin, :cm].set(p['w1'] * s1)
    w2 = jnp.zeros((9, cmp_, cmp_), jnp.float32).at[:, :cm, :cm].set(p['w2'] * s2)
    w3 = jnp.zeros((cmp_, cop), jnp.float32).at[:cm, :cout].set(p['w3'] * s3)
    t1p = jnp.zeros((1, cmp_), jnp.float32).at[:, :cm].set(t1)
    t2p = jnp.zeros((1, cmp_), jnp.float32).at[:, :cm].set(t2)
    t3p = jnp.zeros((1, cop), jnp.float32).at[:, :cout].set(t3)
    return (w1.astype(jnp.bfloat16), t1p,
            w2.astype(jnp.bfloat16), t2p,
            w3.astype(jnp.bfloat16), t3p, ci, cmp_, cop)


def init_bottleneck_params(key, in_channels, out_channels, expansion=4):
    cm = out_channels
    cout = out_channels * expansion
    ks = jax.random.split(key, 9)

    def bn_params(k, c):
        k1, k2, k3, k4 = jax.random.split(k, 4)
        return dict(gamma=1.0 + 0.1 * jax.random.normal(k1, (c,)),
                    beta=0.1 * jax.random.normal(k2, (c,)),
                    mean=0.1 * jax.random.normal(k3, (c,)),
                    var=0.5 + jnp.abs(jax.random.normal(k4, (c,))))

    p = dict(
        w1=0.1 * jax.random.normal(ks[0], (in_channels, cm)),   # 1x1 conv: (Cin, Cm)
        cb1=0.05 * jax.random.normal(ks[1], (cm,)),
        bn1=bn_params(ks[2], cm),
        w2=0.1 * jax.random.normal(ks[3], (9, cm, cm)),         # 3x3 taps: (ky*3+kx, Cin, Cout)
        cb2=0.05 * jax.random.normal(ks[4], (cm,)),
        bn2=bn_params(ks[5], cm),
        w3=0.1 * jax.random.normal(ks[6], (cm, cout)),          # 1x1 conv: (Cm, Cout)
        cb3=0.05 * jax.random.normal(ks[7], (cout,)),
        bn3=bn_params(ks[8], cout),
    )
    return jax.tree_util.tree_map(lambda a: a.astype(jnp.float32), p)


# ------------------------------- forward pass --------------------------------

def bottleneck_forward(x_nchw, p):
    # Module is constructed with defaults: stride=1, i_downsample=None, so the
    # residual add requires in_channels == out_channels * expansion.
    # TODO(synk): stride>1 / i_downsample path and training-mode (batch-stats)
    # BatchNorm are not implemented; BN uses running-stats (eval) semantics.
    # TODO(synk): for very large H*W a spatial halo-tiled grid would bound
    # per-step VMEM further; at ResNet bottleneck shapes a per-image block fits.
    N, Cin, H, W = x_nchw.shape
    Cout = p['w3'].shape[1]
    assert Cin == Cout, "identity residual requires Cin == Cout * expansion"

    w1, t1, w2, t2, w3, t3, Ci, Cmp, Cop = _prepare_weights(p, Cin)

    x = jnp.transpose(x_nchw, (0, 2, 3, 1)).astype(jnp.float32)   # NHWC
    x = x.reshape(N, H * W, Cin)
    x = jnp.pad(x, ((0, 0), (0, 0), (0, Ci - Cin)))               # lane-pad channels

    out = pl.pallas_call(
        _bottleneck_kernel,
        out_shape=jax.ShapeDtypeStruct((N, H * W, Cop), jnp.float32),
        grid=(N,),
        in_specs=[
            pl.BlockSpec((1, H * W, Ci), lambda n: (n, 0, 0)),    # x (per image)
            pl.BlockSpec((Ci, Cmp), lambda n: (0, 0)),            # w1 (resident)
            pl.BlockSpec((1, Cmp), lambda n: (0, 0)),             # t1
            pl.BlockSpec((9, Cmp, Cmp), lambda n: (0, 0, 0)),     # w2
            pl.BlockSpec((1, Cmp), lambda n: (0, 0)),             # t2
            pl.BlockSpec((Cmp, Cop), lambda n: (0, 0)),           # w3
            pl.BlockSpec((1, Cop), lambda n: (0, 0)),             # t3
        ],
        out_specs=pl.BlockSpec((1, H * W, Cop), lambda n: (n, 0, 0)),
        scratch_shapes=[pltpu.VMEM((H + 2, W + 2, Cmp), jnp.float32)],
        compiler_params=pltpu.CompilerParams(
            dimension_semantics=("parallel",),
            vmem_limit_bytes=32 * 1024 * 1024),
    )(x, w1, t1, w2, t2, w3, t3)

    out = out[:, :, :Cout].reshape(N, H, W, Cout)
    return jnp.transpose(out, (0, 3, 1, 2))


# ------------------------------- pure-JAX ref ---------------------------------

def reference_forward(x_nchw, p):
    x = jnp.transpose(x_nchw, (0, 2, 3, 1)).astype(jnp.float32)
    dn = ('NHWC', 'HWIO', 'NHWC')

    def bn(y, bp):
        return (y - bp['mean']) / jnp.sqrt(bp['var'] + EPS) * bp['gamma'] + bp['beta']

    Cin = x.shape[-1]
    Cm = p['w1'].shape[1]
    Cout = p['w3'].shape[1]
    y = lax.conv_general_dilated(x, p['w1'].reshape(1, 1, Cin, Cm), (1, 1), 'VALID',
                                 dimension_numbers=dn) + p['cb1']
    y = jax.nn.relu(bn(y, p['bn1']))
    y = lax.conv_general_dilated(y, p['w2'].reshape(3, 3, Cm, Cm), (1, 1),
                                 ((1, 1), (1, 1)), dimension_numbers=dn) + p['cb2']
    y = jax.nn.relu(bn(y, p['bn2']))
    y = lax.conv_general_dilated(y, p['w3'].reshape(1, 1, Cm, Cout), (1, 1), 'VALID',
                                 dimension_numbers=dn) + p['cb3']
    y = bn(y, p['bn3'])
    y = jax.nn.relu(y + x)
    return jnp.transpose(y, (0, 3, 1, 2))


if __name__ == "__main__":
    key = jax.random.PRNGKey(0)
    k_x, k_p = jax.random.split(key)

    in_channels, out_channels = 16, 4   # out_channels * expansion == in_channels
    N, H, W = 2, 16, 16
    x = jax.random.normal(k_x, (N, in_channels, H, W), jnp.float32)
    params = init_bottleneck_params(k_p, in_channels, out_channels)

    out = jax.jit(bottleneck_forward)(x, params)
    out = jax.block_until_ready(out)

    ref = reference_forward(x, params)
    assert out.shape == (N, in_channels, H, W)
    max_err = float(jnp.max(jnp.abs(out - ref)))
    # bf16 matmul operands (f32 accumulation) -> allow bf16-level tolerance.
    assert jnp.allclose(out, ref, atol=3e-2, rtol=3e-2), max_err
    print("KERNEL_OK")
</pallas_src>

<mosaic_0001>
module attributes {stable_mosaic.version = 11 : i64} {
  func.func @_bottleneck_kernel(%arg0: i32, %arg1: memref<1x256x128xf32, #tpu.memory_space<vmem>>, %arg2: memref<128x128xbf16, #tpu.memory_space<vmem>>, %arg3: memref<1x128xf32, #tpu.memory_space<vmem>>, %arg4: memref<9x128x128xbf16, #tpu.memory_space<vmem>>, %arg5: memref<1x128xf32, #tpu.memory_space<vmem>>, %arg6: memref<128x128xbf16, #tpu.memory_space<vmem>>, %arg7: memref<1x128xf32, #tpu.memory_space<vmem>>, %arg8: memref<1x256x128xf32, #tpu.memory_space<vmem>>, %arg9: memref<18x18x128xf32, #tpu.memory_space<vmem>>) attributes {dimension_semantics = [#tpu.dimension_semantics<parallel>], iteration_bounds = array<i64: 2>, scalar_prefetch = 0 : i64, scratch_operands = 1 : i64, tpu.core_type = #tpu.core_type<tc>, window_params = [{transform_indices = @transform_0, window_bounds = array<i64: 1, 256, 128>}, {pipeline_mode = #tpu.pipeline_mode<synchronous>, transform_indices = @transform_1, window_bounds = array<i64: 128, 128>}, {pipeline_mode = #tpu.pipeline_mode<synchronous>, transform_indices = @transform_2, window_bounds = array<i64: 1, 128>}, {pipeline_mode = #tpu.pipeline_mode<synchronous>, transform_indices = @transform_3, window_bounds = array<i64: 9, 128, 128>}, {pipeline_mode = #tpu.pipeline_mode<synchronous>, transform_indices = @transform_4, window_bounds = array<i64: 1, 128>}, {pipeline_mode = #tpu.pipeline_mode<synchronous>, transform_indices = @transform_5, window_bounds = array<i64: 128, 128>}, {pipeline_mode = #tpu.pipeline_mode<synchronous>, transform_indices = @transform_6, window_bounds = array<i64: 1, 128>}, {transform_indices = @transform_7, window_bounds = array<i64: 1, 256, 128>}]} {
    %c0 = arith.constant 0 : index
    %c0_0 = arith.constant 0 : index
    %c0_1 = arith.constant 0 : index
    %0 = vector.load %arg1[%c0, %c0_0, %c0_1] : memref<1x256x128xf32, #tpu.memory_space<vmem>>, vector<1x256x128xf32>
    %1 = vector.shape_cast %0 : vector<1x256x128xf32> to vector<256x128xf32>
    %2 = arith.truncf %1 : vector<256x128xf32> to vector<256x128xbf16>
    %c0_2 = arith.constant 0 : index
    %c0_3 = arith.constant 0 : index
    %3 = vector.load %arg2[%c0_2, %c0_3] : memref<128x128xbf16, #tpu.memory_space<vmem>>, vector<128x128xbf16>
    %cst = arith.constant dense<0.000000e+00> : vector<256x128xf32>
    %4 = tpu.matmul %2, %3, %cst {dimension_numbers = #tpu.dot_dimension_numbers<[1], [0], [0], [1], [0, 0, 1, 1], [], []>} : vector<256x128xbf16>, vector<128x128xbf16>, vector<256x128xf32> -> vector<256x128xf32>
    %c0_4 = arith.constant 0 : index
    %c0_5 = arith.constant 0 : index
    %5 = vector.load %arg3[%c0_4, %c0_5] : memref<1x128xf32, #tpu.memory_space<vmem>>, vector<1x128xf32>
    %6 = vector.broadcast %5 : vector<1x128xf32> to vector<256x128xf32>
    %7 = arith.addf %4, %6 : vector<256x128xf32>
    %cst_6 = arith.constant 0.000000e+00 : f32
    %8 = vector.broadcast %cst_6 : f32 to vector<256x128xf32>
    %9 = arith.maximumf %7, %8 : vector<256x128xf32>
    %cst_7 = arith.constant 0.000000e+00 : f32
    %10 = vector.broadcast %cst_7 : f32 to vector<18x128xf32>
    %c0_8 = arith.constant 0 : index
    %c0_9 = arith.constant 0 : index
    %c0_10 = arith.constant 0 : index
    %11 = vector.load %arg9[%c0_8, %c0_9, %c0_10] : memref<18x18x128xf32, #tpu.memory_space<vmem>>, vector<1x18x128xf32>
    %12 = vector.shape_cast %11 : vector<1x18x128xf32> to vector<18x128xf32>
    %13 = vector.shape_cast %10 : vector<18x128xf32> to vector<1x18x128xf32>
    tpu.vector_store %arg9[%c0_8, %c0_9, %c0_10], %13 {strides = array<i32>} : memref<18x18x128xf32, #tpu.memory_space<vmem>>, vector<1x18x128xf32>,
    %c17 = arith.constant 17 : index
    %c0_11 = arith.constant 0 : index
    %c0_12 = arith.constant 0 : index
    %14 = vector.load %arg9[%c17, %c0_11, %c0_12] : memref<18x18x128xf32, #tpu.memory_space<vmem>>, vector<1x18x128xf32>
    %15 = vector.shape_cast %14 : vector<1x18x128xf32> to vector<18x128xf32>
    %16 = vector.shape_cast %10 : vector<18x128xf32> to vector<1x18x128xf32>
    tpu.vector_store %arg9[%c17, %c0_11, %c0_12], %16 {strides = array<i32>} : memref<18x18x128xf32, #tpu.memory_space<vmem>>, vector<1x18x128xf32>,
    %17 = vector.shape_cast %9 : vector<256x128xf32> to vector<16x16x128xf32>
    %c0_i32 = arith.constant 0 : i32
    %18 = arith.sitofp %c0_i32 : i32 to f32
    %19 = vector.broadcast %18 : f32 to vector<16x1x128xf32>
    %20 = tpu.concatenate %19, %17 in 1 : vector<16x1x128xf32>, vector<16x16x128xf32> -> vector<16x17x128xf32>
    %21 = vector.broadcast %18 : f32 to vector<16x1x128xf32>
    %22 = tpu.concatenate %20, %21 in 1 : vector<16x17x128xf32>, vector<16x1x128xf32> -> vector<16x18x128xf32>
    %c1 = arith.constant 1 : index
    %c0_13 = arith.constant 0 : index
    %c0_14 = arith.constant 0 : index
    %23 = vector.load %arg9[%c1, %c0_13, %c0_14] : memref<18x18x128xf32, #tpu.memory_space<vmem>>, vector<16x18x128xf32>
    tpu.vector_store %arg9[%c1, %c0_13, %c0_14], %22 {strides = array<i32>} : memref<18x18x128xf32, #tpu.memory_space<vmem>>, vector<16x18x128xf32>,
    %cst_15 = arith.constant 0.000000e+00 : f32
    %24 = vector.broadcast %cst_15 : f32 to vector<256x128xf32>
    %c0_16 = arith.constant 0 : index
    %c0_17 = arith.constant 0 : index
    %c0_18 = arith.constant 0 : index
    %25 = vector.load %arg9[%c0_16, %c0_17, %c0_18] : memref<18x18x128xf32, #tpu.memory_space<vmem>>, vector<16x16x128xf32>
    %26 = vector.shape_cast %25 : vector<16x16x128xf32> to vector<256x128xf32>
    %27 = arith.truncf %26 : vector<256x128xf32> to vector<256x128xbf16>
    %c0_19 = arith.constant 0 : index
    %c0_20 = arith.constant 0 : index
    %c0_21 = arith.constant 0 : index
    %28 = vector.load %arg4[%c0_19, %c0_20, %c0_21] : memref<9x128x128xbf16, #tpu.memory_space<vmem>>, vector<1x128x128xbf16>
    %29 = vector.shape_cast %28 : vector<1x128x128xbf16> to vector<128x128xbf16>
    %cst_22 = arith.constant dense<0.000000e+00> : vector<256x128xf32>
    %30 = tpu.matmul %27, %29, %cst_22 {dimension_numbers = #tpu.dot_dimension_numbers<[1], [0], [0], [1], [0, 0, 1, 1], [], []>} : vector<256x128xbf16>, vector<128x128xbf16>, vector<256x128xf32> -> vector<256x128xf32>
    %31 = arith.addf %24, %30 : vector<256x128xf32>
    %c0_23 = arith.constant 0 : index
    %c1_24 = arith.constant 1 : index
    %c0_25 = arith.constant 0 : index
    %32 = vector.load %arg9[%c0_23, %c1_24, %c0_25] : memref<18x18x128xf32, #tpu.memory_space<vmem>>, vector<16x16x128xf32>
    %33 = vector.shape_cast %32 : vector<16x16x128xf32> to vector<256x128xf32>
    %34 = arith.truncf %33 : vector<256x128xf32> to vector<256x128xbf16>
    %c1_26 = arith.constant 1 : index
    %c0_27 = arith.constant 0 : index
    %c0_28 = arith.constant 0 : index
    %35 = vector.load %arg4[%c1_26, %c0_27, %c0_28] : memref<9x128x128xbf16, #tpu.memory_space<vmem>>, vector<1x128x128xbf16>
    %36 = vector.shape_cast %35 : vector<1x128x128xbf16> to vector<128x128xbf16>
    %cst_29 = arith.constant dense<0.000000e+00> : vector<256x128xf32>
    %37 = tpu.matmul %34, %36, %cst_29 {dimension_numbers = #tpu.dot_dimension_numbers<[1], [0], [0], [1], [0, 0, 1, 1], [], []>} : vector<256x128xbf16>, vector<128x128xbf16>, vector<256x128xf32> -> vector<256x128xf32>
    %38 = arith.addf %31, %37 : vector<256x128xf32>
    %c0_30 = arith.constant 0 : index
    %c2 = arith.constant 2 : index
    %c0_31 = arith.constant 0 : index
    %39 = vector.load %arg9[%c0_30, %c2, %c0_31] : memref<18x18x128xf32, #tpu.memory_space<vmem>>, vector<16x16x128xf32>
    %40 = vector.shape_cast %39 : vector<16x16x128xf32> to vector<256x128xf32>
    %41 = arith.truncf %40 : vector<256x128xf32> to vector<256x128xbf16>
    %c2_32 = arith.constant 2 : index
    %c0_33 = arith.constant 0 : index
    %c0_34 = arith.constant 0 : index
    %42 = vector.load %arg4[%c2_32, %c0_33, %c0_34] : memref<9x128x128xbf16, #tpu.memory_space<vmem>>, vector<1x128x128xbf16>
    %43 = vector.shape_cast %42 : vector<1x128x128xbf16> to vector<128x128xbf16>
    %cst_35 = arith.constant dense<0.000000e+00> : vector<256x128xf32>
    %44 = tpu.matmul %41, %43, %cst_35 {dimension_numbers = #tpu.dot_dimension_numbers<[1], [0], [0], [1], [0, 0, 1, 1], [], []>} : vector<256x128xbf16>, vector<128x128xbf16>, vector<256x128xf32> -> vector<256x128xf32>
    %45 = arith.addf %38, %44 : vector<256x128xf32>
    %c1_36 = arith.constant 1 : index
    %c0_37 = arith.constant 0 : index
    %c0_38 = arith.constant 0 : index
    %46 = vector.load %arg9[%c1_36, %c0_37, %c0_38] : memref<18x18x128xf32, #tpu.memory_space<vmem>>, vector<16x16x128xf32>
    %47 = vector.shape_cast %46 : vector<16x16x128xf32> to vector<256x128xf32>
    %48 = arith.truncf %47 : vector<256x128xf32> to vector<256x128xbf16>
    %c3 = arith.constant 3 : index
    %c0_39 = arith.constant 0 : index
    %c0_40 = arith.constant 0 : index
    %49 = vector.load %arg4[%c3, %c0_39, %c0_40] : memref<9x128x128xbf16, #tpu.memory_space<vmem>>, vector<1x128x128xbf16>
    %50 = vector.shape_cast %49 : vector<1x128x128xbf16> to vector<128x128xbf16>
    %cst_41 = arith.constant dense<0.000000e+00> : vector<256x128xf32>
    %51 = tpu.matmul %48, %50, %cst_41 {dimension_numbers = #tpu.dot_dimension_numbers<[1], [0], [0], [1], [0, 0, 1, 1], [], []>} : vector<256x128xbf16>, vector<128x128xbf16>, vector<256x128xf32> -> vector<256x128xf32>
    %52 = arith.addf %45, %51 : vector<256x128xf32>
    %c1_42 = arith.constant 1 : index
    %c1_43 = arith.constant 1 : index
    %c0_44 = arith.constant 0 : index
    %53 = vector.load %arg9[%c1_42, %c1_43, %c0_44] : memref<18x18x128xf32, #tpu.memory_space<vmem>>, vector<16x16x128xf32>
    %54 = vector.shape_cast %53 : vector<16x16x128xf32> to vector<256x128xf32>
    %55 = arith.truncf %54 : vector<256x128xf32> to vector<256x128xbf16>
    %c4 = arith.constant 4 : index
    %c0_45 = arith.constant 0 : index
    %c0_46 = arith.constant 0 : index
    %56 = vector.load %arg4[%c4, %c0_45, %c0_46] : memref<9x128x128xbf16, #tpu.memory_space<vmem>>, vector<1x128x128xbf16>
    %57 = vector.shape_cast %56 : vector<1x128x128xbf16> to vector<128x128xbf16>
    %cst_47 = arith.constant dense<0.000000e+00> : vector<256x128xf32>
    %58 = tpu.matmul %55, %57, %cst_47 {dimension_numbers = #tpu.dot_dimension_numbers<[1], [0], [0], [1], [0, 0, 1, 1], [], []>} : vector<256x128xbf16>, vector<128x128xbf16>, vector<256x128xf32> -> vector<256x128xf32>
    %59 = arith.addf %52, %58 : vector<256x128xf32>
    %c1_48 = arith.constant 1 : index
    %c2_49 = arith.constant 2 : index
    %c0_50 = arith.constant 0 : index
    %60 = vector.load %arg9[%c1_48, %c2_49, %c0_50] : memref<18x18x128xf32, #tpu.memory_space<vmem>>, vector<16x16x128xf32>
    %61 = vector.shape_cast %60 : vector<16x16x128xf32> to vector<256x128xf32>
    %62 = arith.truncf %61 : vector<256x128xf32> to vector<256x128xbf16>
    %c5 = arith.constant 5 : index
    %c0_51 = arith.constant 0 : index
    %c0_52 = arith.constant 0 : index
    %63 = vector.load %arg4[%c5, %c0_51, %c0_52] : memref<9x128x128xbf16, #tpu.memory_space<vmem>>, vector<1x128x128xbf16>
    %64 = vector.shape_cast %63 : vector<1x128x128xbf16> to vector<128x128xbf16>
    %cst_53 = arith.constant dense<0.000000e+00> : vector<256x128xf32>
    %65 = tpu.matmul %62, %64, %cst_53 {dimension_numbers = #tpu.dot_dimension_numbers<[1], [0], [0], [1], [0, 0, 1, 1], [], []>} : vector<256x128xbf16>, vector<128x128xbf16>, vector<256x128xf32> -> vector<256x128xf32>
    %66 = arith.addf %59, %65 : vector<256x128xf32>
    %c2_54 = arith.constant 2 : index
    %c0_55 = arith.constant 0 : index
    %c0_56 = arith.constant 0 : index
    %67 = vector.load %arg9[%c2_54, %c0_55, %c0_56] : memref<18x18x128xf32, #tpu.memory_space<vmem>>, vector<16x16x128xf32>
    %68 = vector.shape_cast %67 : vector<16x16x128xf32> to vector<256x128xf32>
    %69 = arith.truncf %68 : vector<256x128xf32> to vector<256x128xbf16>
    %c6 = arith.constant 6 : index
    %c0_57 = arith.constant 0 : index
    %c0_58 = arith.constant 0 : index
    %70 = vector.load %arg4[%c6, %c0_57, %c0_58] : memref<9x128x128xbf16, #tpu.memory_space<vmem>>, vector<1x128x128xbf16>
    %71 = vector.shape_cast %70 : vector<1x128x128xbf16> to vector<128x128xbf16>
    %cst_59 = arith.constant dense<0.000000e+00> : vector<256x128xf32>
    %72 = tpu.matmul %69, %71, %cst_59 {dimension_numbers = #tpu.dot_dimension_numbers<[1], [0], [0], [1], [0, 0, 1, 1], [], []>} : vector<256x128xbf16>, vector<128x128xbf16>, vector<256x128xf32> -> vector<256x128xf32>
    %73 = arith.addf %66, %72 : vector<256x128xf32>
    %c2_60 = arith.constant 2 : index
    %c1_61 = arith.constant 1 : index
    %c0_62 = arith.constant 0 : index
    %74 = vector.load %arg9[%c2_60, %c1_61, %c0_62] : memref<18x18x128xf32, #tpu.memory_space<vmem>>, vector<16x16x128xf32>
    %75 = vector.shape_cast %74 : vector<16x16x128xf32> to vector<256x128xf32>
    %76 = arith.truncf %75 : vector<256x128xf32> to vector<256x128xbf16>
    %c7 = arith.constant 7 : index
    %c0_63 = arith.constant 0 : index
    %c0_64 = arith.constant 0 : index
    %77 = vector.load %arg4[%c7, %c0_63, %c0_64] : memref<9x128x128xbf16, #tpu.memory_space<vmem>>, vector<1x128x128xbf16>
    %78 = vector.shape_cast %77 : vector<1x128x128xbf16> to vector<128x128xbf16>
    %cst_65 = arith.constant dense<0.000000e+00> : vector<256x128xf32>
    %79 = tpu.matmul %76, %78, %cst_65 {dimension_numbers = #tpu.dot_dimension_numbers<[1], [0], [0], [1], [0, 0, 1, 1], [], []>} : vector<256x128xbf16>, vector<128x128xbf16>, vector<256x128xf32> -> vector<256x128xf32>
    %80 = arith.addf %73, %79 : vector<256x128xf32>
    %c2_66 = arith.constant 2 : index
    %c2_67 = arith.constant 2 : index
    %c0_68 = arith.constant 0 : index
    %81 = vector.load %arg9[%c2_66, %c2_67, %c0_68] : memref<18x18x128xf32, #tpu.memory_space<vmem>>, vector<16x16x128xf32>
    %82 = vector.shape_cast %81 : vector<16x16x128xf32> to vector<256x128xf32>
    %83 = arith.truncf %82 : vector<256x128xf32> to vector<256x128xbf16>
    %c8 = arith.constant 8 : index
    %c0_69 = arith.constant 0 : index
    %c0_70 = arith.constant 0 : index
    %84 = vector.load %arg4[%c8, %c0_69, %c0_70] : memref<9x128x128xbf16, #tpu.memory_space<vmem>>, vector<1x128x128xbf16>
    %85 = vector.shape_cast %84 : vector<1x128x128xbf16> to vector<128x128xbf16>
    %cst_71 = arith.constant dense<0.000000e+00> : vector<256x128xf32>
    %86 = tpu.matmul %83, %85, %cst_71 {dimension_numbers = #tpu.dot_dimension_numbers<[1], [0], [0], [1], [0, 0, 1, 1], [], []>} : vector<256x128xbf16>, vector<128x128xbf16>, vector<256x128xf32> -> vector<256x128xf32>
    %87 = arith.addf %80, %86 : vector<256x128xf32>
    %c0_72 = arith.constant 0 : index
    %c0_73 = arith.constant 0 : index
    %88 = vector.load %arg5[%c0_72, %c0_73] : memref<1x128xf32, #tpu.memory_space<vmem>>, vector<1x128xf32>
    %89 = vector.broadcast %88 : vector<1x128xf32> to vector<256x128xf32>
    %90 = arith.addf %87, %89 : vector<256x128xf32>
    %cst_74 = arith.constant 0.000000e+00 : f32
    %91 = vector.broadcast %cst_74 : f32 to vector<256x128xf32>
    %92 = arith.maximumf %90, %91 : vector<256x128xf32>
    %93 = arith.truncf %92 : vector<256x128xf32> to vector<256x128xbf16>
    %c0_75 = arith.constant 0 : index
    %c0_76 = arith.constant 0 : index
    %94 = vector.load %arg6[%c0_75, %c0_76] : memref<128x128xbf16, #tpu.memory_space<vmem>>, vector<128x128xbf16>
    %cst_77 = arith.constant dense<0.000000e+00> : vector<256x128xf32>
    %95 = tpu.matmul %93, %94, %cst_77 {dimension_numbers = #tpu.dot_dimension_numbers<[1], [0], [0], [1], [0, 0, 1, 1], [], []>} : vector<256x128xbf16>, vector<128x128xbf16>, vector<256x128xf32> -> vector<256x128xf32>
    %c0_78 = arith.constant 0 : index
    %c0_79 = arith.constant 0 : index
    %96 = vector.load %arg7[%c0_78, %c0_79] : memref<1x128xf32, #tpu.memory_space<vmem>>, vector<1x128xf32>
    %97 = vector.broadcast %96 : vector<1x128xf32> to vector<256x128xf32>
    %98 = arith.addf %95, %97 : vector<256x128xf32>
    %99 = arith.addf %98, %1 : vector<256x128xf32>
    %cst_80 = arith.constant 0.000000e+00 : f32
    %100 = vector.broadcast %cst_80 : f32 to vector<256x128xf32>
    %101 = arith.maximumf %99, %100 : vector<256x128xf32>
    %c0_81 = arith.constant 0 : index
    %c0_82 = arith.constant 0 : index
    %c0_83 = arith.constant 0 : index
    %102 = vector.load %arg8[%c0_81, %c0_82, %c0_83] : memref<1x256x128xf32, #tpu.memory_space<vmem>>, vector<1x256x128xf32>
    %103 = vector.shape_cast %102 : vector<1x256x128xf32> to vector<256x128xf32>
    %104 = vector.shape_cast %101 : vector<256x128xf32> to vector<1x256x128xf32>
    tpu.vector_store %arg8[%c0_81, %c0_82, %c0_83], %104 {strides = array<i32>} : memref<1x256x128xf32, #tpu.memory_space<vmem>>, vector<1x256x128xf32>,
    return
  }
  func.func @transform_0(%arg0: i32) -> (i32, i32, i32) {
    %c0_i32 = arith.constant 0 : i32
    %c0_i32_0 = arith.constant 0 : i32
    %c0_i32_1 = arith.constant 0 : i32
    return %arg0, %c0_i32, %c0_i32_0 : i32, i32, i32
  }
  func.func @transform_1(%arg0: i32) -> (i32, i32) {
    %c0_i32 = arith.constant 0 : i32
    %c0_i32_0 = arith.constant 0 : i32
    %c0_i32_1 = arith.constant 0 : i32
    return %c0_i32, %c0_i32_0 : i32, i32
  }
  func.func @transform_2(%arg0: i32) -> (i32, i32) {
    %c0_i32 = arith.constant 0 : i32
    %c0_i32_0 = arith.constant 0 : i32
    %c0_i32_1 = arith.constant 0 : i32
    return %c0_i32, %c0_i32_0 : i32, i32
  }
  func.func @transform_3(%arg0: i32) -> (i32, i32, i32) {
    %c0_i32 = arith.constant 0 : i32
    %c0_i32_0 = arith.constant 0 : i32
    %c0_i32_1 = arith.constant 0 : i32
    %c0_i32_2 = arith.constant 0 : i32
    return %c0_i32, %c0_i32_0, %c0_i32_1 : i32, i32, i32
  }
  func.func @transform_4(%arg0: i32) -> (i32, i32) {
    %c0_i32 = arith.constant 0 : i32
    %c0_i32_0 = arith.constant 0 : i32
    %c0_i32_1 = arith.constant 0 : i32
    return %c0_i32, %c0_i32_0 : i32, i32
  }
  func.func @transform_5(%arg0: i32) -> (i32, i32) {
    %c0_i32 = arith.constant 0 : i32
    %c0_i32_0 = arith.constant 0 : i32
    %c0_i32_1 = arith.constant 0 : i32
    return %c0_i32, %c0_i32_0 : i32, i32
  }
  func.func @transform_6(%arg0: i32) -> (i32, i32) {
    %c0_i32 = arith.constant 0 : i32
    %c0_i32_0 = arith.constant 0 : i32
    %c0_i32_1 = arith.constant 0 : i32
    return %c0_i32, %c0_i32_0 : i32, i32
  }
  func.func @transform_7(%arg0: i32) -> (i32, i32, i32) {
    %c0_i32 = arith.constant 0 : i32
    %c0_i32_0 = arith.constant 0 : i32
    %c0_i32_1 = arith.constant 0 : i32
    return %arg0, %c0_i32, %c0_i32_0 : i32, i32, i32
  }
}

</mosaic_0001>

<bundles_post_ra>
// kernel: bottleneck_forward.1
= control target key start
LH: loop header
LB: loop body
LE: loop exit
PB: predicated region body
PF: predicated region fallthrough
CT: control target
= control target key end

     0   :  { %s3992_s24 = smov 0   ;;  %s5462_s0 = inlined_call_operand.vmem [shape: f32[2,256,128], index: 0, kind: input, shape index: {}]   ;;  %s5463_s1 = inlined_call_operand.vmem [shape: bf16[128,128], index: 1, kind: input, shape index: {}]   ;;  %s5464_s2 = inlined_call_operand.vmem [shape: f32[1,128], index: 2, kind: input, shape index: {}]   ;;  %s5465_s3 = inlined_call_operand.vmem [shape: bf16[9,128,128], index: 3, kind: input, shape index: {}]   ;;  %s5466_s4 = inlined_call_operand.vmem [shape: f32[1,128], index: 4, kind: input, shape index: {}]   ;;  %s5467_s5 = inlined_call_operand.vmem [shape: bf16[128,128], index: 5, kind: input, shape index: {}]   ;;  %s5468_s6 = inlined_call_operand.vmem [shape: f32[1,128], index: 6, kind: input, shape index: {}]   ;;  %s5469_s7 = inlined_call_operand.vmem [shape: f32[2,256,128], index: 7, kind: output, shape index: {}]  }
   0x1 LB: > { %s3167_s25 = sadd.s32 4294967295, %s3947_s24   ;;  %p3171_p0 = scmp.ge.s32.totalorder %s3947_s24, 1  ;;  %s3947_s24 = sphi %s3992_s24, %s17_s24  }
   0x2   : > { %p237_p1 = scmp.lt.s32.totalorder %s3947_s24, 3 }
   0x4   : > { %p238_p2 = pnand %p3171_p0, %p237_p1 }
   0x6   : > { %241 = sbr.rel (%p238_p2) target bundleno = 1294 (0x50e), region = 48 }
   0xb   : > { %v3667_v0 = vld [vmem:[%s5463_s1 + $0x38] sm:$0xff]  ;;  %v3666_v1 = vld [vmem:[%s5463_s1 + $0x30] sm:$0xff]  ;;  %v3665_v2 = vld [vmem:[%s5463_s1 + $0x28] sm:$0xff]  ;;  %p269_p3 = scmp.lt.s32.totalorder %s3167_s25, 1  ;;  %v3949_v44 = vmov 0.0   ;;  %v3950_v45 = vmov 0.0|0.0  }
   0xc   : > { %395 = vmatpush.bf16.msra.mxu0 %v3667_v0  ;;  %3748 = vmatpush.bf16.msra.mxu3 %v3667_v0  ;;  %v3664_v3 = vld [vmem:[%s5463_s1 + $0x20] sm:$0xff]  ;;  %v3663_v4 = vld [vmem:[%s5463_s1 + $0x18] sm:$0xff]  ;;  %v3662_v5 = vld [vmem:[%s5463_s1 + $0x10] sm:$0xff]  ;;  %516 = vst [vmem:[#allocation2] sm:$0xff] %v3949_v44  ;;  %vm555_vm0 = vcmask 1040384   ;;  %vm3951_vm2 = vmmov 1  }
   0xd   : > { %s5629_s25 = smov (!%p269_p3, %s3167_s25), 1  ;;  %v3661_v6 = vld [vmem:[%s5463_s1 + $0x8] sm:$0xff]  ;;  %v3660_v7 = vld [vmem:[%s5463_s1] sm:$0xff]  ;;  %v4047_v23 = vld [vmem:[%s5465_s3 + $0x38] sm:$0xff]  ;;  %517 = vst [vmem:[#allocation2 + $0x8] sm:$0xff] %v3949_v44 }
   0xe   : > { %s3658_s15 = sshll.u32 %s5629_s25, 8  ;;  %v3683_v24 = vld [vmem:[%s5465_s3 + $0x78] sm:$0xff]  ;;  %1047 = vmatpush.bf16.msra.mxu2 %v4047_v23  ;;  %v4056_v25 = vld [vmem:[%s5465_s3 + $0x30] sm:$0xff]  ;;  %v4065_v27 = vld [vmem:[%s5465_s3 + $0x28] sm:$0xff]  ;;  %518 = vst [vmem:[#allocation2 + $0x10] sm:$0x3] %v3949_v44 }
   0xf   : > { %s4029_s20 = scalar_lea.vmem %s5462_s0, %s3658_s15  ;;  %910 = vmatpush.bf16.msra.mxu1 %v3683_v24  ;;  %v3682_v26 = vld [vmem:[%s5465_s3 + $0x70] sm:$0xff]  ;;  %v4073_v30 = vld [vmem:[%s5465_s3 + $0x20] sm:$0xff]  ;;  %v3681_v32 = vld [vmem:[%s5465_s3 + $0x68] sm:$0xff]  ;;  %520 = vst [vmem:[#allocation2 + $0x198] sm:$0xff] %v3949_v44  ;;  %s5304_s19 = scalar_lea.vmem %s5469_s7, %s3658_s15 }
  0x10   : > { %396 = vmatpush.bf16.msra.mxu0 %v3666_v1  ;;  %3749 = vmatpush.bf16.msra.mxu3 %v3666_v1  ;;  %v279_v8 = vld [vmem:[%s4029_s20] sm:$0xff]  ;;  %v280_v9 = vld [vmem:[%s4029_s20 + $0x8] sm:$0xff]  ;;  %v281_v11 = vld [vmem:[%s4029_s20 + $0x10] sm:$0xff]  ;;  %521 = vst [vmem:[#allocation2 + $0x1a0] sm:$0xff] %v3949_v44 }
  0x11   : > { %v311_v10 = vpack.c.bf16 %v280_v9, %v279_v8  ;;  %v282_v12 = vld [vmem:[%s4029_s20 + $0x18] sm:$0xff]  ;;  %v283_v14 = vld [vmem:[%s4029_s20 + $0x20] sm:$0xff]  ;;  %v284_v15 = vld [vmem:[%s4029_s20 + $0x28] sm:$0xff]  ;;  %522 = vst [vmem:[#allocation2 + $0x1a8] sm:$0x3] %v3949_v44 }
  0x12   : > { %v312_v13 = vpack.c.bf16 %v282_v12, %v281_v11  ;;  %v313_v16 = vpack.c.bf16 %v284_v15, %v283_v14  ;;  %v285_v17 = vld [vmem:[%s4029_s20 + $0x30] sm:$0xff]  ;;  %v286_v18 = vld [vmem:[%s4029_s20 + $0x38] sm:$0xff]  ;;  %v287_v20 = vld [vmem:[%s4029_s20 + $0x40] sm:$0xff]  ;;  %1048 = vmatpush.bf16.msra.mxu2 %v4056_v25 }
  0x13   : > { %v314_v19 = vpack.c.bf16 %v286_v18, %v285_v17  ;;  %v288_v21 = vld [vmem:[%s4029_s20 + $0x48] sm:$0xff]  ;;  %911 = vmatpush.bf16.msra.mxu1 %v3682_v26  ;;  %v289_v28 = vld [vmem:[%s4029_s20 + $0x50] sm:$0xff]  ;;  %v290_v29 = vld [vmem:[%s4029_s20 + $0x58] sm:$0xff] }
  0x14   : > { %397 = vmatpush.bf16.msra.mxu0 %v3665_v2  ;;  %3750 = vmatpush.bf16.msra.mxu3 %v3665_v2  ;;  %v315_v22 = vpack.c.bf16 %v288_v21, %v287_v20  ;;  %v316_v31 = vpack.c.bf16 %v290_v29, %v289_v28  ;;  %v4082_v33 = vld [vmem:[%s5465_s3 + $0x18] sm:$0xff]  ;;  %v3680_v34 = vld [vmem:[%s5465_s3 + $0x60] sm:$0xff]  ;;  %v4091_v35 = vld [vmem:[%s5465_s3 + $0x10] sm:$0xff] }
  0x15   : > { %v3679_v36 = vld [vmem:[%s5465_s3 + $0x58] sm:$0xff]  ;;  %v4100_v37 = vld [vmem:[%s5465_s3 + $0x8] sm:$0xff]  ;;  %v3678_v38 = vld [vmem:[%s5465_s3 + $0x50] sm:$0xff] }
  0x16   : > { %1049 = vmatpush.bf16.msra.mxu2 %v4065_v27  ;;  %v291_v39 = vld [vmem:[%s4029_s20 + $0x60] sm:$0xff]  ;;  %v292_v40 = vld [vmem:[%s4029_s20 + $0x68] sm:$0xff]  ;;  %v293_v50 = vld [vmem:[%s4029_s20 + $0x70] sm:$0xff] }
  0x17   : > { %912 = vmatpush.bf16.msra.mxu1 %v3681_v32  ;;  %v4111_v41 = vld [vmem:[%s5465_s3] sm:$0xff]  ;;  %v317_v42 = vpack.c.bf16 %v292_v40, %v291_v39  ;;  %v3677_v43 = vld [vmem:[%s5465_s3 + $0x48] sm:$0xff]  ;;  %v294_v51 = vld [vmem:[%s4029_s20 + $0x78] sm:$0xff] }
  0x18   : > { %398 = vmatpush.bf16.msra.mxu0 %v3664_v3  ;;  %3751 = vmatpush.bf16.msra.mxu3 %v3664_v3  ;;  %v3676_v46 = vld [vmem:[%s5465_s3 + $0x40] sm:$0xff]  ;;  %v798_v48 = vld [vmem:[#allocation2 + $0x9] sm:$0xff]  ;;  %v318_v52 = vpack.c.bf16 %v294_v51, %v293_v50  ;;  %v3699_v60 = vld [vmem:[%s5465_s3 + $0xf8] sm:$0xff] }
  0x19   : > { %v797_v47 = vld [vmem:[#allocation2 + $0x1] sm:$0xff]  ;;  %v4127_v55 = vld [vmem:[%s5464_s2] ss:$0 sm:$0xff]  ;;  %v3698_v63 = vld [vmem:[%s5465_s3 + $0xf0] sm:$0xff] }
  0x1a   : > { %1050 = vmatpush.bf16.msra.mxu2 %v4073_v30  ;;  %v829_v49 = vpack.c.bf16 %v798_v48, %v797_v47  ;;  %v295_v53 = vld [vmem:[%s4029_s20 + $0x80] sm:$0xff]  ;;  %v296_v54 = vld [vmem:[%s4029_s20 + $0x88] sm:$0xff]  ;;  %vm3817_vm1 = vmneg %vm555_vm0 }
  0x1b   : > { %913 = vmatpush.bf16.msra.mxu1 %v3680_v34  ;;  %v319_v56 = vpack.c.bf16 %v296_v54, %v295_v53  ;;  %v3697_v3 = vld [vmem:[%s5465_s3 + $0xe8] sm:$0xff]  ;;  %vm4150_vm3 = vmpackc.low %vm3951_vm2, %vm3817_vm1  ;;  %v303_v17 = vld [vmem:[%s4029_s20 + $0xc0] sm:$0xff] }
  0x1c   : > { %399 = vmatpush.bf16.msra.mxu0 %v3663_v4  ;;  %3752 = vmatpush.bf16.msra.mxu3 %v3663_v4  ;;  %v297_v4 = vld [vmem:[%s4029_s20 + $0x90] sm:$0xff]  ;;  %v304_v18 = vld [vmem:[%s4029_s20 + $0xc8] sm:$0xff]  ;;  %v306_v48 = vld [vmem:[%s4029_s20 + $0xd8] sm:$0xff] }
  0x1d   : > { %v305_v47 = vld [vmem:[%s4029_s20 + $0xd0] sm:$0xff] }
  0x1e   : > { %1051 = vmatpush.bf16.msra.mxu2 %v4082_v33 }
  0x1f   : > { %914 = vmatpush.bf16.msra.mxu1 %v3679_v36 }
  0x20   : > { %400 = vmatpush.bf16.msra.mxu0 %v3662_v5  ;;  %3753 = vmatpush.bf16.msra.mxu3 %v3662_v5  ;;  %v298_v5 = vld [vmem:[%s4029_s20 + $0x98] sm:$0xff] }
  0x21   : > { %v320_v9 = vpack.c.bf16 %v298_v5, %v297_v4 }
  0x22   : > { %1052 = vmatpush.bf16.msra.mxu2 %v4091_v35 }
  0x23   : > { %915 = vmatpush.bf16.msra.mxu1 %v3678_v38 }
  0x24   : > { %401 = vmatpush.bf16.msra.mxu0 %v3661_v6  ;;  %3754 = vmatpush.bf16.msra.mxu3 %v3661_v6 }
  0x26   : > { %1053 = vmatpush.bf16.msra.mxu2 %v4100_v37 }
  0x27   : > { %916 = vmatpush.bf16.msra.mxu1 %v3677_v43 }
  0x28   : > { %402 = vmatpush.bf16.msra.mxu0 %v3660_v7  ;;  %3755 = vmatpush.bf16.msra.mxu3 %v3660_v7 }
  0x2a   : > { %1054 = vmatpush.bf16.msra.mxu2 %v4111_v41 }
  0x2b   : > { %403 = vmatmul.bf16.vlgmr.msra.gmra.mxu0 %v311_v10  ;;  %917 = vmatpush.bf16.msra.mxu1 %v3676_v46  ;;  %v3696_v10 = vld [vmem:[%s5465_s3 + $0xe0] sm:$0xff] }
  0x2c   : > { %3756 = vmatpush.bf16.msrb.mxu3 %v3683_v24  ;;  %1483 = vmatpush.bf16.msrb.mxu0 %v3699_v60  ;;  %v3694_v24 = vld [vmem:[%s5465_s3 + $0xd0] sm:$0xff] }
  0x2d   : > { %1055 = vmatmul.bf16.vlgmr.msra.gmra.mxu2 %v3950_v45 }
  0x2e   : > { %918 = vmatmul.bf16.vlgmr.msra.gmra.mxu1 %v829_v49 }
  0x30   : > { %3757 = vmatpush.bf16.msrb.mxu3 %v3682_v26  ;;  %1484 = vmatpush.bf16.msrb.mxu0 %v3698_v63 }
  0x34   : > { %3758 = vmatpush.bf16.msrb.mxu3 %v3681_v32  ;;  %1485 = vmatpush.bf16.msrb.mxu0 %v3697_v3 }
  0x38   : > { %3759 = vmatpush.bf16.msrb.mxu3 %v3680_v34  ;;  %1486 = vmatpush.bf16.msrb.mxu0 %v3696_v10  ;;  %v3693_v34 = vld [vmem:[%s5465_s3 + $0xc8] sm:$0xff] }
  0x3b   : > { %408 = vmatmul.bf16.gmra.mxu0 %v312_v13  ;;  %v1136_v13 = vld [vmem:[#allocation2 + $0x2] sm:$0xff] }
  0x3c   : > { %3760 = vmatpush.bf16.msrb.mxu3 %v3679_v36  ;;  %v299_v36 = vld [vmem:[%s4029_s20 + $0xa0] sm:$0xff] }
  0x40   : > { %3761 = vmatpush.bf16.msrb.mxu3 %v3678_v38  ;;  %v300_v38 = vld [vmem:[%s4029_s20 + $0xa8] sm:$0xff] }
  0x44   : > { %3762 = vmatpush.bf16.msrb.mxu3 %v3677_v43  ;;  %v3692_v43 = vld [vmem:[%s5465_s3 + $0xc0] sm:$0xff] }
  0x48   : > { %3763 = vmatpush.bf16.msrb.mxu3 %v3676_v46 }
  0x4b   : > { %413 = vmatmul.bf16.gmra.mxu0 %v313_v16  ;;  %v3695_v16 = vld [vmem:[%s5465_s3 + $0xd8] sm:$0xff] }
  0x4c   : > { %1487 = vmatpush.bf16.msrb.mxu0 %v3695_v16 }
  0x50   : > { %1488 = vmatpush.bf16.msrb.mxu0 %v3694_v24 }
  0x54   : > { %1489 = vmatpush.bf16.msrb.mxu0 %v3693_v34 }
  0x58   : > { %1490 = vmatpush.bf16.msrb.mxu0 %v3692_v43 }
  0x5b   : > { %418 = vmatmul.bf16.gmra.mxu0 %v314_v19  ;;  %v323_v19 = vpack.c.bf16 %v304_v18, %v303_v17 }
  0x5d   : > { %463 = vmatmul.bf16.vlgmr.msra.gmra.mxu3 %v323_v19 }
  0x5e   : > { %3764 = vmatpush.bf16.msra.mxu3 %v4047_v23 }
  0x62   : > { %3765 = vmatpush.bf16.msra.mxu3 %v4056_v25 }
  0x66   : > { %3766 = vmatpush.bf16.msra.mxu3 %v4065_v27  ;;  %v324_v27 = vpack.c.bf16 %v306_v48, %v305_v47 }
  0x6a   : > { %3767 = vmatpush.bf16.msra.mxu3 %v4073_v30  ;;  %v301_v30 = vld [vmem:[%s4029_s20 + $0xb0] sm:$0xff] }
  0x6b   : > { %423 = vmatmul.bf16.gmra.mxu0 %v315_v22 }
  0x6d   : > { %468 = vmatmul.bf16.gmra.mxu3 %v324_v27 }
  0x6e   : > { %3768 = vmatpush.bf16.msra.mxu3 %v4082_v33 }
  0x72   : > { %3769 = vmatpush.bf16.msra.mxu3 %v4091_v35 }
  0x76   : > { %3770 = vmatpush.bf16.msra.mxu3 %v4100_v37 }
  0x7a   : > { %3771 = vmatpush.bf16.msra.mxu3 %v4111_v41 }
  0x7b   : > { %428 = vmatmul.bf16.gmra.mxu0 %v316_v31 }
  0x8b   : > { %433 = vmatmul.bf16.gmra.mxu0 %v317_v42  ;;  %v321_v42 = vpack.c.bf16 %v300_v38, %v299_v36 }
  0x9b   : > { %438 = vmatmul.bf16.gmra.mxu0 %v318_v52 }
  0xa8   : > { %v404_v57 = vpop.f32.mrf.mxu0 }
  0xa9   : > { %v405_v58 = vadd.f32 %v4127_v55, %v404_v57 }
  0xab   : > { %v484_v59 = vmax.f32 %v405_v58, 0.0  ;;  %443 = vmatmul.bf16.gmra.mxu0 %v319_v56  ;;  %v302_v58 = vld [vmem:[%s4029_s20 + $0xb8] sm:$0xff] }
  0xad   : > { %v556_v61 = vrot.slane %v484_v59, 7 }
  0xaf   : > { %v652_v62 = vsel %vm555_vm0, 0.0, %v556_v61 }
  0xb0   : > { %685 = vst [vmem:[#allocation2 + $0x18] sm:$0xff] %v652_v62  ;;  %v406_v0 = vpop.f32.mrf.mxu0 }
  0xb1   : > { %v407_v1 = vadd.f32 %v4127_v55, %v406_v0 }
  0xb3   : > { %v485_v2 = vmax.f32 %v407_v1, 0.0  ;;  %v307_v1 = vld [vmem:[%s4029_s20 + $0xe0] sm:$0xff] }
  0xb5   : > { %v557_v6 = vrot.slane %v485_v2, 7  ;;  %v308_v2 = vld [vmem:[%s4029_s20 + $0xe8] sm:$0xff] }
  0xb6   : > { %v325_v3 = vpack.c.bf16 %v308_v2, %v307_v1  ;;  %v919_v2 = vpop.f32.mrf.mxu1 }
  0xb7   : > { %v558_v7 = vsel %vm555_vm0, %v556_v61, %v557_v6  ;;  %v668_v8 = vsel %vm555_vm0, %v557_v6, 0.0 }
  0xb8   : > { %686 = vst [vmem:[#allocation2 + $0x20] sm:$0xff] %v558_v7  ;;  %v409_v11 = vpop.f32.mrf.mxu0  ;;  %v4154_v14 = vpack.c.bf16 %v558_v7, %v556_v61  ;;  %v322_v61 = vpack.c.bf16 %v302_v58, %v301_v30  ;;  %473 = vmatmul.bf16.gmra.mxu3 %v325_v3 }
  0xb9   : > { %687 = vst [vmem:[#allocation2 + $0x28] sm:$0x3] %v668_v8  ;;  %v410_v12 = vadd.f32 %v4127_v55, %v409_v11 }
  0xba   : > { %3820 = vmatmul.msk.bf16.gmra.mxu2 %vm4150_vm3, %v4154_v14 }
  0xbb   : > { %v486_v15 = vmax.f32 %v410_v12, 0.0  ;;  %448 = vmatmul.bf16.gmra.mxu0 %v320_v9 }
  0xbd   : > { %v559_v20 = vrot.slane %v486_v15, 7 }
  0xbf   : > { %v653_v21 = vsel %vm555_vm0, 0.0, %v559_v20  ;;  %v799_v22 = vld [vmem:[#allocation2 + $0x19] sm:$0xff] }
  0xc0   : > { %688 = vst [vmem:[#allocation2 + $0x30] sm:$0xff] %v653_v21  ;;  %v411_v26 = vpop.f32.mrf.mxu0  ;;  %v800_v28 = vld [vmem:[#allocation2 + $0x21] sm:$0xff] }
  0xc1   : > { %v412_v29 = vadd.f32 %v4127_v55, %v411_v26  ;;  %v4170_v31 = vpack.c.bf16 %v800_v28, %v799_v22 }
  0xc3   : > { %v487_v32 = vmax.f32 %v412_v29, 0.0  ;;  %923 = vmatmul.bf16.gmra.mxu1 %v4170_v31 }
  0xc5   : > { %v560_v23 = vrot.slane %v487_v32, 7 }
  0xc7   : > { %v561_v39 = vsel %vm555_vm0, %v559_v20, %v560_v23  ;;  %v669_v40 = vsel %vm555_vm0, %v560_v23, 0.0 }
  0xc8   : > { %689 = vst [vmem:[#allocation2 + $0x38] sm:$0xff] %v561_v39  ;;  %v414_v44 = vpop.f32.mrf.mxu0  ;;  %v4186_v45 = vpack.c.bf16 %v561_v39, %v559_v20 }
  0xc9   : > { %690 = vst [vmem:[#allocation2 + $0x40] sm:$0x3] %v669_v40  ;;  %v415_v25 = vadd.f32 %v4127_v55, %v414_v44 }
  0xca   : > { %3824 = vmatmul.msk.bf16.gmra.mxu2 %vm4150_vm3, %v4186_v45 }
  0xcb   : > { %v488_v46 = vmax.f32 %v415_v25, 0.0  ;;  %453 = vmatmul.bf16.gmra.mxu0 %v321_v42 }
  0xcd   : > { %v562_v49 = vrot.slane %v488_v46, 7 }
  0xcf   : > { %v654_v50 = vsel %vm555_vm0, 0.0, %v562_v49  ;;  %v801_v51 = vld [vmem:[#allocation2 + $0x31] sm:$0xff] }
  0xd0   : > { %691 = vst [vmem:[#allocation2 + $0x48] sm:$0xff] %v654_v50  ;;  %v416_v52 = vpop.f32.mrf.mxu0  ;;  %v802_v53 = vld [vmem:[#allocation2 + $0x39] sm:$0xff] }
  0xd1   : > { %v417_v54 = vadd.f32 %v4127_v55, %v416_v52  ;;  %v4197_v56 = vpack.c.bf16 %v802_v53, %v801_v51 }
  0xd3   : > { %v489_v57 = vmax.f32 %v417_v54, 0.0  ;;  %928 = vmatmul.bf16.gmra.mxu1 %v4197_v56 }
  0xd5   : > { %v563_v59 = vrot.slane %v489_v57, 7 }
  0xd7   : > { %v564_v60 = vsel %vm555_vm0, %v562_v49, %v563_v59  ;;  %v670_v33 = vsel %vm555_vm0, %v563_v59, 0.0 }
  0xd8   : > { %692 = vst [vmem:[#allocation2 + $0x50] sm:$0xff] %v564_v60  ;;  %v419_v62 = vpop.f32.mrf.mxu0  ;;  %v4207_v0 = vpack.c.bf16 %v564_v60, %v562_v49 }
  0xd9   : > { %693 = vst [vmem:[#allocation2 + $0x58] sm:$0x3] %v670_v33  ;;  %v420_v63 = vadd.f32 %v4127_v55, %v419_v62 }
  0xda   : > { %3828 = vmatmul.msk.bf16.gmra.mxu2 %vm4150_vm3, %v4207_v0 }
  0xdb   : > { %v490_v35 = vmax.f32 %v420_v63, 0.0  ;;  %458 = vmatmul.bf16.gmra.mxu0 %v322_v61 }
  0xdd   : > { %v565_v4 = vrot.slane %v490_v35, 7 }
  0xdf   : > { %v655_v37 = vsel %vm555_vm0, 0.0, %v565_v4  ;;  %v803_v5 = vld [vmem:[#allocation2 + $0x49] sm:$0xff] }
  0xe0   : > { %694 = vst [vmem:[#allocation2 + $0x60] sm:$0xff] %v655_v37  ;;  %v421_v6 = vpop.f32.mrf.mxu0  ;;  %v804_v7 = vld [vmem:[#allocation2 + $0x51] sm:$0xff] }
  0xe1   : > { %v422_v8 = vadd.f32 %v4127_v55, %v421_v6  ;;  %v4217_v9 = vpack.c.bf16 %v804_v7, %v803_v5 }
  0xe3   : > { %v491_v10 = vmax.f32 %v422_v8, 0.0  ;;  %933 = vmatmul.bf16.gmra.mxu1 %v4217_v9 }
  0xe5   : > { %v566_v11 = vrot.slane %v491_v10, 7 }
  0xe7   : > { %v567_v12 = vsel %vm555_vm0, %v565_v4, %v566_v11  ;;  %v671_v41 = vsel %vm555_vm0, %v566_v11, 0.0 }
  0xe8   : > { %695 = vst [vmem:[#allocation2 + $0x68] sm:$0xff] %v567_v12  ;;  %v424_v15 = vpop.f32.mrf.mxu0  ;;  %v4223_v17 = vpack.c.bf16 %v567_v12, %v565_v4  ;;  %v3707_v12 = vld [vmem:[%s5465_s3 + $0x138] sm:$0xff] }
  0xe9   : > { %696 = vst [vmem:[#allocation2 + $0x70] sm:$0x3] %v671_v41  ;;  %v425_v16 = vadd.f32 %v4127_v55, %v424_v15  ;;  %v309_v41 = vld [vmem:[%s4029_s20 + $0xf0] sm:$0xff]  ;;  %1717 = vmatpush.bf16.msrb.mxu1 %v3707_v12 }
  0xea   : > { %3832 = vmatmul.msk.bf16.gmra.mxu2 %vm4150_vm3, %v4223_v17 }
  0xeb   : > { %v492_v18 = vmax.f32 %v425_v16, 0.0  ;;  %3836 = vmatmul.msk.bf16.vlgmr.msrb.gmra.mxu0 %vm4150_vm3, %v4154_v14 }
  0xed   : > { %v568_v19 = vrot.slane %v492_v18, 7  ;;  %v310_v18 = vld [vmem:[%s4029_s20 + $0xf8] sm:$0xff] }
  0xef   : > { %v656_v20 = vsel %vm555_vm0, 0.0, %v568_v19  ;;  %v805_v21 = vld [vmem:[#allocation2 + $0x61] sm:$0xff] }
  0xf0   : > { %697 = vst [vmem:[#allocation2 + $0x78] sm:$0xff] %v656_v20  ;;  %v426_v22 = vpop.f32.mrf.mxu0  ;;  %v806_v24 = vld [vmem:[#allocation2 + $0x69] sm:$0xff] }
  0xf1   : > { %v427_v26 = vadd.f32 %v4127_v55, %v426_v22  ;;  %v4233_v28 = vpack.c.bf16 %v806_v24, %v805_v21 }
  0xf3   : > { %v493_v29 = vmax.f32 %v427_v26, 0.0  ;;  %938 = vmatmul.bf16.gmra.mxu1 %v4233_v28 }
  0xf5   : > { %v569_v32 = vrot.slane %v493_v29, 7 }
  0xf7   : > { %v570_v34 = vsel %vm555_vm0, %v568_v19, %v569_v32  ;;  %v672_v36 = vsel %vm555_vm0, %v569_v32, 0.0  ;;  %v3715_v32 = vld [vmem:[%s5465_s3 + $0x178] sm:$0xff] }
  0xf8   : > { %698 = vst [vmem:[#allocation2 + $0x80] sm:$0xff] %v570_v34  ;;  %v429_v14 = vpop.f32.mrf.mxu0  ;;  %v4239_v23 = vpack.c.bf16 %v570_v34, %v568_v19  ;;  %v326_v19 = vpack.c.bf16 %v310_v18, %v309_v41  ;;  %1951 = vmatpush.bf16.msrb.mxu2 %v3715_v32  ;;  %v3708_v18 = vld [vmem:[%s5465_s3 + $0x140] sm:$0xff] }
  0xf9   : > { %699 = vst [vmem:[#allocation2 + $0x88] sm:$0x3] %v672_v36  ;;  %v430_v38 = vadd.f32 %v4127_v55, %v429_v14  ;;  %v3714_v14 = vld [vmem:[%s5465_s3 + $0x170] sm:$0xff] }
  0xfa   : > { %3840 = vmatmul.msk.bf16.gmra.mxu2 %vm4150_vm3, %v4239_v23  ;;  %478 = vmatmul.bf16.gmra.mxu3 %v326_v19 }
  0xfb   : > { %v494_v39 = vmax.f32 %v430_v38, 0.0  ;;  %3844 = vmatmul.msk.bf16.gmra.mxu0 %vm4150_vm3, %v4186_v45 }
  0xfc   : > { %1952 = vmatpush.bf16.msrb.mxu2 %v3714_v14  ;;  %v3701_v14 = vld [vmem:[%s5465_s3 + $0x108] sm:$0xff] }
  0xfd   : > { %v571_v40 = vrot.slane %v494_v39, 7 }
  0xff   : > { %v657_v42 = vsel %vm555_vm0, 0.0, %v571_v40  ;;  %v807_v43 = vld [vmem:[#allocation2 + $0x79] sm:$0xff] }
 0x100   : > { %700 = vst [vmem:[#allocation2 + $0x90] sm:$0xff] %v657_v42  ;;  %v431_v44 = vpop.f32.mrf.mxu0  ;;  %v808_v25 = vld [vmem:[#allocation2 + $0x81] sm:$0xff] }
 0x101   : > { %v432_v46 = vadd.f32 %v4127_v55, %v431_v44  ;;  %v4249_v47 = vpack.c.bf16 %v808_v25, %v807_v43 }
 0x103   : > { %v495_v48 = vmax.f32 %v432_v46, 0.0  ;;  %943 = vmatmul.bf16.gmra.mxu1 %v4249_v47 }
 0x105   : > { %v572_v27 = vrot.slane %v495_v48, 7 }
 0x107   : > { %v573_v49 = vsel %vm555_vm0, %v571_v40, %v572_v27  ;;  %v673_v50 = vsel %vm555_vm0, %v572_v27, 0.0  ;;  %v4318_v27 = vpop.f32.mrf.mxu1 }
 0x108   : > { %701 = vst [vmem:[#allocation2 + $0x98] sm:$0xff] %v573_v49  ;;  %v434_v45 = vpop.f32.mrf.mxu0  ;;  %v4255_v52 = vpack.c.bf16 %v573_v49, %v571_v40  ;;  %v3706_v49 = vld [vmem:[%s5465_s3 + $0x130] sm:$0xff] }
 0x109   : > { %702 = vst [vmem:[#allocation2 + $0xa0] sm:$0x3] %v673_v50  ;;  %v435_v51 = vadd.f32 %v4127_v55, %v434_v45  ;;  %v3712_v50 = vld [vmem:[%s5465_s3 + $0x160] sm:$0xff]  ;;  %1718 = vmatpush.bf16.msrb.mxu1 %v3706_v49 }
 0x10a   : > { %3848 = vmatmul.msk.bf16.gmra.mxu2 %vm4150_vm3, %v4255_v52 }
 0x10b   : > { %v496_v53 = vmax.f32 %v435_v51, 0.0  ;;  %3852 = vmatmul.msk.bf16.gmra.mxu0 %vm4150_vm3, %v4207_v0  ;;  %v1056_v0 = vpop.f32.mrf.mxu2 }
 0x10c   : > { %v4271_v4 = vadd.f32 %v1056_v0, %v919_v2 }
 0x10d   : > { %v574_v54 = vrot.slane %v496_v53, 7 }
 0x10f   : > { %v658_v57 = vsel %vm555_vm0, 0.0, %v574_v54  ;;  %v809_v30 = vld [vmem:[#allocation2 + $0x91] sm:$0xff] }
 0x110   : > { %703 = vst [vmem:[#allocation2 + $0xa8] sm:$0xff] %v658_v57  ;;  %v436_v58 = vpop.f32.mrf.mxu0  ;;  %v810_v59 = vld [vmem:[#allocation2 + $0x99] sm:$0xff] }
 0x111   : > { %v437_v60 = vadd.f32 %v4127_v55, %v436_v58  ;;  %v4265_v33 = vpack.c.bf16 %v810_v59, %v809_v30  ;;  %v3705_v30 = vld [vmem:[%s5465_s3 + $0x128] sm:$0xff]  ;;  %v3711_v58 = vld [vmem:[%s5465_s3 + $0x158] sm:$0xff] }
 0x112   : > { %1719 = vmatpush.bf16.msrb.mxu1 %v3705_v30 }
 0x113   : > { %v497_v61 = vmax.f32 %v437_v60, 0.0  ;;  %948 = vmatmul.bf16.gmra.mxu1 %v4265_v33  ;;  %v4316_v46 = vpop.f32.mrf.mxu2 }
 0x115   : > { %v575_v62 = vrot.slane %v497_v61, 7 }
 0x117   : > { %v576_v63 = vsel %vm555_vm0, %v574_v54, %v575_v62  ;;  %v674_v35 = vsel %vm555_vm0, %v575_v62, 0.0  ;;  %v3704_v62 = vld [vmem:[%s5465_s3 + $0x120] sm:$0xff] }
 0x118   : > { %704 = vst [vmem:[#allocation2 + $0xb0] sm:$0xff] %v576_v63  ;;  %v439_v1 = vpop.f32.mrf.mxu0  ;;  %v4273_v37 = vpack.c.bf16 %v576_v63, %v574_v54  ;;  %v3710_v63 = vld [vmem:[%s5465_s3 + $0x150] sm:$0xff]  ;;  %1720 = vmatpush.bf16.msrb.mxu1 %v3704_v62 }
 0x119   : > { %705 = vst [vmem:[#allocation2 + $0xb8] sm:$0x3] %v674_v35  ;;  %v440_v3 = vadd.f32 %v4127_v55, %v439_v1 }
 0x11a   : > { %3856 = vmatmul.msk.bf16.gmra.mxu2 %vm4150_vm3, %v4273_v37 }
 0x11b   : > { %v498_v5 = vmax.f32 %v440_v3, 0.0  ;;  %3860 = vmatmul.msk.bf16.gmra.mxu0 %vm4150_vm3, %v4223_v17 }
 0x11d   : > { %v577_v6 = vrot.slane %v498_v5, 7 }
 0x11f   : > { %v659_v7 = vsel %vm555_vm0, 0.0, %v577_v6  ;;  %v811_v8 = vld [vmem:[#allocation2 + $0xa9] sm:$0xff] }
 0x120   : > { %706 = vst [vmem:[#allocation2 + $0xc0] sm:$0xff] %v659_v7  ;;  %v441_v10 = vpop.f32.mrf.mxu0  ;;  %v812_v11 = vld [vmem:[#allocation2 + $0xb1] sm:$0xff]  ;;  %v464_v7 = vpop.f32.mrf.mxu3 }
 0x121   : > { %v442_v15 = vadd.f32 %v4127_v55, %v441_v10  ;;  %v4287_v16 = vpack.c.bf16 %v812_v11, %v811_v8  ;;  %v3703_v8 = vld [vmem:[%s5465_s3 + $0x118] sm:$0xff]  ;;  %v3709_v10 = vld [vmem:[%s5465_s3 + $0x148] sm:$0xff] }
 0x122   : > { %1721 = vmatpush.bf16.msrb.mxu1 %v3703_v8 }
 0x123   : > { %v499_v17 = vmax.f32 %v442_v15, 0.0  ;;  %953 = vmatmul.bf16.gmra.mxu1 %v4287_v16  ;;  %v3702_v15 = vld [vmem:[%s5465_s3 + $0x110] sm:$0xff] }
 0x125   : > { %v578_v20 = vrot.slane %v499_v17, 7 }
 0x126   : > { %1722 = vmatpush.bf16.msrb.mxu1 %v3702_v15 }
 0x127   : > { %v579_v21 = vsel %vm555_vm0, %v577_v6, %v578_v20  ;;  %v675_v22 = vsel %vm555_vm0, %v578_v20, 0.0 }
 0x128   : > { %707 = vst [vmem:[#allocation2 + $0xc8] sm:$0xff] %v579_v21  ;;  %v444_v24 = vpop.f32.mrf.mxu0  ;;  %v4294_v29 = vpack.c.bf16 %v579_v21, %v577_v6  ;;  %v466_v32 = vpop.f32.mrf.mxu3 }
 0x129   : > { %708 = vst [vmem:[#allocation2 + $0xd0] sm:$0x3] %v675_v22  ;;  %v445_v26 = vadd.f32 %v4127_v55, %v444_v24 }
 0x12a   : > { %3864 = vmatmul.msk.bf16.gmra.mxu2 %vm4150_vm3, %v4294_v29  ;;  %1723 = vmatpush.bf16.msrb.mxu1 %v3701_v14 }
 0x12b   : > { %v500_v34 = vmax.f32 %v445_v26, 0.0  ;;  %3868 = vmatmul.msk.bf16.gmra.mxu0 %vm4150_vm3, %v4239_v23  ;;  %v3713_v23 = vld [vmem:[%s5465_s3 + $0x168] sm:$0xff]  ;;  %v465_v26 = vadd.f32 %v4127_v55, %v464_v7 }
 0x12c   : > { %1953 = vmatpush.bf16.msrb.mxu2 %v3713_v23 }
 0x12d   : > { %v580_v36 = vrot.slane %v500_v34, 7 }
 0x12f   : > { %v660_v38 = vsel %vm555_vm0, 0.0, %v580_v36  ;;  %v813_v39 = vld [vmem:[#allocation2 + $0xc1] sm:$0xff] }
 0x130   : > { %709 = vst [vmem:[#allocation2 + $0xd8] sm:$0xff] %v660_v38  ;;  %v446_v40 = vpop.f32.mrf.mxu0  ;;  %v814_v42 = vld [vmem:[#allocation2 + $0xc9] sm:$0xff]  ;;  %1954 = vmatpush.bf16.msrb.mxu2 %v3712_v50 }
 0x131   : > { %v447_v43 = vadd.f32 %v4127_v55, %v446_v40  ;;  %v4310_v44 = vpack.c.bf16 %v814_v42, %v813_v39  ;;  %v508_v39 = vmax.f32 %v465_v26, 0.0 }
 0x133   : > { %v501_v25 = vmax.f32 %v447_v43, 0.0  ;;  %958 = vmatmul.bf16.gmra.mxu1 %v4310_v44  ;;  %v4386_v23 = vrot.slane %v508_v39, 7 }
 0x134   : > { %1955 = vmatpush.bf16.msrb.mxu2 %v3711_v58 }
 0x135   : > { %v581_v48 = vrot.slane %v501_v25, 7 }
 0x137   : > { %v582_v45 = vsel %vm555_vm0, %v580_v36, %v581_v48  ;;  %v676_v51 = vsel %vm555_vm0, %v581_v48, 0.0  ;;  %v3700_v48 = vld [vmem:[%s5465_s3 + $0x100] sm:$0xff] }
 0x138   : > { %710 = vst [vmem:[#allocation2 + $0xe0] sm:$0xff] %v582_v45  ;;  %v449_v53 = vpop.f32.mrf.mxu0  ;;  %v4329_v57 = vpack.c.bf16 %v582_v45, %v580_v36  ;;  %1956 = vmatpush.bf16.msrb.mxu2 %v3710_v63  ;;  %v467_v36 = vadd.f32 %v4127_v55, %v466_v32  ;;  %v664_v45 = vsel %vm555_vm0, 0.0, %v4386_v23  ;;  %1724 = vmatpush.bf16.msrb.mxu1 %v3700_v48 }
 0x139   : > { %711 = vst [vmem:[#allocation2 + $0xe8] sm:$0x3] %v676_v51  ;;  %v450_v54 = vadd.f32 %v4127_v55, %v449_v53 }
 0x13a   : > { %3872 = vmatmul.msk.bf16.gmra.mxu2 %vm4150_vm3, %v4329_v57  ;;  %v509_v40 = vmax.f32 %v467_v36, 0.0  ;;  %721 = vst [vmem:[#allocation2 + $0x138] sm:$0xff] %v664_v45 }
 0x13b   : > { %v502_v59 = vmax.f32 %v450_v54, 0.0  ;;  %3876 = vmatmul.msk.bf16.gmra.mxu0 %vm4150_vm3, %v4255_v52 }
 0x13c   : > { %1957 = vmatpush.bf16.msrb.mxu2 %v3709_v10  ;;  %v593_v25 = vrot.slane %v509_v40, 7 }
 0x13d   : > { %v583_v60 = vrot.slane %v502_v59, 7  ;;  %v1061_v61 = vpop.f32.mrf.mxu2 }
 0x13e   : > { %v4396_v54 = vsel %vm555_vm0, %v4386_v23, %v593_v25  ;;  %v680_v30 = vsel %vm555_vm0, %v593_v25, 0.0 }
 0x13f   : > { %v661_v35 = vsel %vm555_vm0, 0.0, %v583_v60  ;;  %v815_v0 = vld [vmem:[#allocation2 + $0xd9] sm:$0xff]  ;;  %722 = vst [vmem:[#allocation2 + $0x140] sm:$0xff] %v4396_v54 }
 0x140   : > { %712 = vst [vmem:[#allocation2 + $0xf0] sm:$0xff] %v661_v35  ;;  %v924_v1 = vpop.f32.mrf.mxu1  ;;  %v451_v2 = vpop.f32.mrf.mxu0  ;;  %v816_v3 = vld [vmem:[#allocation2 + $0xe1] sm:$0xff]  ;;  %1958 = vmatpush.bf16.msrb.mxu2 %v3708_v18 }
 0x141   : > { %v452_v52 = vadd.f32 %v4127_v55, %v451_v2  ;;  %v4351_v5 = vpack.c.bf16 %v816_v3, %v815_v0  ;;  %v4353_v6 = vadd.f32 %v1061_v61, %v924_v1  ;;  %v469_v61 = vpop.f32.mrf.mxu3  ;;  %723 = vst [vmem:[#allocation2 + $0x148] sm:$0x3] %v680_v30 }
 0x142   : > { %v470_v62 = vadd.f32 %v4127_v55, %v469_v61 }
 0x143   : > { %v503_v11 = vmax.f32 %v452_v52, 0.0  ;;  %963 = vmatmul.bf16.gmra.mxu1 %v4351_v5 }
 0x144   : > { %v510_v35 = vmax.f32 %v470_v62, 0.0 }
 0x145   : > { %v584_v12 = vrot.slane %v503_v11, 7  ;;  %v1063_v41 = vpop.f32.mrf.mxu2 }
 0x146   : > { %v4407_v2 = vrot.slane %v510_v35, 7 }
 0x147   : > { %v585_v19 = vsel %vm555_vm0, %v583_v60, %v584_v12  ;;  %v677_v17 = vsel %vm555_vm0, %v584_v12, 0.0 }
 0x148   : > { %713 = vst [vmem:[#allocation2 + $0xf8] sm:$0xff] %v585_v19  ;;  %v926_v20 = vpop.f32.mrf.mxu1  ;;  %v454_v21 = vpop.f32.mrf.mxu0  ;;  %v4374_v34 = vpack.c.bf16 %v585_v19, %v583_v60  ;;  %v665_v10 = vsel %vm555_vm0, 0.0, %v4407_v2 }
 0x149   : > { %714 = vst [vmem:[#allocation2 + $0x100] sm:$0x3] %v677_v17  ;;  %v455_v22 = vadd.f32 %v4127_v55, %v454_v21  ;;  %v4371_v24 = vadd.f32 %v1063_v41, %v926_v20  ;;  %v471_v41 = vpop.f32.mrf.mxu3 }
 0x14a   : > { %3880 = vmatmul.msk.bf16.gmra.mxu2 %vm4150_vm3, %v4374_v34  ;;  %724 = vst [vmem:[#allocation2 + $0x150] sm:$0xff] %v665_v10  ;;  %v472_v18 = vadd.f32 %v4127_v55, %v471_v41 }
 0x14b   : > { %v504_v38 = vmax.f32 %v455_v22, 0.0  ;;  %3884 = vmatmul.msk.bf16.gmra.mxu0 %vm4150_vm3, %v4273_v37 }
 0x14c   : > { %v511_v17 = vmax.f32 %v472_v18, 0.0 }
 0x14d   : > { %v586_v42 = vrot.slane %v504_v38, 7  ;;  %v1066_v43 = vpop.f32.mrf.mxu2 }
 0x14e   : > { %v596_v22 = vrot.slane %v511_v17, 7 }
 0x14f   : > { %v662_v49 = vsel %vm555_vm0, 0.0, %v586_v42  ;;  %v817_v50 = vld [vmem:[#allocation2 + $0xf1] sm:$0xff] }
 0x150   : > { %715 = vst [vmem:[#allocation2 + $0x108] sm:$0xff] %v662_v49  ;;  %v929_v37 = vpop.f32.mrf.mxu1  ;;  %v456_v51 = vpop.f32.mrf.mxu0  ;;  %v818_v53 = vld [vmem:[#allocation2 + $0xf9] sm:$0xff]  ;;  %v4431_v39 = vsel %vm555_vm0, %v4407_v2, %v596_v22  ;;  %v681_v40 = vsel %vm555_vm0, %v596_v22, 0.0 }
 0x151   : > { %v457_v58 = vadd.f32 %v4127_v55, %v456_v51  ;;  %v4400_v59 = vpack.c.bf16 %v818_v53, %v817_v50  ;;  %v4402_v60 = vadd.f32 %v1066_v43, %v929_v37  ;;  %725 = vst [vmem:[#allocation2 + $0x158] sm:$0xff] %v4431_v39  ;;  %v474_v25 = vpop.f32.mrf.mxu3  ;;  %v1838_v51 = vld [vmem:[#allocation2 + $0x1a] sm:$0xff]  ;;  %v1839_v53 = vld [vmem:[#allocation2 + $0x22] sm:$0xff] }
 0x152   : > { %726 = vst [vmem:[#allocation2 + $0x160] sm:$0x3] %v681_v40  ;;  %v475_v48 = vadd.f32 %v4127_v55, %v474_v25  ;;  %v4452_v35 = vpack.c.bf16 %v1839_v53, %v1838_v51  ;;  %v1842_v53 = vld [vmem:[#allocation2 + $0x4a] sm:$0xff] }
 0x153   : > { %v505_v63 = vmax.f32 %v457_v58, 0.0  ;;  %968 = vmatmul.bf16.gmra.mxu1 %v4400_v59 }
 0x154   : > { %v512_v50 = vmax.f32 %v475_v48, 0.0  ;;  %v823_v48 = vld [vmem:[#allocation2 + $0x139] sm:$0xff] }
 0x155   : > { %v587_v0 = vrot.slane %v505_v63, 7  ;;  %v1068_v1 = vpop.f32.mrf.mxu2 }
 0x156   : > { %v4442_v30 = vrot.slane %v512_v50, 7 }
 0x157   : > { %v588_v3 = vsel %vm555_vm0, %v586_v42, %v587_v0  ;;  %v678_v52 = vsel %vm555_vm0, %v587_v0, 0.0 }
 0x158   : > { %716 = vst [vmem:[#allocation2 + $0x110] sm:$0xff] %v588_v3  ;;  %v931_v7 = vpop.f32.mrf.mxu1  ;;  %v459_v8 = vpop.f32.mrf.mxu0  ;;  %v4416_v15 = vpack.c.bf16 %v588_v3, %v586_v42  ;;  %v666_v0 = vsel %vm555_vm0, 0.0, %v4442_v30 }
 0x159   : > { %717 = vst [vmem:[#allocation2 + $0x118] sm:$0x3] %v678_v52  ;;  %v460_v11 = vadd.f32 %v4127_v55, %v459_v8  ;;  %v4414_v12 = vadd.f32 %v1068_v1, %v931_v7  ;;  %v476_v3 = vpop.f32.mrf.mxu3 }
 0x15a   : > { %3888 = vmatmul.msk.bf16.gmra.mxu2 %vm4150_vm3, %v4416_v15  ;;  %727 = vst [vmem:[#allocation2 + $0x168] sm:$0xff] %v666_v0  ;;  %v477_v52 = vadd.f32 %v4127_v55, %v476_v3 }
 0x15b   : > { %v506_v19 = vmax.f32 %v460_v11, 0.0  ;;  %3892 = vmatmul.msk.bf16.gmra.mxu0 %vm4150_vm3, %v4294_v29 }
 0x15c   : > { %v513_v7 = vmax.f32 %v477_v52, 0.0 }
 0x15d   : > { %v4425_v20 = vrot.slane %v506_v19, 7  ;;  %v1071_v21 = vpop.f32.mrf.mxu2 }
 0x15e   : > { %v599_v10 = vrot.slane %v513_v7, 7  ;;  %v825_v7 = vld [vmem:[#allocation2 + $0x151] sm:$0xff] }
 0x15f   : > { %v663_v26 = vsel %vm555_vm0, 0.0, %v4425_v20  ;;  %v819_v32 = vld [vmem:[#allocation2 + $0x109] sm:$0xff] }
 0x160   : > { %718 = vst [vmem:[#allocation2 + $0x120] sm:$0xff] %v663_v26  ;;  %v934_v36 = vpop.f32.mrf.mxu1  ;;  %v461_v14 = vpop.f32.mrf.mxu0  ;;  %v820_v38 = vld [vmem:[#allocation2 + $0x111] sm:$0xff]  ;;  %v4467_v17 = vsel %vm555_vm0, %v4442_v30, %v599_v10 }
 0x161   : > { %v462_v29 = vadd.f32 %v4127_v55, %v461_v14  ;;  %v4435_v42 = vpack.c.bf16 %v820_v38, %v819_v32  ;;  %v4437_v43 = vadd.f32 %v1071_v21, %v934_v36  ;;  %v682_v21 = vsel %vm555_vm0, %v599_v10, 0.0  ;;  %728 = vst [vmem:[#allocation2 + $0x170] sm:$0xff] %v4467_v17  ;;  %v1840_v32 = vld [vmem:[#allocation2 + $0x32] sm:$0xff]  ;;  %v1841_v36 = vld [vmem:[#allocation2 + $0x3a] sm:$0xff] }
 0x162   : > { %729 = vst [vmem:[#allocation2 + $0x178] sm:$0x3] %v682_v21  ;;  %v4479_v40 = vpack.c.bf16 %v1841_v36, %v1840_v32 }
 0x163   : > { %v507_v49 = vmax.f32 %v462_v29, 0.0  ;;  %973 = vmatmul.bf16.gmra.mxu1 %v4435_v42 }
 0x165   : > { %v590_v45 = vrot.slane %v507_v49, 7  ;;  %v1073_v37 = vpop.f32.mrf.mxu2  ;;  %v824_v49 = vld [vmem:[#allocation2 + $0x141] sm:$0xff] }
 0x167   : > { %v4446_v58 = vsel %vm555_vm0, %v4425_v20, %v590_v45  ;;  %v679_v61 = vsel %vm555_vm0, %v590_v45, 0.0  ;;  %v4489_v45 = vpack.c.bf16 %v824_v49, %v823_v48 }
 0x168   : > { %719 = vst [vmem:[#allocation2 + $0x128] sm:$0xff] %v4446_v58  ;;  %v936_v62 = vpop.f32.mrf.mxu1  ;;  %v4450_v63 = vpop.f32.mrf.mxu0 }
 0x169   : > { %720 = vst [vmem:[#allocation2 + $0x130] sm:$0x3] %v679_v61  ;;  %v4456_v1 = vadd.f32 %v1073_v37, %v936_v62  ;;  %v1843_v61 = vld [vmem:[#allocation2 + $0x52] sm:$0xff] }
 0x16a   : > { %1959 = vmatmul.bf16.vlgmr.msrb.gmra.mxu2 %v4452_v35 }
 0x16b   : > { %3896 = vmatmul.msk.bf16.gmra.mxu0 %vm4150_vm3, %v4329_v57 }
 0x16d   : > { %v1076_v8 = vpop.f32.mrf.mxu2 }
 0x16f   : > { %v821_v11 = vld [vmem:[#allocation2 + $0x121] sm:$0xff] }
 0x170   : > { %v939_v41 = vpop.f32.mrf.mxu1  ;;  %v4463_v18 = vpop.f32.mrf.mxu0  ;;  %v822_v19 = vld [vmem:[#allocation2 + $0x129] sm:$0xff] }
 0x171   : > { %5472 = vst [vmem:[#allocation3_spill] sm:$0xff] %v4463_v18  ;;  %v4470_v22 = vpack.c.bf16 %v822_v19, %v821_v11  ;;  %v4472_v26 = vadd.f32 %v1076_v8, %v939_v41  ;;  %v826_v8 = vld [vmem:[#allocation2 + $0x159] sm:$0xff] }
 0x172   : > { %v4507_v11 = vpack.c.bf16 %v826_v8, %v825_v7  ;;  %v3691_v19 = vld [vmem:[%s5465_s3 + $0xb8] sm:$0xff]  ;;  %v1847_v8 = vld [vmem:[#allocation2 + $0x82] sm:$0xff] }
 0x173   : > { %978 = vmatmul.bf16.vlgmr.msrb.gmra.mxu3 %v4470_v22  ;;  %1725 = vmatmul.bf16.vlgmr.msrb.gmra.mxu1 %v4170_v31  ;;  %v1846_v7 = vld [vmem:[#allocation2 + $0x7a] sm:$0xff] }
 0x174   : > { %1249 = vmatpush.bf16.msrb.mxu3 %v3691_v19 }
 0x175   : > { %v1078_v57 = vpop.f32.mrf.mxu2 }
 0x178   : > { %v941_v14 = vpop.f32.mrf.mxu1  ;;  %v4477_v38 = vpop.f32.mrf.mxu0 }
 0x179   : > { %5473 = vst [vmem:[#allocation4_spill] sm:$0xff] %v4477_v38  ;;  %v4481_v29 = vadd.f32 %v1078_v57, %v941_v14  ;;  %v1845_v57 = vld [vmem:[#allocation2 + $0x6a] sm:$0xff] }
 0x17a   : > { %1964 = vmatmul.bf16.gmra.mxu2 %v4479_v40 }
 0x17b   : > { %3900 = vmatmul.msk.bf16.gmra.mxu0 %vm4150_vm3, %v4374_v34  ;;  %v4497_v34 = vpack.c.bf16 %v1843_v61, %v1842_v53 }
 0x17d   : > { %v1081_v25 = vpop.f32.mrf.mxu2 }
 0x180   : > { %v944_v31 = vpop.f32.mrf.mxu1  ;;  %v4487_v50 = vpop.f32.mrf.mxu0 }
 0x181   : > { %5474 = vst [vmem:[#allocation5_spill] sm:$0xff] %v4487_v50  ;;  %v4491_v37 = vadd.f32 %v1081_v25, %v944_v31  ;;  %v3690_v25 = vld [vmem:[%s5465_s3 + $0xb0] sm:$0xff] }
 0x182   : > { %1250 = vmatpush.bf16.msrb.mxu3 %v3690_v25  ;;  %v827_v31 = vld [vmem:[#allocation2 + $0x169] sm:$0xff] }
 0x183   : > { %983 = vmatmul.bf16.gmra.mxu3 %v4489_v45  ;;  %1730 = vmatmul.bf16.gmra.mxu1 %v4197_v56 }
 0x185   : > { %v1083_v51 = vpop.f32.mrf.mxu2 }
 0x188   : > { %v946_v62 = vpop.f32.mrf.mxu1  ;;  %v4495_v0 = vpop.f32.mrf.mxu0 }
 0x189   : > { %5475 = vst [vmem:[#allocation6_spill] sm:$0xff] %v4495_v0  ;;  %v4499_v3 = vadd.f32 %v1083_v51, %v946_v62  ;;  %v828_v51 = vld [vmem:[#allocation2 + $0x171] sm:$0xff] }
 0x18a   : > { %1969 = vmatmul.bf16.gmra.mxu2 %v4497_v34  ;;  %v4532_v62 = vpack.c.bf16 %v828_v51, %v827_v31  ;;  %v3731_v31 = vld [vmem:[%s5465_s3 + $0x1f8] sm:$0xff] }
 0x18b   : > { %3904 = vmatmul.msk.bf16.gmra.mxu0 %vm4150_vm3, %v4416_v15  ;;  %v1844_v15 = vld [vmem:[#allocation2 + $0x62] sm:$0xff] }
 0x18c   : > { %v4518_v14 = vpack.c.bf16 %v1845_v57, %v1844_v15  ;;  %v3688_v57 = vld [vmem:[%s5465_s3 + $0xa0] sm:$0xff]  ;;  %2420 = vmatpush.bf16.msra.mxu0 %v3731_v31  ;;  %v1848_v31 = vld [vmem:[#allocation2 + $0x92] sm:$0xff] }
 0x18d   : > { %v1086_v52 = vpop.f32.mrf.mxu2 }
 0x190   : > { %v949_v56 = vpop.f32.mrf.mxu1  ;;  %v4505_v10 = vpop.f32.mrf.mxu0 }
 0x191   : > { %5476 = vst [vmem:[#allocation7_spill] sm:$0xff] %v4505_v10  ;;  %v4509_v41 = vadd.f32 %v1086_v52, %v949_v56  ;;  %v479_v56 = vpop.f32.mrf.mxu3 }
 0x192   : > { %v480_v15 = vadd.f32 %v4127_v55, %v479_v56 }
 0x193   : > { %988 = vmatmul.bf16.gmra.mxu3 %v4507_v11  ;;  %1735 = vmatmul.bf16.gmra.mxu1 %v4217_v9  ;;  %v3907_v9 = vpack.c.bf16 %v4446_v58, %v4425_v20  ;;  %v3689_v20 = vld [vmem:[%s5465_s3 + $0xa8] sm:$0xff] }
 0x194   : > { %1251 = vmatpush.bf16.msrb.mxu3 %v3689_v20  ;;  %v514_v25 = vmax.f32 %v480_v15, 0.0  ;;  %v3687_v15 = vld [vmem:[%s5465_s3 + $0x98] sm:$0xff] }
 0x195   : > { %v1088_v21 = vpop.f32.mrf.mxu2 }
 0x196   : > { %v4559_v51 = vrot.slane %v514_v25, 7 }
 0x198   : > { %v951_v32 = vpop.f32.mrf.mxu1  ;;  %v4516_v36 = vpop.f32.mrf.mxu0  ;;  %1252 = vmatpush.bf16.msrb.mxu3 %v3688_v57  ;;  %v667_v20 = vsel %vm555_vm0, 0.0, %v4559_v51  ;;  %v3729_v57 = vld [vmem:[%s5465_s3 + $0x1e8] sm:$0xff] }
 0x199   : > { %5477 = vst [vmem:[#allocation8_spill] sm:$0xff] %v4516_v36  ;;  %v4523_v48 = vadd.f32 %v1088_v21, %v951_v32  ;;  %v4541_v21 = vpack.c.bf16 %v1847_v8, %v1846_v7 }
 0x19a   : > { %1974 = vmatmul.bf16.gmra.mxu2 %v4518_v14  ;;  %730 = vst [vmem:[#allocation2 + $0x180] sm:$0xff] %v667_v20 }
 0x19b   : > { %3908 = vmatmul.msk.bf16.gmra.mxu0 %vm4150_vm3, %v3907_v9 }
 0x19c   : > { %1253 = vmatpush.bf16.msrb.mxu3 %v3687_v15  ;;  %v3727_v15 = vld [vmem:[%s5465_s3 + $0x1d8] sm:$0xff] }
 0x19d   : > { %v1091_v49 = vpop.f32.mrf.mxu2 }
 0x1a0   : > { %v954_v53 = vpop.f32.mrf.mxu1  ;;  %v4530_v61 = vpop.f32.mrf.mxu0 }
 0x1a1   : > { %5478 = vst [vmem:[#allocation9_spill] sm:$0xff] %v4530_v61  ;;  %v4534_v52 = vadd.f32 %v1091_v49, %v954_v53  ;;  %v3911_v49 = vpack.c.bf16 %v4396_v54, %v4386_v23  ;;  %v3730_v23 = vld [vmem:[%s5465_s3 + $0x1f0] sm:$0xff] }
 0x1a2   : > { %2421 = vmatpush.bf16.msra.mxu0 %v3730_v23  ;;  %v3728_v23 = vld [vmem:[%s5465_s3 + $0x1e0] sm:$0xff] }
 0x1a3   : > { %993 = vmatmul.bf16.gmra.mxu3 %v4532_v62  ;;  %1740 = vmatmul.bf16.gmra.mxu1 %v4233_v28 }
 0x1a5   : > { %v1093_v58 = vpop.f32.mrf.mxu2 }
 0x1a6   : > { %2422 = vmatpush.bf16.msra.mxu0 %v3729_v57 }
 0x1a8   : > { %v956_v19 = vpop.f32.mrf.mxu1  ;;  %v4547_v32 = vpop.f32.mrf.mxu0 }
 0x1a9   : > { %5479 = vst [vmem:[#allocation10_spill] sm:$0xff] %v4547_v32  ;;  %v4549_v28 = vadd.f32 %v1093_v58, %v956_v19  ;;  %v481_v58 = vpop.f32.mrf.mxu3 }
 0x1aa   : > { %1979 = vmatmul.bf16.gmra.mxu2 %v4541_v21  ;;  %v482_v7 = vadd.f32 %v4127_v55, %v481_v58  ;;  %2423 = vmatpush.bf16.msra.mxu0 %v3728_v23  ;;  %v1851_v23 = vld [vmem:[#allocation2 + $0xb2] sm:$0xff] }
 0x1ab   : > { %3912 = vmatmul.msk.bf16.gmra.mxu0 %vm4150_vm3, %v3911_v49 }
 0x1ac   : > { %v515_v56 = vmax.f32 %v482_v7, 0.0 }
 0x1ad   : > { %v1096_v53 = vpop.f32.mrf.mxu2 }
 0x1ae   : > { %v602_v55 = vrot.slane %v515_v56, 7  ;;  %v3919_v56 = vpack.c.bf16 %v4431_v39, %v4407_v2  ;;  %2424 = vmatpush.bf16.msra.mxu0 %v3727_v15  ;;  %v3685_v2 = vld [vmem:[%s5465_s3 + $0x88] sm:$0xff] }
 0x1af   : > { %v3725_v39 = vld [vmem:[%s5465_s3 + $0x1c8] sm:$0xff] }
 0x1b0   : > { %v959_v54 = vpop.f32.mrf.mxu1  ;;  %v4569_v19 = vpop.f32.mrf.mxu0  ;;  %v603_v20 = vsel %vm555_vm0, %v4559_v51, %v602_v55 }
 0x1b1   : > { %v4567_v8 = vadd.f32 %v1096_v53, %v959_v54  ;;  %5480 = vst [vmem:[#allocation11_spill] sm:$0xff] %v4569_v19  ;;  %v1849_v53 = vld [vmem:[#allocation2 + $0x9a] sm:$0xff]  ;;  %v3686_v54 = vld [vmem:[%s5465_s3 + $0x90] sm:$0xff] }
 0x1b2   : > { %731 = vst [vmem:[#allocation2 + $0x188] sm:$0xff] %v603_v20  ;;  %v4583_v58 = vpack.c.bf16 %v1849_v53, %v1848_v31  ;;  %1254 = vmatpush.bf16.msrb.mxu3 %v3686_v54  ;;  %v3726_v31 = vld [vmem:[%s5465_s3 + $0x1d0] sm:$0xff] }
 0x1b3   : > { %3916 = vmatmul.msk.bf16.vlgmr.msra.gmra.mxu3 %vm4150_vm3, %v3907_v9  ;;  %1745 = vmatmul.bf16.gmra.mxu1 %v4249_v47  ;;  %v683_v9 = vsel %vm555_vm0, %v602_v55, 0.0 }
 0x1b4   : > { %732 = vst [vmem:[#allocation2 + $0x190] sm:$0x3] %v683_v9  ;;  %2425 = vmatpush.bf16.msra.mxu0 %v3726_v31  ;;  %v3927_v31 = vpack.c.bf16 %v4467_v17, %v4442_v30  ;;  %v1852_v17 = vld [vmem:[#allocation2 + $0xc2] sm:$0xff] }
 0x1b5   : > { %v1098_v25 = vpop.f32.mrf.mxu2 }
 0x1b6   : > { %1255 = vmatpush.bf16.msrb.mxu3 %v3685_v2 }
 0x1b8   : > { %v961_v47 = vpop.f32.mrf.mxu1  ;;  %v4601_v57 = vpop.f32.mrf.mxu0  ;;  %2426 = vmatpush.bf16.msra.mxu0 %v3725_v39 }
 0x1b9   : > { %v4591_v7 = vadd.f32 %v1098_v25, %v961_v47  ;;  %5481 = vst [vmem:[#allocation12_spill] sm:$0xff] %v4601_v57  ;;  %v1850_v47 = vld [vmem:[#allocation2 + $0xaa] sm:$0xff] }
 0x1ba   : > { %1984 = vmatmul.bf16.gmra.mxu2 %v4583_v58 }
 0x1bb   : > { %3920 = vmatmul.msk.bf16.gmra.mxu0 %vm4150_vm3, %v3919_v56 }
 0x1bd   : > { %v1101_v55 = vpop.f32.mrf.mxu2 }
 0x1c0   : > { %v964_v25 = vpop.f32.mrf.mxu1  ;;  %v4617_v54 = vpop.f32.mrf.mxu0 }
 0x1c1   : > { %v4606_v53 = vadd.f32 %v1101_v55, %v964_v25  ;;  %5482 = vst [vmem:[#allocation13_spill] sm:$0xff] %v4617_v54  ;;  %v4619_v55 = vpack.c.bf16 %v1851_v23, %v1850_v47 }
 0x1c3   : > { %3924 = vmatmul.msk.bf16.gmra.mxu3 %vm4150_vm3, %v3911_v49  ;;  %1750 = vmatmul.bf16.gmra.mxu1 %v4265_v33  ;;  %v3724_v33 = vld [vmem:[%s5465_s3 + $0x1c0] sm:$0xff] }
 0x1c4   : > { %v3684_v49 = vld [vmem:[%s5465_s3 + $0x80] sm:$0xff]  ;;  %2427 = vmatpush.bf16.msra.mxu0 %v3724_v33 }
 0x1c5   : > { %v1103_v9 = vpop.f32.mrf.mxu2  ;;  %1256 = vmatpush.bf16.msrb.mxu3 %v3684_v49 }
 0x1c8   : > { %v966_v15 = vpop.f32.mrf.mxu1  ;;  %v4634_v47 = vpop.f32.mrf.mxu0 }
 0x1c9   : > { %v4627_v25 = vadd.f32 %v1103_v9, %v966_v15  ;;  %5483 = vst [vmem:[#allocation14_spill] sm:$0xff] %v4634_v47  ;;  %v3723_v9 = vld [vmem:[%s5465_s3 + $0x1b8] sm:$0xff]  ;;  %v1853_v15 = vld [vmem:[#allocation2 + $0xca] sm:$0xff] }
 0x1ca   : > { %1989 = vmatmul.bf16.gmra.mxu2 %v4619_v55  ;;  %2186 = vmatpush.bf16.msra.mxu3 %v3723_v9  ;;  %v4644_v49 = vpack.c.bf16 %v1853_v15, %v1852_v17  ;;  %v2307_v15 = vld [vmem:[#allocation2 + $0x31] sm:$0xff] }
 0x1cb   : > { %3928 = vmatmul.msk.bf16.gmra.mxu0 %vm4150_vm3, %v3927_v31 }
 0x1cd   : > { %v1106_v2 = vpop.f32.mrf.mxu2 }
 0x1d0   : > { %v969_v39 = vpop.f32.mrf.mxu1 }
 0x1d1   : > { %v4636_v23 = vadd.f32 %v1106_v2, %v969_v39  ;;  %v4649_v2 = vpop.f32.mrf.mxu0 }
 0x1d2   : > { %5484 = vst [vmem:[#allocation15_spill] sm:$0xff] %v4649_v2 }
 0x1d3   : > { %3932 = vmatmul.msk.bf16.gmra.mxu3 %vm4150_vm3, %v3919_v56  ;;  %1755 = vmatmul.bf16.gmra.mxu1 %v4287_v16  ;;  %v3935_v56 = vpack.c.bf16 %v603_v20, %v4559_v51  ;;  %v3739_v16 = vld [vmem:[%s5465_s3 + $0x238] sm:$0xff]  ;;  %v1855_v20 = vld [vmem:[#allocation2 + $0xe2] sm:$0xff] }
 0x1d4   : > { %2654 = vmatpush.bf16.msra.mxu1 %v3739_v16  ;;  %v1854_v51 = vld [vmem:[#allocation2 + $0xda] sm:$0xff] }
 0x1d5   : > { %v1108_v30 = vpop.f32.mrf.mxu2  ;;  %v4664_v47 = vpack.c.bf16 %v1855_v20, %v1854_v51  ;;  %v3722_v51 = vld [vmem:[%s5465_s3 + $0x1b0] sm:$0xff] }
 0x1d6   : > { %v1856_v20 = vld [vmem:[#allocation2 + $0xf2] sm:$0xff]  ;;  %2187 = vmatpush.bf16.msra.mxu3 %v3722_v51 }
 0x1d8   : > { %v971_v33 = vpop.f32.mrf.mxu1 }
 0x1d9   : > { %v4646_v54 = vadd.f32 %v1108_v30, %v971_v33  ;;  %v4662_v30 = vpop.f32.mrf.mxu0  ;;  %v2308_v33 = vld [vmem:[#allocation2 + $0x39] sm:$0xff] }
 0x1da   : > { %1994 = vmatmul.bf16.gmra.mxu2 %v4644_v49  ;;  %5485 = vst [vmem:[#allocation16_spill] sm:$0xff] %v4662_v30  ;;  %v2339_v16 = vpack.c.bf16 %v2308_v33, %v2307_v15  ;;  %v2309_v33 = vld [vmem:[#allocation2 + $0x49] sm:$0xff] }
 0x1db   : > { %3936 = vmatmul.msk.bf16.gmra.mxu0 %vm4150_vm3, %v3935_v56 }
 0x1dd   : > { %v1111_v39 = vpop.f32.mrf.mxu2 }
 0x1e0   : > { %v974_v9 = vpop.f32.mrf.mxu1 }
 0x1e1   : > { %v4657_v17 = vadd.f32 %v1111_v39, %v974_v9  ;;  %v4669_v39 = vpop.f32.mrf.mxu0 }
 0x1e2   : > { %5486 = vst [vmem:[#allocation17_spill] sm:$0xff] %v4669_v39 }
 0x1e3   : > { %3940 = vmatmul.msk.bf16.gmra.mxu3 %vm4150_vm3, %v3927_v31  ;;  %1760 = vmatmul.bf16.gmra.mxu1 %v4310_v44  ;;  %v1137_v31 = vld [vmem:[#allocation2 + $0xa] sm:$0xff] }
 0x1e4   : > { %v1168_v44 = vpack.c.bf16 %v1137_v31, %v1136_v13 }
 0x1e5   : > { %v1113_v2 = vpop.f32.mrf.mxu2 }
 0x1e8   : > { %v976_v56 = vpop.f32.mrf.mxu1 }
 0x1e9   : > { %v4666_v57 = vadd.f32 %v1113_v2, %v976_v56  ;;  %v1857_v2 = vld [vmem:[#allocation2 + $0xfa] sm:$0xff]  ;;  %v2310_v56 = vld [vmem:[#allocation2 + $0x51] sm:$0xff]  ;;  %v4683_v13 = vpop.f32.mrf.mxu0 }
 0x1ea   : > { %1999 = vmatmul.bf16.gmra.mxu2 %v4664_v47  ;;  %v4681_v39 = vpack.c.bf16 %v1857_v2, %v1856_v20  ;;  %5488 = vst [vmem:[#allocation19_spill] sm:$0xff] %v4683_v13  ;;  %v2340_v31 = vpack.c.bf16 %v2310_v56, %v2309_v33  ;;  %v1858_v20 = vld [vmem:[#allocation2 + $0x10a] sm:$0xff]  ;;  %v1859_v2 = vld [vmem:[#allocation2 + $0x112] sm:$0xff]  ;;  %v2311_v56 = vld [vmem:[#allocation2 + $0x61] sm:$0xff] }
 0x1eb   : > { %2428 = vmatmul.bf16.vlgmr.msra.gmra.mxu0 %v2339_v16  ;;  %v4701_v19 = vpack.c.bf16 %v1859_v2, %v1858_v20  ;;  %v1860_v2 = vld [vmem:[#allocation2 + $0x122] sm:$0xff] }
 0x1ed   : > { %v4715_v20 = vpop.f32.mrf.mxu2 }
 0x1ee   : > { %5494 = vst [vmem:[#allocation25_spill] sm:$0xff] %v4715_v20  ;;  %v1635_v20 = vld [vmem:[#allocation2 + $0x189] sm:$0xff] }
 0x1f0   : > { %v4671_v9 = vpop.f32.mrf.mxu1 }
 0x1f1   : > { %v4693_v30 = vpop.f32.mrf.mxu0 }
 0x1f2   : > { %5490 = vst [vmem:[#allocation21_spill] sm:$0xff] %v4693_v30 }
 0x1f3   : > { %1257 = vmatmul.bf16.vlgmr.msrb.gmra.mxu3 %v1168_v44  ;;  %1765 = vmatmul.bf16.gmra.mxu1 %v4351_v5  ;;  %v3738_v5 = vld [vmem:[%s5465_s3 + $0x230] sm:$0xff] }
 0x1f4   : > { %2655 = vmatpush.bf16.msra.mxu1 %v3738_v5 }
 0x1f6   : > { %v4677_v15 = vpop.f32.mrf.mxu3 }
 0x1f8   : > { %v4679_v16 = vpop.f32.mrf.mxu1 }
 0x1f9   : > { %5487 = vst [vmem:[#allocation18_spill] sm:$0xff] %v4679_v16  ;;  %v4704_v32 = vpop.f32.mrf.mxu0 }
 0x1fa   : > { %2004 = vmatmul.bf16.gmra.mxu2 %v4681_v39  ;;  %5492 = vst [vmem:[#allocation23_spill] sm:$0xff] %v4704_v32  ;;  %v2314_v32 = vld [vmem:[#allocation2 + $0x81] sm:$0xff] }
 0x1fb   : > { %2433 = vmatmul.bf16.gmra.mxu0 %v2340_v31  ;;  %v2312_v31 = vld [vmem:[#allocation2 + $0x69] sm:$0xff] }
 0x1fc   : > { %v2341_v5 = vpack.c.bf16 %v2312_v31, %v2311_v56  ;;  %v1861_v56 = vld [vmem:[#allocation2 + $0x12a] sm:$0xff] }
 0x1fd   : > { %v4723_v10 = vpack.c.bf16 %v1861_v56, %v1860_v2  ;;  %v1863_v2 = vld [vmem:[#allocation2 + $0x142] sm:$0xff] }
 0x1fe   : > { %v4689_v44 = vpop.f32.mrf.mxu3 }
 0x200   : > { %v4691_v51 = vpop.f32.mrf.mxu1 }
 0x201   : > { %5489 = vst [vmem:[#allocation20_spill] sm:$0xff] %v4691_v51  ;;  %v4719_v61 = vpop.f32.mrf.mxu0 }
 0x202   : > { %5495 = vst [vmem:[#allocation26_spill] sm:$0xff] %v4719_v61 }
 0x203   : > { %1262 = vmatmul.bf16.gmra.mxu3 %v4452_v35  ;;  %1770 = vmatmul.bf16.gmra.mxu1 %v4400_v59  ;;  %v3721_v59 = vld [vmem:[%s5465_s3 + $0x1a8] sm:$0xff] }
 0x204   : > { %2188 = vmatpush.bf16.msra.mxu3 %v3721_v59  ;;  %v4729_v59 = vpop.f32.mrf.mxu2 }
 0x205   : > { %5497 = vst [vmem:[#allocation28_spill] sm:$0xff] %v4729_v59 }
 0x206   : > { %v4697_v33 = vpop.f32.mrf.mxu3 }
 0x208   : > { %v4699_v13 = vpop.f32.mrf.mxu1 }
 0x209   : > { %5491 = vst [vmem:[#allocation22_spill] sm:$0xff] %v4699_v13  ;;  %v4735_v61 = vpop.f32.mrf.mxu0 }
 0x20a   : > { %2009 = vmatmul.bf16.gmra.mxu2 %v4701_v19  ;;  %5499 = vst [vmem:[#allocation30_spill] sm:$0xff] %v4735_v61 }
 0x20b   : > { %2438 = vmatmul.bf16.gmra.mxu0 %v2341_v5  ;;  %v2313_v5 = vld [vmem:[#allocation2 + $0x79] sm:$0xff] }
 0x20e   : > { %v4706_v30 = vpop.f32.mrf.mxu3 }
 0x210   : > { %v4708_v35 = vpop.f32.mrf.mxu1 }
 0x211   : > { %5493 = vst [vmem:[#allocation24_spill] sm:$0xff] %v4708_v35  ;;  %v3737_v35 = vld [vmem:[%s5465_s3 + $0x228] sm:$0xff]  ;;  %v4748_v61 = vpop.f32.mrf.mxu0 }
 0x212   : > { %2656 = vmatpush.bf16.msra.mxu1 %v3737_v35  ;;  %5502 = vst [vmem:[#allocation33_spill] sm:$0xff] %v4748_v61  ;;  %v2317_v61 = vld [vmem:[#allocation2 + $0xa9] sm:$0xff] }
 0x213   : > { %1267 = vmatmul.bf16.gmra.mxu3 %v4479_v40  ;;  %1775 = vmatmul.bf16.gmra.mxu1 %v4435_v42  ;;  %v2342_v42 = vpack.c.bf16 %v2314_v32, %v2313_v5  ;;  %v1862_v32 = vld [vmem:[#allocation2 + $0x13a] sm:$0xff]  ;;  %v2315_v5 = vld [vmem:[#allocation2 + $0x91] sm:$0xff] }
 0x214   : > { %v4745_v50 = vpack.c.bf16 %v1863_v2, %v1862_v32  ;;  %v3720_v32 = vld [vmem:[%s5465_s3 + $0x1a0] sm:$0xff] }
 0x215   : > { %2189 = vmatpush.bf16.msra.mxu3 %v3720_v32 }
 0x216   : > { %v4717_v31 = vpop.f32.mrf.mxu3 }
 0x218   : > { %v4721_v36 = vpop.f32.mrf.mxu1 }
 0x219   : > { %5496 = vst [vmem:[#allocation27_spill] sm:$0xff] %v4721_v36  ;;  %v4741_v36 = vpop.f32.mrf.mxu2  ;;  %v4761_v2 = vpop.f32.mrf.mxu0 }
 0x21a   : > { %2014 = vmatmul.bf16.gmra.mxu2 %v4723_v10  ;;  %5500 = vst [vmem:[#allocation31_spill] sm:$0xff] %v4741_v36 }
 0x21b   : > { %2443 = vmatmul.bf16.gmra.mxu0 %v2342_v42  ;;  %v2316_v42 = vld [vmem:[#allocation2 + $0x99] sm:$0xff]  ;;  %5505 = vst [vmem:[#allocation36_spill] sm:$0xff] %v4761_v2 }
 0x21c   : > { %v2343_v51 = vpack.c.bf16 %v2316_v42, %v2315_v5  ;;  %v1864_v5 = vld [vmem:[#allocation2 + $0x152] sm:$0xff]  ;;  %v1865_v42 = vld [vmem:[#allocation2 + $0x15a] sm:$0xff] }
 0x21d   : > { %v3736_v2 = vld [vmem:[%s5465_s3 + $0x220] sm:$0xff] }
 0x21e   : > { %v4731_v0 = vpop.f32.mrf.mxu3  ;;  %2657 = vmatpush.bf16.msra.mxu1 %v3736_v2 }
 0x220   : > { %v4733_v13 = vpop.f32.mrf.mxu1 }
 0x221   : > { %5498 = vst [vmem:[#allocation29_spill] sm:$0xff] %v4733_v13  ;;  %v4754_v59 = vpop.f32.mrf.mxu2  ;;  %v4776_v16 = vpop.f32.mrf.mxu0 }
 0x222   : > { %5504 = vst [vmem:[#allocation35_spill] sm:$0xff] %v4754_v59  ;;  %v4766_v59 = vpack.c.bf16 %v1865_v42, %v1864_v5  ;;  %v1867_v5 = vld [vmem:[#allocation2 + $0x172] sm:$0xff] }
 0x223   : > { %1272 = vmatmul.bf16.gmra.mxu3 %v4497_v34  ;;  %1780 = vmatmul.bf16.gmra.mxu1 %v4470_v22  ;;  %5508 = vst [vmem:[#allocation39_spill] sm:$0xff] %v4776_v16  ;;  %v2320_v16 = vld [vmem:[#allocation2 + $0xc9] sm:$0xff] }
 0x226   : > { %v4739_v56 = vpop.f32.mrf.mxu3 }
 0x228   : > { %v4743_v35 = vpop.f32.mrf.mxu1 }
 0x229   : > { %5501 = vst [vmem:[#allocation32_spill] sm:$0xff] %v4743_v35  ;;  %v2318_v35 = vld [vmem:[#allocation2 + $0xb1] sm:$0xff]  ;;  %v4774_v38 = vpop.f32.mrf.mxu2 }
 0x22a   : > { %2019 = vmatmul.bf16.gmra.mxu2 %v4745_v50  ;;  %v2344_v36 = vpack.c.bf16 %v2318_v35, %v2317_v61  ;;  %5507 = vst [vmem:[#allocation38_spill] sm:$0xff] %v4774_v38  ;;  %v1866_v35 = vld [vmem:[#allocation2 + $0x16a] sm:$0xff] }
 0x22b   : > { %2448 = vmatmul.bf16.gmra.mxu0 %v2343_v51 }
 0x22e   : > { %v4750_v13 = vpop.f32.mrf.mxu3 }
 0x230   : > { %v4752_v22 = vpop.f32.mrf.mxu1 }
 0x231   : > { %5503 = vst [vmem:[#allocation34_spill] sm:$0xff] %v4752_v22  ;;  %v4788_v2 = vpop.f32.mrf.mxu2 }
 0x232   : > { %5510 = vst [vmem:[#allocation41_spill] sm:$0xff] %v4788_v2 }
 0x233   : > { %1277 = vmatmul.bf16.gmra.mxu3 %v4518_v14  ;;  %1785 = vmatmul.bf16.gmra.mxu1 %v4489_v45 }
 0x236   : > { %v1116_v51 = vpop.f32.mrf.mxu3 }
 0x237   : > { %v4764_v22 = vadd.f32 %v1116_v51, %v4677_v15  ;;  %v2319_v51 = vld [vmem:[#allocation2 + $0xc1] sm:$0xff] }
 0x238   : > { %v4769_v45 = vpop.f32.mrf.mxu1 }
 0x239   : > { %5506 = vst [vmem:[#allocation37_spill] sm:$0xff] %v4769_v45  ;;  %v4798_v45 = vpop.f32.mrf.mxu0 }
 0x23a   : > { %2024 = vmatmul.bf16.gmra.mxu2 %v4766_v59  ;;  %5511 = vst [vmem:[#allocation42_spill] sm:$0xff] %v4798_v45 }
 0x23b   : > { %2453 = vmatmul.bf16.gmra.mxu0 %v2344_v36  ;;  %v3735_v36 = vld [vmem:[%s5465_s3 + $0x218] sm:$0xff] }
 0x23c   : > { %2658 = vmatpush.bf16.msra.mxu1 %v3735_v36  ;;  %v3733_v36 = vld [vmem:[%s5465_s3 + $0x208] sm:$0xff] }
 0x23e   : > { %v1118_v32 = vpop.f32.mrf.mxu3 }
 0x23f   : > { %v4779_v15 = vadd.f32 %v1118_v32, %v4689_v44  ;;  %v4796_v32 = vpack.c.bf16 %v1867_v5, %v1866_v35  ;;  %v3732_v35 = vld [vmem:[%s5465_s3 + $0x200] sm:$0xff] }
 0x240   : > { %v4786_v61 = vpop.f32.mrf.mxu1 }
 0x241   : > { %5509 = vst [vmem:[#allocation40_spill] sm:$0xff] %v4786_v61  ;;  %v2345_v61 = vpack.c.bf16 %v2320_v16, %v2319_v51  ;;  %v4812_v16 = vpop.f32.mrf.mxu2  ;;  %v4814_v5 = vpop.f32.mrf.mxu0  ;;  %v1868_v51 = vld [vmem:[#allocation2 + $0x182] sm:$0xff] }
 0x242   : > { %5513 = vst [vmem:[#allocation44_spill] sm:$0xff] %v4812_v16 }
 0x243   : > { %1282 = vmatmul.bf16.gmra.mxu3 %v4541_v21  ;;  %1790 = vmatmul.bf16.gmra.mxu1 %v4507_v11  ;;  %v3734_v11 = vld [vmem:[%s5465_s3 + $0x210] sm:$0xff]  ;;  %5514 = vst [vmem:[#allocation45_spill] sm:$0xff] %v4814_v5 }
 0x244   : > { %2659 = vmatpush.bf16.msra.mxu1 %v3734_v11 }
 0x246   : > { %v1121_v42 = vpop.f32.mrf.mxu3 }
 0x247   : > { %v4791_v44 = vadd.f32 %v1121_v42, %v4697_v33 }
 0x248   : > { %2660 = vmatpush.bf16.msra.mxu1 %v3733_v36  ;;  %v4804_v42 = vpop.f32.mrf.mxu1  ;;  %v2321_v36 = vld [vmem:[#allocation2 + $0xd9] sm:$0xff] }
 0x249   : > { %5512 = vst [vmem:[#allocation43_spill] sm:$0xff] %v4804_v42  ;;  %v4828_v16 = vpop.f32.mrf.mxu2 }
 0x24a   : > { %2029 = vmatmul.bf16.gmra.mxu2 %v4796_v32 }
 0x24b   : > { %2458 = vmatmul.bf16.gmra.mxu0 %v2345_v61  ;;  %v3719_v61 = vld [vmem:[%s5465_s3 + $0x198] sm:$0xff] }
 0x24c   : > { %2661 = vmatpush.bf16.msra.mxu1 %v3732_v35  ;;  %2190 = vmatpush.bf16.msra.mxu3 %v3719_v61  ;;  %v1634_v61 = vld [vmem:[#allocation2 + $0x181] sm:$0xff] }
 0x24e   : > { %v1123_v33 = vpop.f32.mrf.mxu3 }
 0x24f   : > { %v4807_v2 = vadd.f32 %v1123_v33, %v4706_v30  ;;  %v1869_v30 = vld [vmem:[#allocation2 + $0x18a] sm:$0xff]  ;;  %v2322_v33 = vld [vmem:[#allocation2 + $0xe1] sm:$0xff] }
 0x250   : > { %v4824_v35 = vpack.c.bf16 %v1869_v30, %v1868_v51  ;;  %v4826_v5 = vpop.f32.mrf.mxu1  ;;  %v2346_v42 = vpack.c.bf16 %v2322_v33, %v2321_v36  ;;  %v2324_v36 = vld [vmem:[#allocation2 + $0xf9] sm:$0xff] }
 0x253   : > { %1287 = vmatmul.bf16.gmra.mxu3 %v4583_v58  ;;  %1795 = vmatmul.bf16.gmra.mxu1 %v4532_v62  ;;  %v4831_v62 = vpop.f32.mrf.mxu0 }
 0x254   : > { %5515 = vst [vmem:[#allocation46_spill] sm:$0xff] %v4831_v62 }
 0x256   : > { %v1126_v11 = vpop.f32.mrf.mxu3 }
 0x257   : > { %v4822_v45 = vadd.f32 %v1126_v11, %v4717_v31  ;;  %v4836_v31 = vpack.c.bf16 %v1635_v20, %v1634_v61  ;;  %v2323_v11 = vld [vmem:[#allocation2 + $0xf1] sm:$0xff] }
 0x258   : > { %v4838_v51 = vpop.f32.mrf.mxu1  ;;  %v2347_v62 = vpack.c.bf16 %v2324_v36, %v2323_v11  ;;  %v2326_v11 = vld [vmem:[#allocation2 + $0x111] sm:$0xff] }
 0x259   : > { %5516 = vst [vmem:[#allocation47_spill] sm:$0xff] %v4838_v51 }
 0x25a   : > { %2034 = vmatmul.bf16.gmra.mxu2 %v4824_v35 }
 0x25b   : > { %2463 = vmatmul.bf16.gmra.mxu0 %v2346_v42  ;;  %v4842_v42 = vpop.f32.mrf.mxu0 }
 0x25c   : > { %5517 = vst [vmem:[#allocation48_spill] sm:$0xff] %v4842_v42 }
 0x25e   : > { %v1128_v38 = vpop.f32.mrf.mxu3 }
 0x25f   : > { %v4834_v18 = vadd.f32 %v1128_v38, %v4731_v0  ;;  %v3747_v38 = vld [vmem:[%s5467_s5 + $0x38] sm:$0xff] }
 0x260   : > { %2927 = vmatpush.bf16.msra.mxu2 %v3747_v38  ;;  %v4850_v0 = vpop.f32.mrf.mxu1 }
 0x261   : > { %5518 = vst [vmem:[#allocation49_spill] sm:$0xff] %v4850_v0  ;;  %v2327_v0 = vld [vmem:[#allocation2 + $0x121] sm:$0xff] }
 0x263   : > { %1292 = vmatmul.bf16.gmra.mxu3 %v4619_v55  ;;  %1800 = vmatmul.bf16.gmra.mxu1 %v4836_v31  ;;  %v4855_v51 = vpop.f32.mrf.mxu0 }
 0x264   : > { %5519 = vst [vmem:[#allocation50_spill] sm:$0xff] %v4855_v51 }
 0x266   : > { %v1131_v30 = vpop.f32.mrf.mxu3 }
 0x267   : > { %v4845_v33 = vadd.f32 %v1131_v30, %v4739_v56  ;;  %v3718_v56 = vld [vmem:[%s5465_s3 + $0x190] sm:$0xff] }
 0x268   : > { %2191 = vmatpush.bf16.msra.mxu3 %v3718_v56  ;;  %v4862_v36 = vpop.f32.mrf.mxu1 }
 0x269   : > { %5520 = vst [vmem:[#allocation51_spill] sm:$0xff] %v4862_v36  ;;  %v2328_v36 = vld [vmem:[#allocation2 + $0x129] sm:$0xff] }
 0x26b   : > { %2468 = vmatmul.bf16.gmra.mxu0 %v2347_v62  ;;  %v2325_v62 = vld [vmem:[#allocation2 + $0x109] sm:$0xff] }
 0x26e   : > { %v1133_v20 = vpop.f32.mrf.mxu3 }
 0x26f   : > { %v4853_v61 = vadd.f32 %v1133_v20, %v4750_v13  ;;  %v2348_v13 = vpack.c.bf16 %v2326_v11, %v2325_v62  ;;  %v4867_v20 = vpop.f32.mrf.mxu0  ;;  %v3746_v62 = vld [vmem:[%s5467_s5 + $0x30] sm:$0xff] }
 0x270   : > { %5521 = vst [vmem:[#allocation52_spill] sm:$0xff] %v4867_v20  ;;  %2928 = vmatpush.bf16.msra.mxu2 %v3746_v62 }
 0x273   : > { %1297 = vmatmul.bf16.gmra.mxu3 %v4644_v49  ;;  %2662 = vmatmul.bf16.vlgmr.msra.gmra.mxu1 %v4479_v40  ;;  %v4871_v40 = vpop.f32.mrf.mxu1 }
 0x274   : > { %5522 = vst [vmem:[#allocation53_spill] sm:$0xff] %v4871_v40 }
 0x276   : > { %v1258_v30 = vpop.f32.mrf.mxu3 }
 0x277   : > { %v4865_v38 = vadd.f32 %v1258_v30, %v4271_v4  ;;  %v4875_v56 = vpop.f32.mrf.mxu0  ;;  %v2349_v30 = vpack.c.bf16 %v2328_v36, %v2327_v0  ;;  %v2329_v36 = vld [vmem:[#allocation2 + $0x139] sm:$0xff] }
 0x278   : > { %5523 = vst [vmem:[#allocation54_spill] sm:$0xff] %v4875_v56 }
 0x27b   : > { %2473 = vmatmul.bf16.gmra.mxu0 %v2348_v13  ;;  %v4883_v11 = vpop.f32.mrf.mxu1 }
 0x27c   : > { %5524 = vst [vmem:[#allocation55_spill] sm:$0xff] %v4883_v11 }
 0x27e   : > { %v4869_v51 = vpop.f32.mrf.mxu3 }
 0x27f   : > { %v4885_v20 = vpop.f32.mrf.mxu0 }
 0x280   : > { %5525 = vst [vmem:[#allocation56_spill] sm:$0xff] %v4885_v20 }
 0x283   : > { %1302 = vmatmul.bf16.gmra.mxu3 %v4664_v47  ;;  %2667 = vmatmul.bf16.gmra.mxu1 %v4497_v34 }
 0x286   : > { %v1263_v42 = vpop.f32.mrf.mxu3 }
 0x287   : > { %v4878_v4 = vadd.f32 %v1263_v42, %v4353_v6  ;;  %v3717_v6 = vld [vmem:[%s5465_s3 + $0x188] sm:$0xff]  ;;  %v4895_v42 = vpop.f32.mrf.mxu1  ;;  %v4900_v20 = vpop.f32.mrf.mxu0 }
 0x288   : > { %5526 = vst [vmem:[#allocation57_spill] sm:$0xff] %v4895_v42  ;;  %2192 = vmatpush.bf16.msra.mxu3 %v3717_v6  ;;  %v2331_v42 = vld [vmem:[#allocation2 + $0x151] sm:$0xff] }
 0x28b   : > { %2478 = vmatmul.bf16.gmra.mxu0 %v2349_v30  ;;  %v2330_v30 = vld [vmem:[#allocation2 + $0x141] sm:$0xff] }
 0x28e   : > { %v1265_v13 = vpop.f32.mrf.mxu3 }
 0x28f   : > { %v4888_v34 = vadd.f32 %v1265_v13, %v4371_v24  ;;  %v2350_v24 = vpack.c.bf16 %v2330_v30, %v2329_v36  ;;  %v4902_v56 = vpop.f32.mrf.mxu1  ;;  %v4907_v11 = vpop.f32.mrf.mxu0 }
 0x290   : > { %5527 = vst [vmem:[#allocation58_spill] sm:$0xff] %v4902_v56 }
 0x293   : > { %1307 = vmatmul.bf16.gmra.mxu3 %v4681_v39  ;;  %2672 = vmatmul.bf16.gmra.mxu1 %v4518_v14 }
 0x296   : > { %v1268_v0 = vpop.f32.mrf.mxu3 }
 0x297   : > { %v4898_v62 = vadd.f32 %v1268_v0, %v4402_v60  ;;  %v2332_v60 = vld [vmem:[#allocation2 + $0x159] sm:$0xff]  ;;  %v4914_v36 = vpop.f32.mrf.mxu1 }
 0x298   : > { %5528 = vst [vmem:[#allocation59_spill] sm:$0xff] %v4914_v36  ;;  %v2351_v30 = vpack.c.bf16 %v2332_v60, %v2331_v42  ;;  %v2334_v60 = vld [vmem:[#allocation2 + $0x171] sm:$0xff] }
 0x29b   : > { %2483 = vmatmul.bf16.gmra.mxu0 %v2350_v24  ;;  %v4919_v24 = vpop.f32.mrf.mxu0 }
 0x29e   : > { %v1270_v13 = vpop.f32.mrf.mxu3 }
 0x29f   : > { %v4905_v14 = vadd.f32 %v1270_v13, %v4414_v12  ;;  %v3745_v12 = vld [vmem:[%s5467_s5 + $0x28] sm:$0xff]  ;;  %v4924_v56 = vpop.f32.mrf.mxu1 }
 0x2a0   : > { %2929 = vmatpush.bf16.msra.mxu2 %v3745_v12  ;;  %5529 = vst [vmem:[#allocation60_spill] sm:$0xff] %v4924_v56 }
 0x2a3   : > { %1312 = vmatmul.bf16.gmra.mxu3 %v4701_v19  ;;  %2677 = vmatmul.bf16.gmra.mxu1 %v4541_v21 }
 0x2a6   : > { %v1273_v6 = vpop.f32.mrf.mxu3 }
 0x2a7   : > { %v4912_v0 = vadd.f32 %v1273_v6, %v4437_v43  ;;  %v3716_v43 = vld [vmem:[%s5465_s3 + $0x180] sm:$0xff]  ;;  %v2333_v6 = vld [vmem:[#allocation2 + $0x169] sm:$0xff] }
 0x2a8   : > { %2193 = vmatpush.bf16.msra.mxu3 %v3716_v43 }
 0x2ab   : > { %2488 = vmatmul.bf16.gmra.mxu0 %v2351_v30  ;;  %v4931_v30 = vpop.f32.mrf.mxu0 }
 0x2ae   : > { %v1275_v13 = vpop.f32.mrf.mxu3 }
 0x2af   : > { %v4922_v21 = vadd.f32 %v1275_v13, %v4456_v1  ;;  %v2352_v1 = vpack.c.bf16 %v2334_v60, %v2333_v6  ;;  %v4936_v13 = vpop.f32.mrf.mxu1 }
 0x2b0   : > { %5530 = vst [vmem:[#allocation61_spill] sm:$0xff] %v4936_v13 }
 0x2b3   : > { %1317 = vmatmul.bf16.gmra.mxu3 %v4723_v10  ;;  %2682 = vmatmul.bf16.gmra.mxu1 %v4583_v58  ;;  %v4941_v36 = vpop.f32.mrf.mxu0 }
 0x2b6   : > { %v1278_v42 = vpop.f32.mrf.mxu3 }
 0x2b7   : > { %v4934_v12 = vadd.f32 %v1278_v42, %v4472_v26  ;;  %v4945_v40 = vpop.f32.mrf.mxu1  ;;  %v3744_v42 = vld [vmem:[%s5467_s5 + $0x20] sm:$0xff] }
 0x2b8   : > { %5531 = vst [vmem:[#allocation62_spill] sm:$0xff] %v4945_v40  ;;  %2930 = vmatpush.bf16.msra.mxu2 %v3744_v42 }
 0x2bb   : > { %2493 = vmatmul.bf16.gmra.mxu0 %v2352_v1  ;;  %v4953_v6 = vpop.f32.mrf.mxu0 }
 0x2be   : > { %v1280_v56 = vpop.f32.mrf.mxu3 }
 0x2bf   : > { %v4939_v58 = vadd.f32 %v1280_v56, %v4481_v29 }
 0x2c3   : > { %1322 = vmatmul.bf16.gmra.mxu3 %v4745_v50  ;;  %2687 = vmatmul.bf16.gmra.mxu1 %v4619_v55  ;;  %v4959_v55 = vpop.f32.mrf.mxu1 }
 0x2c4   : > { %5532 = vst [vmem:[#allocation63_spill] sm:$0xff] %v4959_v55 }
 0x2c6   : > { %v1283_v43 = vpop.f32.mrf.mxu3 }
 0x2c7   : > { %v4948_v26 = vadd.f32 %v1283_v43, %v4491_v37 }
 0x2cb   : > { %2498 = vmatmul.bf16.gmra.mxu0 %v4836_v31  ;;  %v4966_v1 = vpop.f32.mrf.mxu1 }
 0x2cc   : > { %5533 = vst [vmem:[#allocation64_spill] sm:$0xff] %v4966_v1 }
 0x2ce   : > { %v1285_v29 = vpop.f32.mrf.mxu3 }
 0x2cf   : > { %v4957_v56 = vadd.f32 %v1285_v29, %v4499_v3 }
 0x2d3   : > { %1327 = vmatmul.bf16.gmra.mxu3 %v4766_v59  ;;  %2692 = vmatmul.bf16.gmra.mxu1 %v4644_v49  ;;  %v4973_v3 = vpop.f32.mrf.mxu1 }
 0x2d4   : > { %5534 = vst [vmem:[#allocation65_spill] sm:$0xff] %v4973_v3 }
 0x2d6   : > { %v1288_v37 = vpop.f32.mrf.mxu3 }
 0x2d7   : > { %v4964_v60 = vadd.f32 %v1288_v37, %v4509_v41  ;;  %v3743_v41 = vld [vmem:[%s5467_s5 + $0x18] sm:$0xff] }
 0x2d8   : > { %2931 = vmatpush.bf16.msra.mxu2 %v3743_v41  ;;  %v2074_v37 = vld [vmem:[#allocation2 + $0x38] sm:$0xff]  ;;  %v2076_v41 = vld [vmem:[#allocation2 + $0x50] sm:$0xff] }
 0x2db   : > { %v4981_v1 = vpop.f32.mrf.mxu1 }
 0x2dc   : > { %5535 = vst [vmem:[#allocation66_spill] sm:$0xff] %v4981_v1  ;;  %v2075_v1 = vld [vmem:[#allocation2 + $0x48] sm:$0xff] }
 0x2dd   : > { %v2106_v13 = vpack.c.bf16 %v2076_v41, %v2075_v1  ;;  %v2080_v41 = vld [vmem:[#allocation2 + $0x80] sm:$0xff] }
 0x2de   : > { %v1290_v43 = vpop.f32.mrf.mxu3 }
 0x2df   : > { %v4969_v31 = vadd.f32 %v1290_v43, %v4523_v48  ;;  %v2073_v43 = vld [vmem:[#allocation2 + $0x30] sm:$0xff] }
 0x2e3   : > { %1332 = vmatmul.bf16.gmra.mxu3 %v4796_v32  ;;  %2697 = vmatmul.bf16.gmra.mxu1 %v4664_v47  ;;  %v2105_v47 = vpack.c.bf16 %v2074_v37, %v2073_v43  ;;  %v2077_v37 = vld [vmem:[#allocation2 + $0x60] sm:$0xff] }
 0x2e6   : > { %v1293_v42 = vpop.f32.mrf.mxu3 }
 0x2e7   : > { %v4976_v29 = vadd.f32 %v1293_v42, %v4534_v52  ;;  %v4990_v42 = vpop.f32.mrf.mxu1 }
 0x2e8   : > { %5536 = vst [vmem:[#allocation67_spill] sm:$0xff] %v4990_v42 }
 0x2ee   : > { %v1295_v49 = vpop.f32.mrf.mxu3 }
 0x2ef   : > { %v4984_v48 = vadd.f32 %v1295_v49, %v4549_v28  ;;  %v4995_v28 = vpop.f32.mrf.mxu1 }
 0x2f0   : > { %5537 = vst [vmem:[#allocation68_spill] sm:$0xff] %v4995_v28  ;;  %v2084_v28 = vld [vmem:[#allocation2 + $0xb0] sm:$0xff] }
 0x2f3   : > { %2194 = vmatmul.bf16.vlgmr.msra.gmra.mxu3 %v2105_v47  ;;  %2702 = vmatmul.bf16.gmra.mxu1 %v4681_v39 }
 0x2f6   : > { %v1298_v3 = vpop.f32.mrf.mxu3 }
 0x2f7   : > { %v4988_v52 = vadd.f32 %v1298_v3, %v4567_v8  ;;  %v3742_v8 = vld [vmem:[%s5467_s5 + $0x10] sm:$0xff]  ;;  %v5004_v3 = vpop.f32.mrf.mxu1 }
 0x2f8   : > { %2932 = vmatpush.bf16.msra.mxu2 %v3742_v8  ;;  %5538 = vst [vmem:[#allocation69_spill] sm:$0xff] %v5004_v3  ;;  %v5018_v8 = vpop.f32.mrf.mxu2 }
 0x2fe   : > { %v1300_v55 = vpop.f32.mrf.mxu3 }
 0x2ff   : > { %v4993_v40 = vadd.f32 %v1300_v55, %v4591_v7  ;;  %v2078_v55 = vld [vmem:[#allocation2 + $0x68] sm:$0xff] }
 0x303   : > { %2199 = vmatmul.bf16.gmra.mxu3 %v2106_v13  ;;  %2707 = vmatmul.bf16.gmra.mxu1 %v4701_v19  ;;  %v2107_v13 = vpack.c.bf16 %v2078_v55, %v2077_v37 }
 0x306   : > { %v1303_v49 = vpop.f32.mrf.mxu3 }
 0x307   : > { %v4999_v39 = vadd.f32 %v1303_v49, %v4606_v53  ;;  %v5010_v53 = vpop.f32.mrf.mxu1 }
 0x308   : > { %5539 = vst [vmem:[#allocation70_spill] sm:$0xff] %v5010_v53 }
 0x30e   : > { %v1305_v7 = vpop.f32.mrf.mxu3 }
 0x30f   : > { %v5007_v1 = vadd.f32 %v1305_v7, %v4627_v25  ;;  %v2079_v25 = vld [vmem:[#allocation2 + $0x78] sm:$0xff]  ;;  %v5020_v7 = vpop.f32.mrf.mxu1 }
 0x310   : > { %v2108_v55 = vpack.c.bf16 %v2080_v41, %v2079_v25  ;;  %v2081_v25 = vld [vmem:[#allocation2 + $0x90] sm:$0xff] }
 0x313   : > { %2204 = vmatmul.bf16.gmra.mxu3 %v2107_v13  ;;  %2712 = vmatmul.bf16.gmra.mxu1 %v4723_v10  ;;  %v5029_v13 = vpop.f32.mrf.mxu2 }
 0x316   : > { %v1308_v19 = vpop.f32.mrf.mxu3 }
 0x317   : > { %v5013_v43 = vadd.f32 %v1308_v19, %v4636_v23  ;;  %v3741_v23 = vld [vmem:[%s5467_s5 + $0x8] sm:$0xff] }
 0x318   : > { %2933 = vmatpush.bf16.msra.mxu2 %v3741_v23 }
 0x31e   : > { %v1310_v47 = vpop.f32.mrf.mxu3 }
 0x31f   : > { %v5016_v49 = vadd.f32 %v1310_v47, %v4646_v54  ;;  %v5031_v54 = vpop.f32.mrf.mxu1  ;;  %v2082_v47 = vld [vmem:[#allocation2 + $0x98] sm:$0xff] }
 0x323   : > { %2209 = vmatmul.bf16.gmra.mxu3 %v2108_v55  ;;  %2717 = vmatmul.bf16.gmra.mxu1 %v4745_v50  ;;  %v2109_v50 = vpack.c.bf16 %v2082_v47, %v2081_v25 }
 0x326   : > { %v1313_v10 = vpop.f32.mrf.mxu3 }
 0x327   : > { %v5024_v37 = vadd.f32 %v1313_v10, %v4657_v17  ;;  %v5037_v17 = vpop.f32.mrf.mxu2  ;;  %v5039_v55 = vpop.f32.mrf.mxu1 }
 0x329   : > { %5540 = vst [vmem:[#allocation71_spill] sm:$0xff] %v5024_v37 }
 0x32e   : > { %v1315_v19 = vpop.f32.mrf.mxu3 }
 0x32f   : > { %v5034_v41 = vadd.f32 %v1315_v19, %v4666_v57  ;;  %v5044_v3 = vpop.f32.mrf.mxu2  ;;  %v5046_v42 = vpop.f32.mrf.mxu1  ;;  %v2083_v19 = vld [vmem:[#allocation2 + $0xa8] sm:$0xff] }
 0x330   : > { %v2110_v47 = vpack.c.bf16 %v2084_v28, %v2083_v19  ;;  %v2085_v19 = vld [vmem:[#allocation2 + $0xc0] sm:$0xff] }
 0x331   : > { %5541 = vst [vmem:[#allocation72_spill] sm:$0xff] %v5034_v41  ;;  %v5096_v41 = vpop.f32.mrf.mxu0 }
 0x333   : > { %2214 = vmatmul.bf16.gmra.mxu3 %v2109_v50  ;;  %2722 = vmatmul.bf16.gmra.mxu1 %v4766_v59 }
 0x336   : > { %v1318_v10 = vpop.f32.mrf.mxu3 }
 0x337   : > { %v5042_v53 = vadd.f32 %v1318_v10, %v4764_v22  ;;  %v5055_v22 = vpop.f32.mrf.mxu2  ;;  %v5057_v50 = vpop.f32.mrf.mxu1  ;;  %v3740_v10 = vld [vmem:[%s5467_s5] sm:$0xff] }
 0x338   : > { %2934 = vmatpush.bf16.msra.mxu2 %v3740_v10 }
 0x339   : > { %5542 = vst [vmem:[#allocation73_spill] sm:$0xff] %v5042_v53  ;;  %v2088_v53 = vld [vmem:[#allocation2 + $0xe0] sm:$0xff] }
 0x33e   : > { %v1320_v23 = vpop.f32.mrf.mxu3 }
 0x33f   : > { %v5049_v57 = vadd.f32 %v1320_v23, %v4779_v15  ;;  %v2086_v23 = vld [vmem:[#allocation2 + $0xc8] sm:$0xff] }
 0x341   : > { %5543 = vst [vmem:[#allocation74_spill] sm:$0xff] %v5049_v57 }
 0x343   : > { %2219 = vmatmul.bf16.gmra.mxu3 %v2110_v47  ;;  %2727 = vmatmul.bf16.gmra.mxu1 %v4796_v32  ;;  %v2111_v32 = vpack.c.bf16 %v2086_v23, %v2085_v19  ;;  %v5065_v47 = vpop.f32.mrf.mxu2 }
 0x346   : > { %v1323_v59 = vpop.f32.mrf.mxu3 }
 0x347   : > { %v5053_v25 = vadd.f32 %v1323_v59, %v4791_v44  ;;  %v5067_v44 = vpop.f32.mrf.mxu1 }
 0x349   : > { %5544 = vst [vmem:[#allocation75_spill] sm:$0xff] %v5053_v25 }
 0x34b   : > { %v5073_v57 = vpop.f32.mrf.mxu2 }
 0x34e   : > { %v1325_v15 = vpop.f32.mrf.mxu3 }
 0x34f   : > { %v5063_v28 = vadd.f32 %v1325_v15, %v4807_v2  ;;  %v2087_v15 = vld [vmem:[#allocation2 + $0xd8] sm:$0xff] }
 0x350   : > { %v2112_v23 = vpack.c.bf16 %v2088_v53, %v2087_v15  ;;  %v2089_v53 = vld [vmem:[#allocation2 + $0xf0] sm:$0xff] }
 0x351   : > { %5545 = vst [vmem:[#allocation76_spill] sm:$0xff] %v5063_v28 }
 0x353   : > { %2224 = vmatmul.bf16.gmra.mxu3 %v2111_v32  ;;  %2732 = vmatmul.bf16.gmra.mxu1 %v4824_v35  ;;  %v5078_v19 = vpop.f32.mrf.mxu2 }
 0x356   : > { %v1328_v59 = vpop.f32.mrf.mxu3 }
 0x357   : > { %v5071_v25 = vadd.f32 %v1328_v59, %v4822_v45  ;;  %v1572_v45 = vadd.f32 %v4450_v63, %v4865_v38  ;;  %v2090_v59 = vld [vmem:[#allocation2 + $0xf8] sm:$0xff]  ;;  %v5551_v63 = vld [vmem:[#allocation25_spill] sm:$0xff] }
 0x359   : > { %5546 = vst [vmem:[#allocation77_spill] sm:$0xff] %v5071_v25  ;;  %v1059_v25 = vadd.f32 %v4316_v46, %v4318_v27  ;;  %v5098_v27 = vpop.f32.mrf.mxu1 }
 0x35b   : > { %v1339_v15 = vadd.f32 %v4869_v51, %v1059_v25  ;;  %v5553_v25 = vld [vmem:[#allocation4_spill] sm:$0xff] }
 0x35e   : > { %v1330_v10 = vpop.f32.mrf.mxu3 }
 0x35f   : > { %v5076_v2 = vadd.f32 %v1330_v10, %v4834_v18  ;;  %v5090_v10 = vpop.f32.mrf.mxu2 }
 0x361   : > { %5547 = vst [vmem:[#allocation78_spill] sm:$0xff] %v5076_v2 }
 0x363   : > { %2229 = vmatmul.bf16.gmra.mxu3 %v2112_v23  ;;  %v2113_v23 = vpack.c.bf16 %v2090_v59, %v2089_v53 }
 0x366   : > { %v1333_v28 = vpop.f32.mrf.mxu3 }
 0x367   : > { %v5081_v32 = vadd.f32 %v1333_v28, %v4845_v33  ;;  %v1806_v33 = vadd.f32 %v4671_v9, %v1572_v45  ;;  %v5550_v28 = vld [vmem:[#allocation3_spill] sm:$0xff]  ;;  %v1574_v9 = vadd.f32 %v5553_v25, %v4878_v4  ;;  %v5554_v45 = vld [vmem:[#allocation28_spill] sm:$0xff] }
 0x369   : > { %5548 = vst [vmem:[#allocation79_spill] sm:$0xff] %v5081_v32  ;;  %v1573_v32 = vadd.f32 %v5550_v28, %v1339_v15  ;;  %v2040_v38 = vadd.f32 %v5551_v63, %v1806_v33  ;;  %v2092_v15 = vld [vmem:[#allocation2 + $0x110] sm:$0xff]  ;;  %v5113_v28 = vpop.f32.mrf.mxu0 }
 0x36e   : > { %v1335_v35 = vpop.f32.mrf.mxu3 }
 0x36f   : > { %v5088_v18 = vadd.f32 %v1335_v35, %v4853_v61  ;;  %v5552_v61 = vld [vmem:[#allocation18_spill] sm:$0xff] }
 0x370   : > { %v1807_v35 = vadd.f32 %v5552_v61, %v1573_v32  ;;  %v2091_v32 = vld [vmem:[#allocation2 + $0x108] sm:$0xff] }
 0x371   : > { %5549 = vst [vmem:[#allocation80_spill] sm:$0xff] %v5088_v18  ;;  %v5101_v18 = vpop.f32.mrf.mxu2  ;;  %v2114_v63 = vpack.c.bf16 %v2092_v15, %v2091_v32 }
 0x372   : > { %v2041_v59 = vadd.f32 %v5554_v45, %v1807_v35 }
 0x373   : > { %2234 = vmatmul.bf16.gmra.mxu3 %v2113_v23 }
 0x376   : > { %v2195_v2 = vpop.f32.mrf.mxu3 }
 0x377   : > { %v2275_v46 = vadd.f32 %v2195_v2, %v2040_v38  ;;  %v5111_v2 = vld [vmem:[%s5466_s4] ss:$0 sm:$0xff]  ;;  %v5555_v38 = vld [vmem:[#allocation20_spill] sm:$0xff] }
 0x378   : > { %v1808_v4 = vadd.f32 %v5555_v38, %v1574_v9  ;;  %v5558_v38 = vld [vmem:[#allocation22_spill] sm:$0xff] }
 0x379   : > { %v2509_v51 = vadd.f32 %v4900_v20, %v2275_v46  ;;  %v5117_v46 = vpop.f32.mrf.mxu1  ;;  %v5121_v35 = vpop.f32.mrf.mxu2 }
 0x37b   : > { %v2743_v23 = vadd.f32 %v5020_v7, %v2509_v51  ;;  %v5556_v51 = vld [vmem:[#allocation5_spill] sm:$0xff] }
 0x37c   : > { %v1575_v25 = vadd.f32 %v5556_v51, %v4888_v34 }
 0x37d   : > { %v2779_v61 = vadd.f32 %v5111_v2, %v2743_v23  ;;  %v5128_v23 = vpop.f32.mrf.mxu0 }
 0x37e   : > { %v2197_v53 = vpop.f32.mrf.mxu3  ;;  %v1809_v37 = vadd.f32 %v5558_v38, %v1575_v25  ;;  %v2093_v25 = vld [vmem:[#allocation2 + $0x120] sm:$0xff] }
 0x37f   : > { %v2276_v33 = vadd.f32 %v2197_v53, %v2041_v59  ;;  %v5557_v59 = vld [vmem:[#allocation31_spill] sm:$0xff]  ;;  %v2811_v15 = vmax.f32 %v2779_v61, 0.0 }
 0x380   : > { %v2042_v53 = vadd.f32 %v5557_v59, %v1808_v4 }
 0x381   : > { %v2510_v20 = vadd.f32 %v4907_v11, %v2276_v33  ;;  %v5133_v34 = vpop.f32.mrf.mxu1  ;;  %v5136_v4 = vpop.f32.mrf.mxu2 }
 0x383   : > { %v2744_v7 = vadd.f32 %v5031_v54, %v2510_v20  ;;  %2239 = vmatmul.bf16.gmra.mxu3 %v2114_v63  ;;  %v5559_v20 = vld [vmem:[#allocation6_spill] sm:$0xff] }
 0x384   : > { %v1576_v63 = vadd.f32 %v5559_v20, %v4898_v62  ;;  %v5563_v20 = vld [vmem:[#allocation38_spill] sm:$0xff] }
 0x385   : > { %v2780_v45 = vadd.f32 %v5111_v2, %v2744_v7  ;;  %v5560_v7 = vld [vmem:[#allocation35_spill] sm:$0xff]  ;;  %v5145_v38 = vpop.f32.mrf.mxu0 }
 0x386   : > { %v2200_v11 = vpop.f32.mrf.mxu3  ;;  %v2043_v51 = vadd.f32 %v5560_v7, %v1809_v37  ;;  %v5562_v37 = vld [vmem:[#allocation7_spill] sm:$0xff] }
 0x387   : > { %v2812_v33 = vmax.f32 %v2780_v45, 0.0  ;;  %v2277_v9 = vadd.f32 %v2200_v11, %v2042_v53  ;;  %v2094_v45 = vld [vmem:[#allocation2 + $0x128] sm:$0xff] }
 0x389   : > { %v2843_v32 = vpack.c.bf16 %v2812_v33, %v2811_v15  ;;  %v2511_v54 = vadd.f32 %v4919_v24, %v2277_v9  ;;  %v2115_v15 = vpack.c.bf16 %v2094_v45, %v2093_v25  ;;  %v5561_v24 = vld [vmem:[#allocation24_spill] sm:$0xff]  ;;  %v5151_v45 = vpop.f32.mrf.mxu2 }
 0x38a   : > { %v1810_v33 = vadd.f32 %v5561_v24, %v1576_v63 }
 0x38b   : > { %2935 = vmatmul.bf16.vlgmr.msra.gmra.mxu2 %v2843_v32  ;;  %v2745_v59 = vadd.f32 %v5039_v55, %v2511_v54  ;;  %v1577_v32 = vadd.f32 %v5562_v37, %v4905_v14  ;;  %v5565_v14 = vld [vmem:[#allocation8_spill] sm:$0xff]  ;;  %v2096_v37 = vld [vmem:[#allocation2 + $0x140] sm:$0xff] }
 0x38c   : > { %v2044_v7 = vadd.f32 %v5563_v20, %v1810_v33 }
 0x38d   : > { %v2781_v62 = vadd.f32 %v5111_v2, %v2745_v59  ;;  %v5158_v20 = vpop.f32.mrf.mxu0 }
 0x38e   : > { %v2202_v61 = vpop.f32.mrf.mxu3 }
 0x38f   : > { %v2278_v53 = vadd.f32 %v2202_v61, %v2043_v51  ;;  %v5149_v51 = vpop.f32.mrf.mxu1  ;;  %v2813_v61 = vmax.f32 %v2781_v62, 0.0 }
 0x391   : > { %v2512_v11 = vadd.f32 %v4931_v30, %v2278_v53  ;;  %v5564_v53 = vld [vmem:[#allocation27_spill] sm:$0xff] }
 0x392   : > { %v1811_v59 = vadd.f32 %v5564_v53, %v1577_v32 }
 0x393   : > { %v2746_v9 = vadd.f32 %v5046_v42, %v2512_v11  ;;  %2244 = vmatmul.bf16.gmra.mxu3 %v2115_v15  ;;  %v1578_v11 = vadd.f32 %v5565_v14, %v4912_v0  ;;  %v5566_v15 = vld [vmem:[#allocation41_spill] sm:$0xff] }
 0x394   : > { %v2045_v24 = vadd.f32 %v5566_v15, %v1811_v59  ;;  %v5569_v59 = vld [vmem:[#allocation44_spill] sm:$0xff] }
 0x395   : > { %v2782_v55 = vadd.f32 %v5111_v2, %v2746_v9  ;;  %v2095_v9 = vld [vmem:[#allocation2 + $0x138] sm:$0xff] }
 0x396   : > { %v2205_v54 = vpop.f32.mrf.mxu3 }
 0x397   : > { %v2279_v30 = vadd.f32 %v2205_v54, %v2044_v7  ;;  %v2814_v63 = vmax.f32 %v2782_v55, 0.0  ;;  %v5161_v55 = vpop.f32.mrf.mxu1  ;;  %v2116_v54 = vpack.c.bf16 %v2096_v37, %v2095_v9  ;;  %v5570_v9 = vld [vmem:[#allocation32_spill] sm:$0xff] }
 0x399   : > { %v2844_v42 = vpack.c.bf16 %v2814_v63, %v2813_v61  ;;  %v2513_v25 = vadd.f32 %v4941_v36, %v2279_v30  ;;  %v5567_v36 = vld [vmem:[#allocation29_spill] sm:$0xff]  ;;  %v5165_v61 = vpop.f32.mrf.mxu2 }
 0x39a   : > { %v1812_v30 = vadd.f32 %v5567_v36, %v1578_v11 }
 0x39b   : > { %2940 = vmatmul.bf16.gmra.mxu2 %v2844_v42  ;;  %v2747_v62 = vadd.f32 %v5057_v50, %v2513_v25  ;;  %v5568_v42 = vld [vmem:[#allocation9_spill] sm:$0xff] }
 0x39c   : > { %v1579_v53 = vadd.f32 %v5568_v42, %v4922_v21  ;;  %v2046_v50 = vadd.f32 %v5569_v59, %v1812_v30  ;;  %v5571_v21 = vld [vmem:[#allocation10_spill] sm:$0xff]  ;;  %v2097_v30 = vld [vmem:[#allocation2 + $0x150] sm:$0xff] }
 0x39d   : > { %v2783_v63 = vadd.f32 %v5111_v2, %v2747_v62 }
 0x39e   : > { %v2207_v33 = vpop.f32.mrf.mxu3  ;;  %v1813_v37 = vadd.f32 %v5570_v9, %v1579_v53 }
 0x39f   : > { %v2280_v7 = vadd.f32 %v2207_v33, %v2045_v24  ;;  %v5173_v33 = vpop.f32.mrf.mxu0 }
 0x3a1   : > { %v2514_v32 = vadd.f32 %v4953_v6, %v2280_v7  ;;  %v2815_v6 = vmax.f32 %v2783_v63, 0.0  ;;  %v5179_v7 = vpop.f32.mrf.mxu2 }
 0x3a3   : > { %v2748_v0 = vadd.f32 %v5067_v44, %v2514_v32  ;;  %2249 = vmatmul.bf16.gmra.mxu3 %v2116_v54  ;;  %v5176_v44 = vpop.f32.mrf.mxu1  ;;  %v1580_v32 = vadd.f32 %v5571_v21, %v4934_v12  ;;  %v2047_v54 = vadd.f32 %v4828_v16, %v1813_v37  ;;  %v5573_v16 = vld [vmem:[#allocation11_spill] sm:$0xff] }
 0x3a5   : > { %v2784_v25 = vadd.f32 %v5111_v2, %v2748_v0  ;;  %v2098_v0 = vld [vmem:[#allocation2 + $0x158] sm:$0xff] }
 0x3a6   : > { %v2210_v14 = vpop.f32.mrf.mxu3  ;;  %v2117_v59 = vpack.c.bf16 %v2098_v0, %v2097_v30 }
 0x3a7   : > { %v2281_v15 = vadd.f32 %v2210_v14, %v2046_v50  ;;  %v2816_v24 = vmax.f32 %v2784_v25, 0.0  ;;  %v5572_v50 = vld [vmem:[#allocation34_spill] sm:$0xff] }
 0x3a8   : > { %v1814_v25 = vadd.f32 %v5572_v50, %v1580_v32 }
 0x3a9   : > { %v2845_v11 = vpack.c.bf16 %v2816_v24, %v2815_v6  ;;  %v2515_v62 = vadd.f32 %v5096_v41, %v2281_v15  ;;  %v5187_v41 = vpop.f32.mrf.mxu0  ;;  %v1581_v15 = vadd.f32 %v5573_v16, %v4939_v58  ;;  %v5575_v58 = vld [vmem:[#allocation12_spill] sm:$0xff] }
 0x3ab   : > { %2945 = vmatmul.bf16.gmra.mxu2 %v2845_v11  ;;  %v2749_v63 = vadd.f32 %v5098_v27, %v2515_v62  ;;  %v5193_v6 = vpop.f32.mrf.mxu1  ;;  %v2048_v27 = vadd.f32 %v5018_v8, %v1814_v25 }
 0x3ad   : > { %v2785_v12 = vadd.f32 %v5111_v2, %v2749_v63  ;;  %v2099_v63 = vld [vmem:[#allocation2 + $0x168] sm:$0xff] }
 0x3ae   : > { %v2212_v36 = vpop.f32.mrf.mxu3 }
 0x3af   : > { %v2282_v42 = vadd.f32 %v2212_v36, %v2047_v54  ;;  %v2817_v37 = vmax.f32 %v2785_v12, 0.0  ;;  %v1582_v36 = vadd.f32 %v5575_v58, %v4948_v26  ;;  %v5576_v12 = vld [vmem:[#allocation40_spill] sm:$0xff] }
 0x3b0   : > { %v2337_v26 = vld [vmem:[#allocation2 + $0x199] sm:$0xff] }
 0x3b1   : > { %v2516_v53 = vadd.f32 %v5113_v28, %v2282_v42  ;;  %v5197_v28 = vpop.f32.mrf.mxu2  ;;  %v5203_v30 = vpop.f32.mrf.mxu0  ;;  %v2100_v42 = vld [vmem:[#allocation2 + $0x170] sm:$0xff]  ;;  %v1816_v16 = vadd.f32 %v5576_v12, %v1582_v36  ;;  %v2102_v12 = vld [vmem:[#allocation2 + $0x188] sm:$0xff] }
 0x3b3   : > { %v2750_v14 = vadd.f32 %v5117_v46, %v2516_v53  ;;  %2254 = vmatmul.bf16.gmra.mxu3 %v2117_v59  ;;  %v5574_v46 = vld [vmem:[#allocation37_spill] sm:$0xff]  ;;  %v5206_v53 = vpop.f32.mrf.mxu1 }
 0x3b4   : > { %v1815_v32 = vadd.f32 %v5574_v46, %v1581_v15  ;;  %v2338_v15 = vld [vmem:[#allocation2 + $0x1a1] sm:$0xff] }
 0x3b5   : > { %v2786_v24 = vadd.f32 %v5111_v2, %v2750_v14  ;;  %v2118_v14 = vpack.c.bf16 %v2100_v42, %v2099_v63 }
 0x3b6   : > { %v2215_v11 = vpop.f32.mrf.mxu3  ;;  %v2049_v8 = vadd.f32 %v5029_v13, %v1815_v32 }
 0x3b7   : > { %v2283_v9 = vadd.f32 %v2215_v11, %v2048_v27  ;;  %v2818_v62 = vmax.f32 %v2786_v24, 0.0  ;;  %v2354_v24 = vpack.c.bf16 %v2338_v15, %v2337_v26  ;;  %v2571_v11 = vld [vmem:[#allocation2 + $0x19a] sm:$0xff] }
 0x3b9   : > { %v2846_v21 = vpack.c.bf16 %v2818_v62, %v2817_v37  ;;  %v2517_v54 = vadd.f32 %v5128_v23, %v2283_v9  ;;  %v5209_v25 = vpop.f32.mrf.mxu2  ;;  %v2572_v9 = vld [vmem:[#allocation2 + $0x1a2] sm:$0xff]  ;;  %2503 = vmatmul.bf16.gmra.mxu0 %v2354_v24  ;;  %v5219_v32 = vpop.f32.mrf.mxu0 }
 0x3ba   : > { %v2588_v37 = vpack.c.bf16 %v2572_v9, %v2571_v11 }
 0x3bb   : > { %2950 = vmatmul.bf16.gmra.mxu2 %v2846_v21  ;;  %v2751_v59 = vadd.f32 %v5133_v34, %v2517_v54  ;;  %v5577_v34 = vld [vmem:[#allocation13_spill] sm:$0xff]  ;;  %v2050_v21 = vadd.f32 %v5037_v17, %v1816_v16  ;;  %v5221_v36 = vpop.f32.mrf.mxu1  ;;  %v5579_v17 = vld [vmem:[#allocation14_spill] sm:$0xff] }
 0x3bc   : > { %v1583_v62 = vadd.f32 %v5577_v34, %v4957_v56  ;;  %2737 = vmatmul.bf16.gmra.mxu1 %v2588_v37 }
 0x3bd   : > { %v2787_v13 = vadd.f32 %v5111_v2, %v2751_v59  ;;  %v1584_v59 = vadd.f32 %v5579_v17, %v4964_v60 }
 0x3be   : > { %v2217_v0 = vpop.f32.mrf.mxu3 }
 0x3bf   : > { %v2284_v50 = vadd.f32 %v2217_v0, %v2049_v8  ;;  %v2819_v54 = vmax.f32 %v2787_v13, 0.0  ;;  %v5578_v0 = vld [vmem:[#allocation43_spill] sm:$0xff]  ;;  %v1818_v24 = vadd.f32 %v4826_v5, %v1584_v59  ;;  %v3784_v59 = vld [vmem:[#allocation2] sm:$0xff] }
 0x3c0   : > { %v1817_v63 = vadd.f32 %v5578_v0, %v1583_v62 }
 0x3c1   : > { %v2518_v23 = vadd.f32 %v5145_v38, %v2284_v50  ;;  %v5224_v42 = vpop.f32.mrf.mxu2  ;;  %v2466_v15 = vpop.f32.mrf.mxu0 }
 0x3c2   : > { %v2051_v50 = vadd.f32 %v5044_v3, %v1817_v63  ;;  %v5580_v3 = vld [vmem:[#allocation15_spill] sm:$0xff] }
 0x3c3   : > { %v2752_v27 = vadd.f32 %v5149_v51, %v2518_v23  ;;  %2259 = vmatmul.bf16.gmra.mxu3 %v2118_v14  ;;  %v2101_v14 = vld [vmem:[#allocation2 + $0x180] sm:$0xff]  ;;  %v2700_v11 = vpop.f32.mrf.mxu1  ;;  %v1585_v37 = vadd.f32 %v5580_v3, %v4969_v31 }
 0x3c4   : > { %v2119_v13 = vpack.c.bf16 %v2102_v12, %v2101_v14  ;;  %v5583_v14 = vld [vmem:[#allocation49_spill] sm:$0xff] }
 0x3c5   : > { %v2788_v38 = vadd.f32 %v5111_v2, %v2752_v27 }
 0x3c6   : > { %v2220_v46 = vpop.f32.mrf.mxu3 }
 0x3c7   : > { %v2285_v51 = vadd.f32 %v2220_v46, %v2050_v21  ;;  %v2820_v58 = vmax.f32 %v2788_v38, 0.0  ;;  %v5581_v46 = vld [vmem:[#allocation47_spill] sm:$0xff] }
 0x3c9   : > { %v2847_v8 = vpack.c.bf16 %v2820_v58, %v2819_v54  ;;  %v2519_v56 = vadd.f32 %v5158_v20, %v2285_v51  ;;  %v5235_v9 = vpop.f32.mrf.mxu2  ;;  %v1819_v51 = vadd.f32 %v5581_v46, %v1585_v37  ;;  %v5582_v58 = vld [vmem:[#allocation16_spill] sm:$0xff] }
 0x3cb   : > { %2955 = vmatmul.bf16.gmra.mxu2 %v2847_v8  ;;  %v2753_v16 = vadd.f32 %v5161_v55, %v2519_v56  ;;  %v2052_v55 = vadd.f32 %v5055_v22, %v1818_v24  ;;  %v1586_v8 = vadd.f32 %v5582_v58, %v4976_v29  ;;  %v2703_v0 = vpop.f32.mrf.mxu1  ;;  %v2053_v31 = vadd.f32 %v5065_v47, %v1819_v51 }
 0x3cd   : > { %v2789_v60 = vadd.f32 %v5111_v2, %v2753_v16  ;;  %v1820_v12 = vadd.f32 %v5583_v14, %v1586_v8  ;;  %v5584_v16 = vld [vmem:[#allocation17_spill] sm:$0xff]  ;;  %v5589_v14 = vld [vmem:[#allocation55_spill] sm:$0xff] }
 0x3ce   : > { %v2222_v23 = vpop.f32.mrf.mxu3  ;;  %v1587_v47 = vadd.f32 %v5584_v16, %v4984_v48  ;;  %v5586_v48 = vld [vmem:[#allocation19_spill] sm:$0xff] }
 0x3cf   : > { %v2286_v26 = vadd.f32 %v2222_v23, %v2051_v50  ;;  %v2821_v21 = vmax.f32 %v2789_v60, 0.0  ;;  %v2120_v50 = vpack.c.bf16 %v3784_v59, %v3784_v59  ;;  %v5590_v16 = vld [vmem:[#allocation23_spill] sm:$0xff] }
 0x3d1   : > { %v2520_v27 = vadd.f32 %v5173_v33, %v2286_v26  ;;  %v5246_v22 = vpop.f32.mrf.mxu2 }
 0x3d3   : > { %v2754_v20 = vadd.f32 %v5176_v44, %v2520_v27  ;;  %2264 = vmatmul.bf16.gmra.mxu3 %v2119_v13  ;;  %v2469_v44 = vpop.f32.mrf.mxu0  ;;  %v2054_v27 = vadd.f32 %v5073_v57, %v1820_v12  ;;  %v2705_v24 = vpop.f32.mrf.mxu1 }
 0x3d5   : > { %v2790_v34 = vadd.f32 %v5111_v2, %v2754_v20 }
 0x3d6   : > { %v2225_v62 = vpop.f32.mrf.mxu3 }
 0x3d7   : > { %v2287_v33 = vadd.f32 %v2225_v62, %v2052_v55  ;;  %v2822_v38 = vmax.f32 %v2790_v34, 0.0  ;;  %v1588_v62 = vadd.f32 %v5586_v48, %v4988_v52 }
 0x3d9   : > { %v2848_v5 = vpack.c.bf16 %v2822_v38, %v2821_v21  ;;  %v2521_v54 = vadd.f32 %v5187_v41, %v2287_v33  ;;  %v5257_v3 = vpop.f32.mrf.mxu2 }
 0x3db   : > { %2960 = vmatmul.bf16.gmra.mxu2 %v2848_v5  ;;  %v2755_v56 = vadd.f32 %v5193_v6, %v2521_v54  ;;  %v2471_v26 = vpop.f32.mrf.mxu0  ;;  %v2708_v46 = vpop.f32.mrf.mxu1  ;;  %v5587_v54 = vld [vmem:[#allocation53_spill] sm:$0xff] }
 0x3dc   : > { %v1822_v58 = vadd.f32 %v5587_v54, %v1588_v62 }
 0x3dd   : > { %v2791_v29 = vadd.f32 %v5111_v2, %v2755_v56 }
 0x3de   : > { %v2227_v63 = vpop.f32.mrf.mxu3  ;;  %v2056_v52 = vadd.f32 %v5090_v10, %v1822_v58 }
 0x3df   : > { %v2288_v17 = vadd.f32 %v2227_v63, %v2053_v31  ;;  %v2823_v60 = vmax.f32 %v2791_v29, 0.0  ;;  %v5588_v63 = vld [vmem:[#allocation21_spill] sm:$0xff] }
 0x3e0   : > { %v1589_v56 = vadd.f32 %v5588_v63, %v4993_v40  ;;  %v1590_v40 = vadd.f32 %v5590_v16, %v4999_v39 }
 0x3e1   : > { %v2522_v23 = vadd.f32 %v5203_v30, %v2288_v17  ;;  %v5266_v8 = vpop.f32.mrf.mxu2 }
 0x3e2   : > { %v1823_v12 = vadd.f32 %v5589_v14, %v1589_v56 }
 0x3e3   : > { %v2756_v41 = vadd.f32 %v5206_v53, %v2522_v23  ;;  %2269 = vmatmul.bf16.gmra.mxu3 %v2120_v50  ;;  %v5585_v53 = vld [vmem:[#allocation51_spill] sm:$0xff]  ;;  %v2474_v21 = vpop.f32.mrf.mxu0 }
 0x3e4   : > { %v1821_v55 = vadd.f32 %v5585_v53, %v1587_v47  ;;  %v2057_v10 = vadd.f32 %v5101_v18, %v1823_v12 }
 0x3e5   : > { %v2792_v6 = vadd.f32 %v5111_v2, %v2756_v41  ;;  %v2710_v41 = vpop.f32.mrf.mxu1 }
 0x3e6   : > { %v2230_v13 = vpop.f32.mrf.mxu3  ;;  %v2055_v57 = vadd.f32 %v5078_v19, %v1821_v55 }
 0x3e7   : > { %v2289_v20 = vadd.f32 %v2230_v13, %v2054_v27  ;;  %v2824_v30 = vmax.f32 %v2792_v6, 0.0 }
 0x3e9   : > { %v2849_v37 = vpack.c.bf16 %v2824_v30, %v2823_v60  ;;  %v2523_v34 = vadd.f32 %v5219_v32, %v2289_v20  ;;  %v5591_v20 = vld [vmem:[#allocation57_spill] sm:$0xff] }
 0x3ea   : > { %v1824_v60 = vadd.f32 %v5591_v20, %v1590_v40 }
 0x3eb   : > { %2965 = vmatmul.bf16.gmra.mxu2 %v2849_v37  ;;  %v2757_v38 = vadd.f32 %v5221_v36, %v2523_v34  ;;  %v2476_v23 = vpop.f32.mrf.mxu0 }
 0x3ec   : > { %v2058_v48 = vadd.f32 %v5121_v35, %v1824_v60 }
 0x3ed   : > { %v2793_v32 = vadd.f32 %v5111_v2, %v2757_v38  ;;  %v2713_v34 = vpop.f32.mrf.mxu1  ;;  %v5593_v38 = vld [vmem:[#allocation58_spill] sm:$0xff] }
 0x3ee   : > { %v2232_v33 = vpop.f32.mrf.mxu3 }
 0x3ef   : > { %v2290_v5 = vadd.f32 %v2232_v33, %v2055_v57  ;;  %v2825_v36 = vmax.f32 %v2793_v32, 0.0 }
 0x3f1   : > { %v2524_v51 = vadd.f32 %v2466_v15, %v2290_v5 }
 0x3f3   : > { %v2758_v31 = vadd.f32 %v2700_v11, %v2524_v51  ;;  %v5274_v11 = vpop.f32.mrf.mxu2  ;;  %v2479_v30 = vpop.f32.mrf.mxu0  ;;  %v5594_v51 = vld [vmem:[#allocation30_spill] sm:$0xff] }
 0x3f4   : > { %v1592_v54 = vadd.f32 %v5594_v51, %v5013_v43 }
 0x3f5   : > { %v2794_v19 = vadd.f32 %v5111_v2, %v2758_v31  ;;  %v2715_v63 = vpop.f32.mrf.mxu1 }
 0x3f6   : > { %v2235_v17 = vpop.f32.mrf.mxu3 }
 0x3f7   : > { %v2291_v59 = vadd.f32 %v2235_v17, %v2056_v52  ;;  %v2826_v50 = vmax.f32 %v2794_v19, 0.0  ;;  %v3785_v17 = vld [vmem:[%s4029_s20] sm:$0xff] }
 0x3f9   : > { %v2850_v15 = vpack.c.bf16 %v2826_v50, %v2825_v36  ;;  %v2525_v29 = vadd.f32 %v2469_v44, %v2291_v59  ;;  %v5592_v44 = vld [vmem:[#allocation26_spill] sm:$0xff]  ;;  %v5595_v36 = vld [vmem:[#allocation59_spill] sm:$0xff] }
 0x3fa   : > { %v1591_v55 = vadd.f32 %v5592_v44, %v5007_v1  ;;  %v5291_v1 = vld [vmem:[%s5468_s6] ss:$0 sm:$0xff]  ;;  %v1826_v50 = vadd.f32 %v5595_v36, %v1592_v54  ;;  %v5598_v44 = vld [vmem:[#allocation71_spill] sm:$0xff] }
 0x3fb   : > { %2970 = vmatmul.bf16.gmra.mxu2 %v2850_v15  ;;  %v2759_v27 = vadd.f32 %v2703_v0, %v2525_v29  ;;  %v5285_v62 = vpop.f32.mrf.mxu2  ;;  %v2481_v35 = vpop.f32.mrf.mxu0  ;;  %v5596_v15 = vld [vmem:[#allocation33_spill] sm:$0xff] }
 0x3fc   : > { %v1593_v14 = vadd.f32 %v5596_v15, %v5016_v49  ;;  %v5597_v49 = vld [vmem:[#allocation60_spill] sm:$0xff]  ;;  %v5603_v15 = vld [vmem:[#allocation62_spill] sm:$0xff] }
 0x3fd   : > { %v2795_v53 = vadd.f32 %v5111_v2, %v2759_v27 }
 0x3fe   : > { %v2237_v47 = vpop.f32.mrf.mxu3 }
 0x3ff   : > { %v2292_v6 = vadd.f32 %v2237_v47, %v2057_v10  ;;  %v2827_v57 = vmax.f32 %v2795_v53, 0.0 }
 0x401   : > { %v2526_v13 = vadd.f32 %v2471_v26, %v2292_v6  ;;  %v2718_v6 = vpop.f32.mrf.mxu1 }
 0x403   : > { %v2760_v37 = vadd.f32 %v2705_v24, %v2526_v13  ;;  %v1825_v24 = vadd.f32 %v5593_v38, %v1591_v55  ;;  %v2484_v40 = vpop.f32.mrf.mxu0  ;;  %v3786_v13 = vld [vmem:[%s4029_s20 + $0x8] sm:$0xff]  ;;  %v5599_v55 = vld [vmem:[#allocation36_spill] sm:$0xff] }
 0x405   : > { %v2796_v39 = vadd.f32 %v5111_v2, %v2760_v37  ;;  %v2059_v58 = vadd.f32 %v5136_v4, %v1825_v24  ;;  %v1827_v37 = vadd.f32 %v5597_v49, %v1593_v14 }
 0x406   : > { %v2240_v18 = vpop.f32.mrf.mxu3 }
 0x407   : > { %v2293_v0 = vadd.f32 %v2240_v18, %v2058_v48  ;;  %v2828_v26 = vmax.f32 %v2796_v39, 0.0  ;;  %v1594_v48 = vadd.f32 %v5599_v55, %v5598_v44  ;;  %v2061_v39 = vadd.f32 %v5165_v61, %v1827_v37  ;;  %v5601_v61 = vld [vmem:[#allocation72_spill] sm:$0xff] }
 0x409   : > { %v2851_v33 = vpack.c.bf16 %v2828_v26, %v2827_v57  ;;  %v2527_v5 = vadd.f32 %v2474_v21, %v2293_v0 }
 0x40b   : > { %2975 = vmatmul.bf16.gmra.mxu2 %v2851_v33  ;;  %v2761_v56 = vadd.f32 %v2708_v46, %v2527_v5  ;;  %v2486_v38 = vpop.f32.mrf.mxu0  ;;  %v3787_v5 = vld [vmem:[%s4029_s20 + $0x10] sm:$0xff] }
 0x40d   : > { %v2797_v46 = vadd.f32 %v5111_v2, %v2761_v56 }
 0x40e   : > { %v2242_v31 = vpop.f32.mrf.mxu3  ;;  %v2936_v32 = vpop.f32.mrf.mxu2 }
 0x40f   : > { %v2294_v52 = vadd.f32 %v2242_v31, %v2059_v58  ;;  %v2937_v21 = vadd.f32 %v5291_v1, %v2936_v32  ;;  %v2829_v27 = vmax.f32 %v2797_v46, 0.0  ;;  %v2720_v58 = vpop.f32.mrf.mxu1 }
 0x411   : > { %v2528_v19 = vadd.f32 %v2476_v23, %v2294_v52  ;;  %v3016_v59 = vadd.f32 %v3785_v17, %v2937_v21  ;;  %v2060_v23 = vadd.f32 %v5151_v45, %v1826_v50  ;;  %v5602_v52 = vld [vmem:[#allocation39_spill] sm:$0xff] }
 0x412   : > { %v1595_v21 = vadd.f32 %v5602_v52, %v5601_v61 }
 0x413   : > { %v2762_v43 = vadd.f32 %v2710_v41, %v2528_v19  ;;  %v3048_v4 = vmax.f32 %v3016_v59, 0.0 }
 0x414   : > { %v1829_v14 = vadd.f32 %v5603_v15, %v1595_v21  ;;  %v3791_v15 = vld [vmem:[%s4029_s20 + $0x30] sm:$0xff] }
 0x415   : > { %3080 = vst [vmem:[%s5304_s19] sm:$0xff] %v3048_v4  ;;  %v2798_v12 = vadd.f32 %v5111_v2, %v2762_v43 }
 0x416   : > { %v2245_v29 = vpop.f32.mrf.mxu3  ;;  %v2938_v16 = vpop.f32.mrf.mxu2 }
 0x417   : > { %v2295_v10 = vadd.f32 %v2245_v29, %v2060_v23  ;;  %v2939_v47 = vadd.f32 %v5291_v1, %v2938_v16  ;;  %v2830_v41 = vmax.f32 %v2798_v12, 0.0  ;;  %v2489_v23 = vpop.f32.mrf.mxu0  ;;  %v5605_v16 = vld [vmem:[#allocation42_spill] sm:$0xff] }
 0x419   : > { %v3017_v20 = vadd.f32 %v3786_v13, %v2939_v47  ;;  %v2852_v60 = vpack.c.bf16 %v2830_v41, %v2829_v27  ;;  %v2529_v53 = vadd.f32 %v2479_v30, %v2295_v10  ;;  %v5600_v30 = vld [vmem:[#allocation61_spill] sm:$0xff]  ;;  %v2723_v47 = vpop.f32.mrf.mxu1  ;;  %v2063_v27 = vadd.f32 %v5197_v28, %v1829_v14 }
 0x41a   : > { %v1828_v54 = vadd.f32 %v5600_v30, %v1594_v48 }
 0x41b   : > { %v3049_v45 = vmax.f32 %v3017_v20, 0.0  ;;  %2980 = vmatmul.bf16.gmra.mxu2 %v2852_v60  ;;  %v2763_v57 = vadd.f32 %v2713_v34, %v2529_v53  ;;  %v3789_v53 = vld [vmem:[%s4029_s20 + $0x20] sm:$0xff] }
 0x41c   : > { %v2062_v34 = vadd.f32 %v5179_v7, %v1828_v54  ;;  %v5604_v7 = vld [vmem:[#allocation73_spill] sm:$0xff] }
 0x41d   : > { %3081 = vst [vmem:[%s5304_s19 + $0x8] sm:$0xff] %v3049_v45  ;;  %v2799_v56 = vadd.f32 %v5111_v2, %v2763_v57  ;;  %v1596_v10 = vadd.f32 %v5605_v16, %v5604_v7  ;;  %v5608_v57 = vld [vmem:[#allocation45_spill] sm:$0xff] }
 0x41e   : > { %v2247_v18 = vpop.f32.mrf.mxu3  ;;  %v2941_v0 = vpop.f32.mrf.mxu2 }
 0x41f   : > { %v2296_v26 = vadd.f32 %v2247_v18, %v2061_v39  ;;  %v2942_v33 = vadd.f32 %v5291_v1, %v2941_v0  ;;  %v2831_v50 = vmax.f32 %v2799_v56, 0.0  ;;  %v2491_v18 = vpop.f32.mrf.mxu0  ;;  %v5607_v0 = vld [vmem:[#allocation74_spill] sm:$0xff]  ;;  %v5609_v56 = vld [vmem:[#allocation64_spill] sm:$0xff] }
 0x420   : > { %v1597_v28 = vadd.f32 %v5608_v57, %v5607_v0  ;;  %v5616_v57 = vld [vmem:[#allocation77_spill] sm:$0xff] }
 0x421   : > { %v2530_v24 = vadd.f32 %v2481_v35, %v2296_v26  ;;  %v3018_v51 = vadd.f32 %v3787_v5, %v2942_v33 }
 0x422   : > { %v1831_v61 = vadd.f32 %v5609_v56, %v1597_v28  ;;  %v5617_v28 = vld [vmem:[#allocation50_spill] sm:$0xff] }
 0x423   : > { %v2764_v31 = vadd.f32 %v2715_v63, %v2530_v24  ;;  %v3050_v32 = vmax.f32 %v3018_v51, 0.0  ;;  %v3788_v63 = vld [vmem:[%s4029_s20 + $0x18] sm:$0xff]  ;;  %v2725_v24 = vpop.f32.mrf.mxu1 }
 0x425   : > { %3082 = vst [vmem:[%s5304_s19 + $0x10] sm:$0xff] %v3050_v32  ;;  %v2800_v19 = vadd.f32 %v5111_v2, %v2764_v31 }
 0x426   : > { %v2250_v17 = vpop.f32.mrf.mxu3  ;;  %v2943_v35 = vpop.f32.mrf.mxu2 }
 0x427   : > { %v2297_v59 = vadd.f32 %v2250_v17, %v2062_v34  ;;  %v2944_v36 = vadd.f32 %v5291_v1, %v2943_v35  ;;  %v2832_v43 = vmax.f32 %v2800_v19, 0.0  ;;  %v5611_v34 = vld [vmem:[#allocation46_spill] sm:$0xff]  ;;  %v2065_v17 = vadd.f32 %v5224_v42, %v1831_v61  ;;  %v5613_v42 = vld [vmem:[#allocation76_spill] sm:$0xff] }
 0x429   : > { %v3019_v4 = vadd.f32 %v3788_v63, %v2944_v36  ;;  %v2853_v46 = vpack.c.bf16 %v2832_v43, %v2831_v50  ;;  %v2531_v12 = vadd.f32 %v2484_v40, %v2297_v59  ;;  %v5606_v40 = vld [vmem:[#allocation63_spill] sm:$0xff]  ;;  %v2494_v36 = vpop.f32.mrf.mxu0 }
 0x42a   : > { %v1830_v44 = vadd.f32 %v5606_v40, %v1596_v10  ;;  %v5614_v10 = vld [vmem:[#allocation48_spill] sm:$0xff] }
 0x42b   : > { %v3051_v29 = vmax.f32 %v3019_v4, 0.0  ;;  %2985 = vmatmul.bf16.gmra.mxu2 %v2853_v46  ;;  %v2765_v20 = vadd.f32 %v2718_v6, %v2531_v12  ;;  %v2728_v4 = vpop.f32.mrf.mxu1  ;;  %v3792_v40 = vld [vmem:[%s4029_s20 + $0x38] sm:$0xff] }
 0x42c   : > { %v2064_v6 = vadd.f32 %v5209_v25, %v1830_v44  ;;  %v5610_v25 = vld [vmem:[#allocation75_spill] sm:$0xff] }
 0x42d   : > { %3083 = vst [vmem:[%s5304_s19 + $0x18] sm:$0xff] %v3051_v29  ;;  %v2801_v39 = vadd.f32 %v5111_v2, %v2765_v20  ;;  %v1598_v19 = vadd.f32 %v5611_v34, %v5610_v25  ;;  %v5619_v25 = vld [vmem:[#allocation78_spill] sm:$0xff] }
 0x42e   : > { %v2252_v41 = vpop.f32.mrf.mxu3  ;;  %v2946_v13 = vpop.f32.mrf.mxu2 }
 0x42f   : > { %v2298_v60 = vadd.f32 %v2252_v41, %v2063_v27  ;;  %v2947_v49 = vadd.f32 %v5291_v1, %v2946_v13  ;;  %v2833_v30 = vmax.f32 %v2801_v39, 0.0  ;;  %v1599_v27 = vadd.f32 %v5614_v10, %v5613_v42  ;;  %v5623_v42 = vld [vmem:[#allocation54_spill] sm:$0xff] }
 0x431   : > { %v2532_v37 = vadd.f32 %v2486_v38, %v2298_v60  ;;  %v3020_v45 = vadd.f32 %v3789_v53, %v2947_v49 }
 0x433   : > { %v2766_v55 = vadd.f32 %v2720_v58, %v2532_v37  ;;  %v3052_v48 = vmax.f32 %v3020_v45, 0.0  ;;  %v3790_v58 = vld [vmem:[%s4029_s20 + $0x28] sm:$0xff]  ;;  %v2496_v45 = vpop.f32.mrf.mxu0 }
 0x435   : > { %3084 = vst [vmem:[%s5304_s19 + $0x20] sm:$0xff] %v3052_v48  ;;  %v2802_v26 = vadd.f32 %v5111_v2, %v2766_v55  ;;  %v5615_v48 = vld [vmem:[#allocation66_spill] sm:$0xff] }
 0x436   : > { %v2255_v33 = vpop.f32.mrf.mxu3  ;;  %v2948_v38 = vpop.f32.mrf.mxu2  ;;  %v1833_v39 = vadd.f32 %v5615_v48, %v1599_v27 }
 0x437   : > { %v2299_v5 = vadd.f32 %v2255_v33, %v2064_v6  ;;  %v2949_v51 = vadd.f32 %v5291_v1, %v2948_v38  ;;  %v2834_v54 = vmax.f32 %v2802_v26, 0.0  ;;  %v1600_v6 = vadd.f32 %v5617_v28, %v5616_v57 }
 0x438   : > { %v2067_v26 = vadd.f32 %v5246_v22, %v1833_v39  ;;  %v5620_v22 = vld [vmem:[#allocation52_spill] sm:$0xff] }
 0x439   : > { %v3021_v31 = vadd.f32 %v3790_v58, %v2949_v51  ;;  %v2854_v32 = vpack.c.bf16 %v2834_v54, %v2833_v30  ;;  %v2533_v52 = vadd.f32 %v2489_v23, %v2299_v5  ;;  %v5612_v23 = vld [vmem:[#allocation65_spill] sm:$0xff]  ;;  %v1601_v34 = vadd.f32 %v5620_v22, %v5619_v25 }
 0x43a   : > { %v1832_v12 = vadd.f32 %v5612_v23, %v1598_v19  ;;  %v3793_v54 = vld [vmem:[%s4029_s20 + $0x40] sm:$0xff]  ;;  %v5621_v23 = vld [vmem:[#allocation68_spill] sm:$0xff] }
 0x43b   : > { %v3053_v21 = vmax.f32 %v3021_v31, 0.0  ;;  %2990 = vmatmul.bf16.gmra.mxu2 %v2854_v32  ;;  %v2767_v50 = vadd.f32 %v2723_v47, %v2533_v52  ;;  %v5618_v31 = vld [vmem:[#allocation67_spill] sm:$0xff]  ;;  %v2499_v56 = vpop.f32.mrf.mxu0 }
 0x43c   : > { %v2066_v47 = vadd.f32 %v5235_v9, %v1832_v12  ;;  %v1834_v32 = vadd.f32 %v5618_v31, %v1600_v6  ;;  %v1835_v12 = vadd.f32 %v5621_v23, %v1601_v34  ;;  %v5627_v31 = vld [vmem:[#allocation70_spill] sm:$0xff] }
 0x43d   : > { %3085 = vst [vmem:[%s5304_s19 + $0x28] sm:$0xff] %v3053_v21  ;;  %v2803_v16 = vadd.f32 %v5111_v2, %v2767_v50  ;;  %v3798_v23 = vld [vmem:[%s4029_s20 + $0x68] sm:$0xff] }
 0x43e   : > { %v2257_v35 = vpop.f32.mrf.mxu3  ;;  %v2951_v59 = vpop.f32.mrf.mxu2  ;;  %v2069_v27 = vadd.f32 %v5266_v8, %v1835_v12 }
 0x43f   : > { %v2300_v43 = vadd.f32 %v2257_v35, %v2065_v17  ;;  %v2952_v63 = vadd.f32 %v5291_v1, %v2951_v59  ;;  %v2835_v37 = vmax.f32 %v2803_v16, 0.0  ;;  %v2068_v17 = vadd.f32 %v5257_v3, %v1834_v32  ;;  %v5622_v16 = vld [vmem:[#allocation79_spill] sm:$0xff] }
 0x440   : > { %v1602_v10 = vadd.f32 %v5623_v42, %v5622_v16 }
 0x441   : > { %v2534_v46 = vadd.f32 %v2491_v18, %v2300_v43  ;;  %v3022_v14 = vadd.f32 %v3791_v15, %v2952_v63  ;;  %v2730_v18 = vpop.f32.mrf.mxu1 }
 0x443   : > { %v2768_v29 = vadd.f32 %v2725_v24, %v2534_v46  ;;  %v3054_v7 = vmax.f32 %v3022_v14, 0.0  ;;  %v3794_v46 = vld [vmem:[%s4029_s20 + $0x48] sm:$0xff]  ;;  %v2501_v3 = vpop.f32.mrf.mxu0 }
 0x445   : > { %3086 = vst [vmem:[%s5304_s19 + $0x30] sm:$0xff] %v3054_v7  ;;  %v2804_v41 = vadd.f32 %v5111_v2, %v2768_v29 }
 0x446   : > { %v2260_v13 = vpop.f32.mrf.mxu3  ;;  %v2953_v20 = vpop.f32.mrf.mxu2 }
 0x447   : > { %v2301_v60 = vadd.f32 %v2260_v13, %v2066_v47  ;;  %v2954_v49 = vadd.f32 %v5291_v1, %v2953_v20  ;;  %v2836_v53 = vmax.f32 %v2804_v41, 0.0 }
 0x449   : > { %v3023_v44 = vadd.f32 %v3792_v40, %v2954_v49  ;;  %v2855_v55 = vpack.c.bf16 %v2836_v53, %v2835_v37  ;;  %v2535_v0 = vadd.f32 %v2494_v36, %v2301_v60  ;;  %v2733_v19 = vpop.f32.mrf.mxu1  ;;  %v3795_v53 = vld [vmem:[%s4029_s20 + $0x50] sm:$0xff]  ;;  %v5624_v40 = vld [vmem:[#allocation69_spill] sm:$0xff] }
 0x44b   : > { %v3055_v9 = vmax.f32 %v3023_v44, 0.0  ;;  %2995 = vmatmul.bf16.gmra.mxu2 %v2855_v55  ;;  %v2769_v24 = vadd.f32 %v2728_v4, %v2535_v0  ;;  %v1836_v44 = vadd.f32 %v5624_v40, %v1602_v10  ;;  %v5626_v0 = vld [vmem:[#allocation56_spill] sm:$0xff] }
 0x44d   : > { %3087 = vst [vmem:[%s5304_s19 + $0x38] sm:$0xff] %v3055_v9  ;;  %v2805_v21 = vadd.f32 %v5111_v2, %v2769_v24  ;;  %v2504_v9 = vpop.f32.mrf.mxu0  ;;  %v2070_v57 = vadd.f32 %v5274_v11, %v1836_v44 }
 0x44e   : > { %v2262_v33 = vpop.f32.mrf.mxu3  ;;  %v2956_v38 = vpop.f32.mrf.mxu2 }
 0x44f   : > { %v2302_v5 = vadd.f32 %v2262_v33, %v2067_v26  ;;  %v2957_v51 = vadd.f32 %v5291_v1, %v2956_v38  ;;  %v2837_v63 = vmax.f32 %v2805_v21, 0.0 }
 0x451   : > { %v2536_v30 = vadd.f32 %v2496_v45, %v2302_v5  ;;  %v3024_v58 = vadd.f32 %v3793_v54, %v2957_v51  ;;  %v2735_v49 = vpop.f32.mrf.mxu1 }
 0x453   : > { %v2770_v61 = vadd.f32 %v2730_v18, %v2536_v30  ;;  %v3056_v52 = vmax.f32 %v3024_v58, 0.0  ;;  %v5625_v18 = vld [vmem:[#allocation80_spill] sm:$0xff] }
 0x454   : > { %v1603_v8 = vadd.f32 %v5626_v0, %v5625_v18  ;;  %v3796_v30 = vld [vmem:[%s4029_s20 + $0x58] sm:$0xff] }
 0x455   : > { %3088 = vst [vmem:[%s5304_s19 + $0x40] sm:$0xff] %v3056_v52  ;;  %v2806_v35 = vadd.f32 %v5111_v2, %v2770_v61 }
 0x456   : > { %v2265_v59 = vpop.f32.mrf.mxu3  ;;  %v2958_v36 = vpop.f32.mrf.mxu2  ;;  %v1837_v32 = vadd.f32 %v5627_v31, %v1603_v8  ;;  %v3803_v8 = vld [vmem:[%s4029_s20 + $0x90] sm:$0xff] }
 0x457   : > { %v2303_v50 = vadd.f32 %v2265_v59, %v2068_v17  ;;  %v2959_v43 = vadd.f32 %v5291_v1, %v2958_v36  ;;  %v2838_v4 = vmax.f32 %v2806_v35, 0.0  ;;  %v3797_v35 = vld [vmem:[%s4029_s20 + $0x60] sm:$0xff] }
 0x458   : > { %v2071_v11 = vadd.f32 %v5285_v62, %v1837_v32  ;;  %v3806_v32 = vld [vmem:[%s4029_s20 + $0xa8] sm:$0xff] }
 0x459   : > { %v3025_v15 = vadd.f32 %v3794_v46, %v2959_v43  ;;  %v2856_v14 = vpack.c.bf16 %v2838_v4, %v2837_v63  ;;  %v2537_v29 = vadd.f32 %v2499_v56, %v2303_v50  ;;  %v2738_v51 = vpop.f32.mrf.mxu1 }
 0x45b   : > { %v3057_v7 = vmax.f32 %v3025_v15, 0.0  ;;  %3000 = vmatmul.bf16.gmra.mxu2 %v2856_v14  ;;  %v2771_v13 = vadd.f32 %v2733_v19, %v2537_v29  ;;  %v2506_v19 = vpop.f32.mrf.mxu0 }
 0x45d   : > { %3089 = vst [vmem:[%s5304_s19 + $0x48] sm:$0xff] %v3057_v7  ;;  %v2807_v39 = vadd.f32 %v5111_v2, %v2771_v13 }
 0x45e   : > { %v2267_v47 = vpop.f32.mrf.mxu3  ;;  %v2961_v41 = vpop.f32.mrf.mxu2 }
 0x45f   : > { %v2304_v20 = vadd.f32 %v2267_v47, %v2069_v27  ;;  %v2962_v60 = vadd.f32 %v5291_v1, %v2961_v41  ;;  %v2839_v24 = vmax.f32 %v2807_v39, 0.0  ;;  %v3800_v41 = vld [vmem:[%s4029_s20 + $0x78] sm:$0xff] }
 0x461   : > { %v2538_v37 = vadd.f32 %v2501_v3, %v2304_v20  ;;  %v3026_v45 = vadd.f32 %v3795_v53, %v2962_v60  ;;  %v2740_v36 = vpop.f32.mrf.mxu1 }
 0x463   : > { %v2772_v55 = vadd.f32 %v2735_v49, %v2538_v37  ;;  %v3058_v48 = vmax.f32 %v3026_v45, 0.0  ;;  %v3801_v37 = vld [vmem:[%s4029_s20 + $0x80] sm:$0xff] }
 0x465   : > { %3090 = vst [vmem:[%s5304_s19 + $0x50] sm:$0xff] %v3058_v48  ;;  %v2808_v28 = vadd.f32 %v5111_v2, %v2772_v55  ;;  %v3802_v55 = vld [vmem:[%s4029_s20 + $0x88] sm:$0xff] }
 0x466   : > { %v2270_v6 = vpop.f32.mrf.mxu3  ;;  %v2963_v26 = vpop.f32.mrf.mxu2 }
 0x467   : > { %v2305_v33 = vadd.f32 %v2270_v6, %v2070_v57  ;;  %v2964_v38 = vadd.f32 %v5291_v1, %v2963_v26  ;;  %v2840_v5 = vmax.f32 %v2808_v28, 0.0  ;;  %v3804_v26 = vld [vmem:[%s4029_s20 + $0x98] sm:$0xff] }
 0x469   : > { %v3027_v54 = vadd.f32 %v3796_v30, %v2964_v38  ;;  %v2857_v58 = vpack.c.bf16 %v2840_v5, %v2839_v24  ;;  %v2539_v56 = vadd.f32 %v2504_v9, %v2305_v33 }
 0x46b   : > { %v3059_v61 = vmax.f32 %v3027_v54, 0.0  ;;  %3005 = vmatmul.bf16.gmra.mxu2 %v2857_v58  ;;  %v2773_v25 = vadd.f32 %v2738_v51, %v2539_v56  ;;  %v3805_v51 = vld [vmem:[%s4029_s20 + $0xa0] sm:$0xff] }
 0x46d   : > { %3091 = vst [vmem:[%s5304_s19 + $0x58] sm:$0xff] %v3059_v61  ;;  %v2809_v63 = vadd.f32 %v5111_v2, %v2773_v25 }
 0x46e   : > { %v2272_v52 = vpop.f32.mrf.mxu3  ;;  %v2966_v21 = vpop.f32.mrf.mxu2 }
 0x46f   : > { %v2306_v22 = vadd.f32 %v2272_v52, %v2071_v11  ;;  %v2967_v34 = vadd.f32 %v5291_v1, %v2966_v21  ;;  %v2841_v15 = vmax.f32 %v2809_v63, 0.0  ;;  %v3807_v21 = vld [vmem:[%s4029_s20 + $0xb0] sm:$0xff] }
 0x471   : > { %v2540_v17 = vadd.f32 %v2506_v19, %v2306_v22  ;;  %v3028_v59 = vadd.f32 %v3797_v35, %v2967_v34 }
 0x473   : > { %v2774_v50 = vadd.f32 %v2740_v36, %v2540_v17  ;;  %v3060_v43 = vmax.f32 %v3028_v59, 0.0  ;;  %v3808_v17 = vld [vmem:[%s4029_s20 + $0xb8] sm:$0xff] }
 0x475   : > { %3092 = vst [vmem:[%s5304_s19 + $0x60] sm:$0xff] %v3060_v43  ;;  %v2810_v62 = vadd.f32 %v5111_v2, %v2774_v50  ;;  %v3799_v2 = vld [vmem:[%s4029_s20 + $0x70] sm:$0xff]  ;;  %v3809_v43 = vld [vmem:[%s4029_s20 + $0xc0] sm:$0xff] }
 0x476   : > { %v2968_v4 = vpop.f32.mrf.mxu2 }
 0x477   : > { %v2969_v46 = vadd.f32 %v5291_v1, %v2968_v4  ;;  %v2842_v14 = vmax.f32 %v2810_v62, 0.0 }
 0x479   : > { %v3029_v12 = vadd.f32 %v3798_v23, %v2969_v46  ;;  %v2858_v29 = vpack.c.bf16 %v2842_v14, %v2841_v15  ;;  %v3810_v15 = vld [vmem:[%s4029_s20 + $0xc8] sm:$0xff] }
 0x47b   : > { %v3061_v7 = vmax.f32 %v3029_v12, 0.0  ;;  %3010 = vmatmul.bf16.gmra.mxu2 %v2858_v29 }
 0x47d   : > { %3093 = vst [vmem:[%s5304_s19 + $0x68] sm:$0xff] %v3061_v7  ;;  %v3811_v7 = vld [vmem:[%s4029_s20 + $0xd0] sm:$0xff] }
 0x47e   : > { %v2971_v3 = vpop.f32.mrf.mxu2 }
 0x47f   : > { %v2972_v16 = vadd.f32 %v5291_v1, %v2971_v3 }
 0x481   : > { %v3030_v42 = vadd.f32 %v3799_v2, %v2972_v16 }
 0x483   : > { %v3062_v10 = vmax.f32 %v3030_v42, 0.0 }
 0x485   : > { %3094 = vst [vmem:[%s5304_s19 + $0x70] sm:$0xff] %v3062_v10  ;;  %v3812_v10 = vld [vmem:[%s4029_s20 + $0xd8] sm:$0xff] }
 0x486   : > { %v2973_v27 = vpop.f32.mrf.mxu2 }
 0x487   : > { %v2974_v47 = vadd.f32 %v5291_v1, %v2973_v27 }
 0x489   : > { %v3031_v13 = vadd.f32 %v3800_v41, %v2974_v47 }
 0x48b   : > { %v3063_v20 = vmax.f32 %v3031_v13, 0.0 }
 0x48d   : > { %3095 = vst [vmem:[%s5304_s19 + $0x78] sm:$0xff] %v3063_v20  ;;  %v3813_v20 = vld [vmem:[%s4029_s20 + $0xe0] sm:$0xff] }
 0x48e   : > { %v2976_v60 = vpop.f32.mrf.mxu2 }
 0x48f   : > { %v2977_v49 = vadd.f32 %v5291_v1, %v2976_v60 }
 0x491   : > { %v3032_v53 = vadd.f32 %v3801_v37, %v2977_v49 }
 0x493   : > { %v3064_v45 = vmax.f32 %v3032_v53, 0.0 }
 0x495   : > { %3096 = vst [vmem:[%s5304_s19 + $0x80] sm:$0xff] %v3064_v45  ;;  %v3814_v45 = vld [vmem:[%s4029_s20 + $0xe8] sm:$0xff] }
 0x496   : > { %v2978_v40 = vpop.f32.mrf.mxu2 }
 0x497   : > { %v2979_v44 = vadd.f32 %v5291_v1, %v2978_v40 }
 0x499   : > { %v3033_v48 = vadd.f32 %v3802_v55, %v2979_v44 }
 0x49b   : > { %v3065_v39 = vmax.f32 %v3033_v48, 0.0 }
 0x49d   : > { %3097 = vst [vmem:[%s5304_s19 + $0x88] sm:$0xff] %v3065_v39  ;;  %v3815_v39 = vld [vmem:[%s4029_s20 + $0xf0] sm:$0xff] }
 0x49e   : > { %v2981_v18 = vpop.f32.mrf.mxu2 }
 0x49f   : > { %v2982_v0 = vadd.f32 %v5291_v1, %v2981_v18 }
 0x4a1   : > { %v3034_v9 = vadd.f32 %v3803_v8, %v2982_v0 }
 0x4a3   : > { %v3066_v57 = vmax.f32 %v3034_v9, 0.0 }
 0x4a5   : > { %3098 = vst [vmem:[%s5304_s19 + $0x90] sm:$0xff] %v3066_v57  ;;  %v3816_v57 = vld [vmem:[%s4029_s20 + $0xf8] sm:$0xff] }
 0x4a6   : > { %v2983_v28 = vpop.f32.mrf.mxu2 }
 0x4a7   : > { %v2984_v6 = vadd.f32 %v5291_v1, %v2983_v28 }
 0x4a9   : > { %v3035_v33 = vadd.f32 %v3804_v26, %v2984_v6 }
 0x4ab   : > { %v3067_v38 = vmax.f32 %v3035_v33, 0.0 }
 0x4ad   : > { %3099 = vst [vmem:[%s5304_s19 + $0x98] sm:$0xff] %v3067_v38 }
 0x4ae   : > { %v2986_v24 = vpop.f32.mrf.mxu2 }
 0x4af   : > { %v2987_v5 = vadd.f32 %v5291_v1, %v2986_v24 }
 0x4b1   : > { %v3036_v30 = vadd.f32 %v3805_v51, %v2987_v5 }
 0x4b3   : > { %v3068_v54 = vmax.f32 %v3036_v30, 0.0 }
 0x4b5   : > { %3100 = vst [vmem:[%s5304_s19 + $0xa0] sm:$0xff] %v3068_v54 }
 0x4b6   : > { %v2988_v58 = vpop.f32.mrf.mxu2 }
 0x4b7   : > { %v2989_v31 = vadd.f32 %v5291_v1, %v2988_v58 }
 0x4b9   : > { %v3037_v56 = vadd.f32 %v3806_v32, %v2989_v31 }
 0x4bb   : > { %v3069_v61 = vmax.f32 %v3037_v56, 0.0 }
 0x4bd   : > { %3101 = vst [vmem:[%s5304_s19 + $0xa8] sm:$0xff] %v3069_v61 }
 0x4be   : > { %v2991_v11 = vpop.f32.mrf.mxu2 }
 0x4bf   : > { %v2992_v52 = vadd.f32 %v5291_v1, %v2991_v11 }
 0x4c1   : > { %v3038_v25 = vadd.f32 %v3807_v21, %v2992_v52 }
 0x4c3   : > { %v3070_v22 = vmax.f32 %v3038_v25, 0.0 }
 0x4c5   : > { %3102 = vst [vmem:[%s5304_s19 + $0xb0] sm:$0xff] %v3070_v22 }
 0x4c6   : > { %v2993_v34 = vpop.f32.mrf.mxu2 }
 0x4c7   : > { %v2994_v19 = vadd.f32 %v5291_v1, %v2993_v34 }
 0x4c9   : > { %v3039_v35 = vadd.f32 %v3808_v17, %v2994_v19 }
 0x4cb   : > { %v3071_v59 = vmax.f32 %v3039_v35, 0.0 }
 0x4cd   : > { %3103 = vst [vmem:[%s5304_s19 + $0xb8] sm:$0xff] %v3071_v59 }
 0x4ce   : > { %v2996_v36 = vpop.f32.mrf.mxu2 }
 0x4cf   : > { %v2997_v50 = vadd.f32 %v5291_v1, %v2996_v36 }
 0x4d1   : > { %v3040_v63 = vadd.f32 %v3809_v43, %v2997_v50 }
 0x4d3   : > { %v3072_v62 = vmax.f32 %v3040_v63, 0.0 }
 0x4d5   : > { %3104 = vst [vmem:[%s5304_s19 + $0xc0] sm:$0xff] %v3072_v62 }
 0x4d6   : > { %v2998_v4 = vpop.f32.mrf.mxu2 }
 0x4d7   : > { %v2999_v46 = vadd.f32 %v5291_v1, %v2998_v4 }
 0x4d9   : > { %v3041_v14 = vadd.f32 %v3810_v15, %v2999_v46 }
 0x4db   : > { %v3073_v23 = vmax.f32 %v3041_v14, 0.0 }
 0x4dd   : > { %3105 = vst [vmem:[%s5304_s19 + $0xc8] sm:$0xff] %v3073_v23 }
 0x4de   : > { %v3001_v12 = vpop.f32.mrf.mxu2 }
 0x4df   : > { %v3002_v29 = vadd.f32 %v5291_v1, %v3001_v12 }
 0x4e1   : > { %v3042_v3 = vadd.f32 %v3811_v7, %v3002_v29 }
 0x4e3   : > { %v3074_v16 = vmax.f32 %v3042_v3, 0.0 }
 0x4e5   : > { %3106 = vst [vmem:[%s5304_s19 + $0xd0] sm:$0xff] %v3074_v16 }
 0x4e6   : > { %v3003_v2 = vpop.f32.mrf.mxu2 }
 0x4e7   : > { %v3004_v42 = vadd.f32 %v5291_v1, %v3003_v2 }
 0x4e9   : > { %v3043_v27 = vadd.f32 %v3812_v10, %v3004_v42 }
 0x4eb   : > { %v3075_v47 = vmax.f32 %v3043_v27, 0.0 }
 0x4ed   : > { %3107 = vst [vmem:[%s5304_s19 + $0xd8] sm:$0xff] %v3075_v47 }
 0x4ee   : > { %v3006_v41 = vpop.f32.mrf.mxu2 }
 0x4ef   : > { %v3007_v13 = vadd.f32 %v5291_v1, %v3006_v41 }
 0x4f1   : > { %v3044_v60 = vadd.f32 %v3813_v20, %v3007_v13 }
 0x4f3   : > { %v3076_v49 = vmax.f32 %v3044_v60, 0.0 }
 0x4f5   : > { %3108 = vst [vmem:[%s5304_s19 + $0xe0] sm:$0xff] %v3076_v49 }
 0x4f6   : > { %v3008_v37 = vpop.f32.mrf.mxu2 }
 0x4f7   : > { %v3009_v53 = vadd.f32 %v5291_v1, %v3008_v37 }
 0x4f9   : > { %v3045_v40 = vadd.f32 %v3814_v45, %v3009_v53 }
 0x4fb   : > { %v3077_v44 = vmax.f32 %v3045_v40, 0.0 }
 0x4fd   : > { %3109 = vst [vmem:[%s5304_s19 + $0xe8] sm:$0xff] %v3077_v44 }
 0x4fe   : > { %v3011_v55 = vpop.f32.mrf.mxu2 }
 0x4ff   : > { %v3012_v48 = vadd.f32 %v5291_v1, %v3011_v55 }
 0x501   : > { %v3046_v18 = vadd.f32 %v3815_v39, %v3012_v48 }
 0x503   : > { %v3078_v0 = vmax.f32 %v3046_v18, 0.0 }
 0x505   : > { %3110 = vst [vmem:[%s5304_s19 + $0xf0] sm:$0xff] %v3078_v0 }
 0x506   : > { %v3013_v8 = vpop.f32.mrf.mxu2 }
 0x507   : > { %v3014_v9 = vadd.f32 %v5291_v1, %v3013_v8 }
 0x509   : > { %v3047_v28 = vadd.f32 %v3816_v57, %v3014_v9 }
 0x50b   : > { %v3079_v6 = vmax.f32 %v3047_v28, 0.0 }
 0x50d   : > { %3111 = vst [vmem:[%s5304_s19 + $0xf8] sm:$0xff] %v3079_v6 }
 0x50e PF: > { %s17_s24 = sadd.s32 1, %s3947_s24  }
 0x50f   : > { %p14_p4 = scmp.ge.s32.totalorder %s17_s24, 4  }
 0x511   :  { %16 = sbr.rel (!%p14_p4) target bundleno = 1 (0x1), region = 89 }

</bundles_post_ra>
